<compile_context>
chip_gen: v5e
topology: v5e:2x2
jax: 0.10.0
libtpu: 0.0.40
codegen_flags: <defaults>
</compile_context>

<pallas_src>
import jax
import jax.numpy as jnp
from jax.experimental import pallas as pl
from jax.experimental.pallas import tpu as pltpu

IN_DIM = 192
HID_DIM = 1024
OUT_DIM = 1024


def _mlp_kernel(x_ref, w1_ref, b1_ref, w2_ref, b2_ref, o_ref):
    # x tile arrives already as bf16 (cast once in the wrapper).
    h = jnp.dot(x_ref[...], w1_ref[...], preferred_element_type=jnp.float32)
    h = jnp.maximum(h + b1_ref[...].astype(jnp.float32), 0.0)   # (bm,1024)+(1,1024)
    out = jnp.dot(h.astype(jnp.bfloat16), w2_ref[...],
                  preferred_element_type=jnp.float32)
    out = out + b2_ref[...].astype(jnp.float32)
    o_ref[...] = out.astype(o_ref.dtype)


def wav2vec_classifier_forward(input_values, w1, b1, w2, b2, *,
                               block_b=1024, out_dtype=jnp.float32):
    """input_values: (B, 1, 192) or (B, 192) -> logits (B, 1024).

    Weights are (in_features, out_features) (i.e. PyTorch weight.T), bf16.
    """
    # torch.squeeze equivalent, done safely: explicit reshape keeps the batch
    # dim even when B == 1 (plain squeeze() would also drop it).
    if input_values.ndim == 3:
        x = input_values.reshape(input_values.shape[0], IN_DIM)
    else:
        x = input_values
    B = x.shape[0]

    # Stream x in bf16 (matches the reference numerics, halves the x DMA).
    x = x.astype(jnp.bfloat16)
    w1 = w1.astype(jnp.bfloat16)
    w2 = w2.astype(jnp.bfloat16)
    b1_2d = b1.astype(jnp.bfloat16).reshape(1, HID_DIM)
    b2_2d = b2.astype(jnp.bfloat16).reshape(1, OUT_DIM)

    # Batch tile: full batch if it fits, otherwise a multiple-of-8 tile and a
    # cdiv grid with a clipped last tile (no pad / slice passes over HBM).
    if B <= block_b:
        bm = B
    else:
        bm = max(8, (block_b // 8) * 8)
    grid_b = pl.cdiv(B, bm)

    out_itemsize = jnp.dtype(out_dtype).itemsize
    weight_bytes = 2 * (w1.size + w2.size + b1_2d.size + b2_2d.size)
    bytes_accessed = (weight_bytes
                      + B * IN_DIM * 2              # bf16 x stream
                      + B * OUT_DIM * out_itemsize)  # logits stream
    cost = pl.CostEstimate(
        flops=2 * B * (IN_DIM * HID_DIM + HID_DIM * OUT_DIM),
        transcendentals=0,
        bytes_accessed=bytes_accessed,
    )

    out = pl.pallas_call(
        _mlp_kernel,
        out_shape=jax.ShapeDtypeStruct((B, OUT_DIM), out_dtype),
        grid=(grid_b,),
        in_specs=[
            pl.BlockSpec((bm, IN_DIM), lambda i: (i, 0)),          # x tile (bf16)
            pl.BlockSpec((IN_DIM, HID_DIM), lambda i: (0, 0)),     # W1 resident
            pl.BlockSpec((1, HID_DIM), lambda i: (0, 0)),          # b1 resident
            pl.BlockSpec((HID_DIM, OUT_DIM), lambda i: (0, 0)),    # W2 resident
            pl.BlockSpec((1, OUT_DIM), lambda i: (0, 0)),          # b2 resident
        ],
        out_specs=pl.BlockSpec((bm, OUT_DIM), lambda i: (i, 0)),
        compiler_params=pltpu.CompilerParams(
            # Batch axis is fully independent (no reduction): always safe to
            # megacore-shard; no-op on single-TC chips (v5e/v6e).
            dimension_semantics=("parallel",),
            # ~20 MiB double-buffered footprint at bm=1024; 32 MiB leaves
            # headroom on every generation incl. v7x (64 MiB/TC physical).
            vmem_limit_bytes=32 << 20,
        ),
        cost_estimate=cost,
    )(x, w1, b1_2d, w2, b2_2d)
    return out


def _init_params(key):
    # Deterministic synthetic parameters (shapes from nn.Linear(192,1024),
    # nn.Linear(1024,1024)); stored as (in, out), bf16 for HBM-byte savings.
    k1, k2, k3, k4 = jax.random.split(key, 4)
    w1 = (jax.random.normal(k1, (IN_DIM, HID_DIM), jnp.float32) * 0.02).astype(jnp.bfloat16)
    b1 = (jax.random.normal(k2, (HID_DIM,), jnp.float32) * 0.01).astype(jnp.bfloat16)
    w2 = (jax.random.normal(k3, (HID_DIM, OUT_DIM), jnp.float32) * 0.02).astype(jnp.bfloat16)
    b2 = (jax.random.normal(k4, (OUT_DIM,), jnp.float32) * 0.01).astype(jnp.bfloat16)
    return w1, b1, w2, b2


def _reference(x, w1, b1, w2, b2):
    # Pure-JAX reference with the same numerics as the kernel:
    # bf16 operands, f32 accumulation.
    w1f = w1.astype(jnp.float32)
    w2f = w2.astype(jnp.float32)
    b1f = b1.astype(jnp.float32)
    b2f = b2.astype(jnp.float32)
    xq = x.astype(jnp.bfloat16).astype(jnp.float32)
    h = jnp.maximum(xq @ w1f + b1f, 0.0)
    hq = h.astype(jnp.bfloat16).astype(jnp.float32)
    return hq @ w2f + b2f


if __name__ == "__main__":
    key = jax.random.PRNGKey(0)
    kp, kx = jax.random.split(key)
    w1, b1, w2, b2 = _init_params(kp)

    # (B, block_b): B=1 exercises the squeeze(B==1) hazard fix; B=8 is the
    # tiny case; B=300 is a single full-batch tile; (300, block_b=128) forces
    # a 3-step grid with a clipped (44-row) last tile, i.e. the no-pad path.
    for B, blk in ((1, 1024), (8, 1024), (300, 1024), (300, 128)):
        kb = jax.random.fold_in(kx, B * 10000 + blk)
        input_values = jax.random.normal(kb, (B, 1, IN_DIM), jnp.float32)

        logits = wav2vec_classifier_forward(input_values, w1, b1, w2, b2,
                                            block_b=blk)
        logits = jax.block_until_ready(logits)

        x = input_values.reshape(B, IN_DIM)
        ref = _reference(x, w1, b1, w2, b2)
        assert logits.shape == (B, OUT_DIM), logits.shape
        assert logits.dtype == jnp.float32, logits.dtype
        assert jnp.allclose(logits, ref, atol=2e-3, rtol=2e-3), (
            f"mismatch at B={B}, blk={blk}: "
            f"max abs err {jnp.max(jnp.abs(logits - ref))}")

    # Optional bf16-logits path (halves the output HBM stream).
    kb = jax.random.fold_in(kx, 777)
    input_values = jax.random.normal(kb, (8, 1, IN_DIM), jnp.float32)
    logits_bf16 = wav2vec_classifier_forward(input_values, w1, b1, w2, b2,
                                             out_dtype=jnp.bfloat16)
    logits_bf16 = jax.block_until_ready(logits_bf16)
    ref = _reference(input_values.reshape(8, IN_DIM), w1, b1, w2, b2)
    assert logits_bf16.dtype == jnp.bfloat16
    assert jnp.allclose(logits_bf16.astype(jnp.float32), ref,
                        atol=2e-2, rtol=2e-2)

    print("KERNEL_OK")
</pallas_src>

<mosaic_0001>
module attributes {stable_mosaic.version = 11 : i64} {
  func.func @_mlp_kernel(%arg0: i32, %arg1: memref<1x192xbf16, #tpu.memory_space<vmem>>, %arg2: memref<192x1024xbf16, #tpu.memory_space<vmem>>, %arg3: memref<1x1024xbf16, #tpu.memory_space<vmem>>, %arg4: memref<1024x1024xbf16, #tpu.memory_space<vmem>>, %arg5: memref<1x1024xbf16, #tpu.memory_space<vmem>>, %arg6: memref<1x1024xf32, #tpu.memory_space<vmem>>) attributes {dimension_semantics = [#tpu.dimension_semantics<parallel>], iteration_bounds = array<i64: 1>, scalar_prefetch = 0 : i64, scratch_operands = 0 : i64, tpu.core_type = #tpu.core_type<tc>, window_params = [{transform_indices = @transform_0, window_bounds = array<i64: 1, 192>}, {pipeline_mode = #tpu.pipeline_mode<synchronous>, transform_indices = @transform_1, window_bounds = array<i64: 192, 1024>}, {pipeline_mode = #tpu.pipeline_mode<synchronous>, transform_indices = @transform_2, window_bounds = array<i64: 1, 1024>}, {pipeline_mode = #tpu.pipeline_mode<synchronous>, transform_indices = @transform_3, window_bounds = array<i64: 1024, 1024>}, {pipeline_mode = #tpu.pipeline_mode<synchronous>, transform_indices = @transform_4, window_bounds = array<i64: 1, 1024>}, {transform_indices = @transform_5, window_bounds = array<i64: 1, 1024>}]} {
    %c0 = arith.constant 0 : index
    %c0_0 = arith.constant 0 : index
    %0 = vector.load %arg1[%c0, %c0_0] : memref<1x192xbf16, #tpu.memory_space<vmem>>, vector<1x192xbf16>
    %c0_1 = arith.constant 0 : index
    %c0_2 = arith.constant 0 : index
    %1 = vector.load %arg2[%c0_1, %c0_2] : memref<192x1024xbf16, #tpu.memory_space<vmem>>, vector<192x1024xbf16>
    %cst = arith.constant dense<0.000000e+00> : vector<1x1024xf32>
    %2 = tpu.matmul %0, %1, %cst {dimension_numbers = #tpu.dot_dimension_numbers<[1], [0], [0], [1], [0, 0, 1, 1], [], []>} : vector<1x192xbf16>, vector<192x1024xbf16>, vector<1x1024xf32> -> vector<1x1024xf32>
    %c0_3 = arith.constant 0 : index
    %c0_4 = arith.constant 0 : index
    %3 = vector.load %arg3[%c0_3, %c0_4] : memref<1x1024xbf16, #tpu.memory_space<vmem>>, vector<1x1024xbf16>
    %4 = arith.extf %3 : vector<1x1024xbf16> to vector<1x1024xf32>
    %5 = arith.addf %2, %4 : vector<1x1024xf32>
    %cst_5 = arith.constant 0.000000e+00 : f32
    %6 = vector.broadcast %cst_5 : f32 to vector<1x1024xf32>
    %7 = arith.maximumf %5, %6 : vector<1x1024xf32>
    %8 = arith.truncf %7 : vector<1x1024xf32> to vector<1x1024xbf16>
    %c0_6 = arith.constant 0 : index
    %c0_7 = arith.constant 0 : index
    %9 = vector.load %arg4[%c0_6, %c0_7] : memref<1024x1024xbf16, #tpu.memory_space<vmem>>, vector<1024x1024xbf16>
    %cst_8 = arith.constant dense<0.000000e+00> : vector<1x1024xf32>
    %10 = tpu.matmul %8, %9, %cst_8 {dimension_numbers = #tpu.dot_dimension_numbers<[1], [0], [0], [1], [0, 0, 1, 1], [], []>} : vector<1x1024xbf16>, vector<1024x1024xbf16>, vector<1x1024xf32> -> vector<1x1024xf32>
    %c0_9 = arith.constant 0 : index
    %c0_10 = arith.constant 0 : index
    %11 = vector.load %arg5[%c0_9, %c0_10] : memref<1x1024xbf16, #tpu.memory_space<vmem>>, vector<1x1024xbf16>
    %12 = arith.extf %11 : vector<1x1024xbf16> to vector<1x1024xf32>
    %13 = arith.addf %10, %12 : vector<1x1024xf32>
    %c0_11 = arith.constant 0 : index
    %c0_12 = arith.constant 0 : index
    %14 = vector.load %arg6[%c0_11, %c0_12] : memref<1x1024xf32, #tpu.memory_space<vmem>>, vector<1x1024xf32>
    tpu.vector_store %arg6[%c0_11, %c0_12], %13 {strides = array<i32>} : memref<1x1024xf32, #tpu.memory_space<vmem>>, vector<1x1024xf32>,
    return
  }
  func.func @transform_0(%arg0: i32) -> (i32, i32) {
    %c0_i32 = arith.constant 0 : i32
    %c0_i32_0 = arith.constant 0 : i32
    return %arg0, %c0_i32 : i32, i32
  }
  func.func @transform_1(%arg0: i32) -> (i32, i32) {
    %c0_i32 = arith.constant 0 : i32
    %c0_i32_0 = arith.constant 0 : i32
    %c0_i32_1 = arith.constant 0 : i32
    return %c0_i32, %c0_i32_0 : i32, i32
  }
  func.func @transform_2(%arg0: i32) -> (i32, i32) {
    %c0_i32 = arith.constant 0 : i32
    %c0_i32_0 = arith.constant 0 : i32
    %c0_i32_1 = arith.constant 0 : i32
    return %c0_i32, %c0_i32_0 : i32, i32
  }
  func.func @transform_3(%arg0: i32) -> (i32, i32) {
    %c0_i32 = arith.constant 0 : i32
    %c0_i32_0 = arith.constant 0 : i32
    %c0_i32_1 = arith.constant 0 : i32
    return %c0_i32, %c0_i32_0 : i32, i32
  }
  func.func @transform_4(%arg0: i32) -> (i32, i32) {
    %c0_i32 = arith.constant 0 : i32
    %c0_i32_0 = arith.constant 0 : i32
    %c0_i32_1 = arith.constant 0 : i32
    return %c0_i32, %c0_i32_0 : i32, i32
  }
  func.func @transform_5(%arg0: i32) -> (i32, i32) {
    %c0_i32 = arith.constant 0 : i32
    %c0_i32_0 = arith.constant 0 : i32
    return %arg0, %c0_i32 : i32, i32
  }
}

</mosaic_0001>

<bundles_post_ra>
// kernel: tpu_custom_call.1
= control target key start
LH: loop header
LB: loop body
LE: loop exit
PB: predicated region body
PF: predicated region fallthrough
CT: control target
= control target key end

     0   :  { %10 = vsyncpa [#allocation3], 0  ;;  %s8351_s0 = inlined_call_operand.hbm [shape: bf16[1,192], index: 0, kind: input, shape index: {}]   ;;  %s8352_s1 = inlined_call_operand.hbm [shape: bf16[192,1024], index: 1, kind: input, shape index: {}]   ;;  %s8353_s2 = inlined_call_operand.hbm [shape: bf16[1,1024], index: 2, kind: input, shape index: {}]   ;;  %s8354_s3 = inlined_call_operand.hbm [shape: bf16[1024,1024], index: 3, kind: input, shape index: {}]   ;;  %s8355_s4 = inlined_call_operand.hbm [shape: bf16[1,1024], index: 4, kind: input, shape index: {}]   ;;  %s8356_s5 = inlined_call_operand.hbm [shape: f32[1,1024], index: 5, kind: output, shape index: {}]  }
   0x1   :  { %11 = vsyncpa [#allocation6], 0 }
   0x2   :  { %12 = vsyncpa [#allocation9], 0  ;;  %s29_s20 = sshll.u32 %s8352_s1, 4  ;;  %s30_s20 = int_to_ptr.hbm [resolvable:$true] %s29_s20 }
   0x3   :  { %13 = vsyncpa [#allocation4], 0  ;;  %s8108_s21 = smov [#allocation5]   ;;  %s53_s25 = sshll.u32 %s8354_s3, 4  ;;  %s54_s25 = int_to_ptr.hbm [resolvable:$true] %s53_s25 }
   0x4   :  { %s31_s22 = sshll.u32 %s8108_s21, 4  ;;  %s8109_s26 = smov 512   ;;  %s32_s22 = int_to_ptr.vmem [resolvable:$true] %s31_s22 }
   0x5   :  { %s8110_s27 = smov 32   ;;  %s8111_s28 = smov [#allocation8]  }
   0x6   :  { %37 = dma.hbm_to_vmem [thread:$0]  %s30_s20, 12288, %s32_s22, [#allocation6], %s8109_s26, %s8109_s26, %s8110_s27  }
   0x7   :  { %s55_s29 = sshll.u32 %s8111_s28, 4  ;;  %s19_s7 = sshll.u32 %s8351_s0, 4  ;;  %s56_s29 = int_to_ptr.vmem [resolvable:$true] %s55_s29  ;;  %s20_s7 = int_to_ptr.hbm [resolvable:$true] %s19_s7 }
   0x8   :  { %61 = dma.hbm_to_vmem [thread:$0]  %s54_s25, 65536, %s56_s29, [#allocation9], %s8109_s26, %s8109_s26, %s8110_s27  }
   0x9   :  { %s43_s9 = sshll.u32 %s8353_s2, 4  ;;  %s8112_s10 = smov [#allocation2]   ;;  %s44_s9 = int_to_ptr.hbm [resolvable:$true] %s43_s9 }
   0xa   :  { %s21_s11 = sshll.u32 %s8112_s10, 4  ;;  %s8113_s3 = smov [#allocation7]   ;;  %s22_s11 = int_to_ptr.vmem [resolvable:$true] %s21_s11 }
   0xb   :  { %24 = dma.hbm_to_vmem [thread:$0]  %s20_s7, 32, %s22_s11, [#allocation3]  }
   0xc   :  { %s45_s12 = sshll.u32 %s8113_s3, 4  ;;  %s67_s15 = sshll.u32 %s8355_s4, 4  ;;  %s46_s12 = int_to_ptr.vmem [resolvable:$true] %s45_s12  ;;  %s68_s15 = int_to_ptr.hbm [resolvable:$true] %s67_s15 }
   0xd   :  { %48 = dma.hbm_to_vmem [thread:$0]  %s44_s9, 128, %s46_s12, [#allocation6]  }
   0xe   :  { %s8114_s0 = smov [#allocation10]  }
   0xf   :  { %s69_s16 = sshll.u32 %s8114_s0, 4  ;;  %s70_s16 = int_to_ptr.vmem [resolvable:$true] %s69_s16 }
  0x10   :  { %72 = dma.hbm_to_vmem [thread:$0]  %s68_s15, 128, %s70_s16, [#allocation9]  }
  0x11   :  { %8100 = dma.done.wait [#allocation3], 32  }
  0x12   :  { %8101 = vsyncadd [#allocation3], 4294967264 }
  0x13   :  { %8102 = dma.done.wait [#allocation6], 12416  }
  0x14   :  { %8103 = vsyncadd [#allocation6], 4294954880 }
  0x15   :  { %8104 = dma.done.wait [#allocation9], 65664  }
  0x16   :  { %8105 = vsyncadd [#allocation9], 4294901632  ;;  %v5125_v0 = vld [vmem:[#allocation5 + $0x1c0] sm:$0xf]  ;;  %v7395_v5 = vld [vmem:[#allocation5 + $0x1c4] sm:$0xf] }
  0x17   :  { %v7399_v1 = vld [vmem:[#allocation5 + $0x1dc] sm:$0xf0]  ;;  %v5127_v6 = vld [vmem:[#allocation5 + $0x1e0] sm:$0xf0]  ;;  %v5133_v44 = vld [vmem:[#allocation5 + $0x1c8] sm:$0xf] }
  0x18   :  { %v5253_v2 = vld [vmem:[#allocation5 + $0x2c0] sm:$0xf]  ;;  %v5126_v3 = vor.u32 %v7399_v1, %v5125_v0  ;;  %v5130_v8 = vor.u32 %v7395_v5, %v5127_v6  ;;  %v7427_v9 = vld [vmem:[#allocation5 + $0x2c4] sm:$0xf]  ;;  %v7400_v46 = vld [vmem:[#allocation5 + $0x1e4] sm:$0xf0] }
  0x19   :  { %v7431_v4 = vld [vmem:[#allocation5 + $0x2dc] sm:$0xf0]  ;;  %v5255_v10 = vld [vmem:[#allocation5 + $0x2e0] sm:$0xf0]  ;;  %v5261_v47 = vld [vmem:[#allocation5 + $0x2c8] sm:$0xf]  ;;  %v5134_v54 = vor.u32 %v7400_v46, %v5133_v44 }
  0x1a   :  { %v5254_v7 = vor.u32 %v7431_v4, %v5253_v2  ;;  %v5093_v11 = vld [vmem:[#allocation5 + $0x180] sm:$0xf]  ;;  %700 = vmatpush.bf16.msra.mxu0 %v5126_v3  ;;  %v5258_v12 = vor.u32 %v7427_v9, %v5255_v10  ;;  %726 = vmatpush.bf16.msra.mxu2 %v5130_v8  ;;  %v7387_v18 = vld [vmem:[#allocation5 + $0x184] sm:$0xf]  ;;  %v7432_v48 = vld [vmem:[#allocation5 + $0x2e4] sm:$0xf0] }
  0x1b   :  { %v7391_v13 = vld [vmem:[#allocation5 + $0x19c] sm:$0xf0]  ;;  %v5095_v19 = vld [vmem:[#allocation5 + $0x1a0] sm:$0xf0]  ;;  %v94_v57 = vld [vmem:[#allocation2] sm:$0x3]  ;;  %v5262_v58 = vor.u32 %v7432_v48, %v5261_v47 }
  0x1c   :  { %v5221_v14 = vld [vmem:[#allocation5 + $0x280] sm:$0xf]  ;;  %717 = vmatpush.bf16.msra.mxu1 %v5254_v7  ;;  %v5094_v16 = vor.u32 %v7391_v13, %v5093_v11  ;;  %v7419_v20 = vld [vmem:[#allocation5 + $0x284] sm:$0xf]  ;;  %743 = vmatpush.bf16.msra.mxu3 %v5258_v12  ;;  %v5098_v21 = vor.u32 %v7387_v18, %v5095_v19  ;;  %195 = vst [vmem:[#allocation1] ss:$9 sm:$0xff] %v94_v57 }
  0x1d   :  { %v7423_v15 = vld [vmem:[#allocation5 + $0x29c] sm:$0xf0]  ;;  %v5223_v22 = vld [vmem:[#allocation5 + $0x2a0] sm:$0xf0]  ;;  %v5101_v59 = vld [vmem:[#allocation5 + $0x188] sm:$0xf] }
  0x1e   :  { %v5222_v17 = vor.u32 %v7423_v15, %v5221_v14  ;;  %v5061_v23 = vld [vmem:[#allocation5 + $0x140] sm:$0xf]  ;;  %v5226_v25 = vor.u32 %v7419_v20, %v5223_v22  ;;  %v7379_v28 = vld [vmem:[#allocation5 + $0x144] sm:$0xf]  ;;  %701 = vmatpush.bf16.msra.mxu0 %v5094_v16  ;;  %727 = vmatpush.bf16.msra.mxu2 %v5098_v21  ;;  %v7392_v60 = vld [vmem:[#allocation5 + $0x1a4] sm:$0xf0] }
  0x1f   :  { %v7383_v24 = vld [vmem:[#allocation5 + $0x15c] sm:$0xf0]  ;;  %v5063_v30 = vld [vmem:[#allocation5 + $0x160] sm:$0xf0]  ;;  %v5229_v62 = vld [vmem:[#allocation5 + $0x288] sm:$0xf]  ;;  %v5102_v3 = vor.u32 %v7392_v60, %v5101_v59 }
  0x20   :  { %v5189_v26 = vld [vmem:[#allocation5 + $0x240] sm:$0xf]  ;;  %v5062_v29 = vor.u32 %v7383_v24, %v5061_v23  ;;  %v7411_v31 = vld [vmem:[#allocation5 + $0x244] sm:$0xf]  ;;  %718 = vmatpush.bf16.msra.mxu1 %v5222_v17  ;;  %v5066_v34 = vor.u32 %v7379_v28, %v5063_v30  ;;  %744 = vmatpush.bf16.msra.mxu3 %v5226_v25  ;;  %v7424_v0 = vld [vmem:[#allocation5 + $0x2a4] sm:$0xf0] }
  0x21   :  { %v7415_v27 = vld [vmem:[#allocation5 + $0x25c] sm:$0xf0]  ;;  %v5191_v32 = vld [vmem:[#allocation5 + $0x260] sm:$0xf0]  ;;  %v5069_v6 = vld [vmem:[#allocation5 + $0x148] sm:$0xf]  ;;  %v5230_v8 = vor.u32 %v7424_v0, %v5229_v62 }
  0x22   :  { %v5190_v33 = vor.u32 %v7415_v27, %v5189_v26  ;;  %v5029_v35 = vld [vmem:[#allocation5 + $0x100] sm:$0xf]  ;;  %v5194_v38 = vor.u32 %v7411_v31, %v5191_v32  ;;  %v7371_v40 = vld [vmem:[#allocation5 + $0x104] sm:$0xf]  ;;  %702 = vmatpush.bf16.msra.mxu0 %v5062_v29  ;;  %728 = vmatpush.bf16.msra.mxu2 %v5066_v34  ;;  %v7384_v7 = vld [vmem:[#allocation5 + $0x164] sm:$0xf0] }
  0x23   :  { %v7375_v36 = vld [vmem:[#allocation5 + $0x11c] sm:$0xf0]  ;;  %v5031_v41 = vld [vmem:[#allocation5 + $0x120] sm:$0xf0]  ;;  %vm697_vm0 = vcmask 523264   ;;  %v5070_v16 = vor.u32 %v7384_v7, %v5069_v6  ;;  %vm4864_vm1 = vcmask 1040384  }
  0x24   :  { %v5157_v37 = vld [vmem:[#allocation5 + $0x200] sm:$0xf]  ;;  %v7403_v42 = vld [vmem:[#allocation5 + $0x204] sm:$0xf]  ;;  %v5030_v45 = vor.u32 %v7375_v36, %v5029_v35  ;;  %719 = vmatpush.bf16.msra.mxu1 %v5190_v33  ;;  %v5034_v50 = vor.u32 %v7371_v40, %v5031_v41  ;;  %745 = vmatpush.bf16.msra.mxu3 %v5194_v38  ;;  %v5197_v10 = vld [vmem:[#allocation5 + $0x248] sm:$0xf] }
  0x25   :  { %v7407_v39 = vld [vmem:[#allocation5 + $0x21c] sm:$0xf0]  ;;  %v5159_v43 = vld [vmem:[#allocation5 + $0x220] sm:$0xf0]  ;;  %v7416_v12 = vld [vmem:[#allocation5 + $0x264] sm:$0xf0] }
  0x26   :  { %v5158_v49 = vor.u32 %v7407_v39, %v5157_v37  ;;  %v4997_v51 = vld [vmem:[#allocation5 + $0xc0] sm:$0xf]  ;;  %v5162_v53 = vor.u32 %v7403_v42, %v5159_v43  ;;  %v7363_v55 = vld [vmem:[#allocation5 + $0xc4] sm:$0xf]  ;;  %703 = vmatpush.bf16.msra.mxu0 %v5030_v45  ;;  %729 = vmatpush.bf16.msra.mxu2 %v5034_v50  ;;  %v5037_v19 = vld [vmem:[#allocation5 + $0x108] sm:$0xf]  ;;  %v5198_v21 = vor.u32 %v7416_v12, %v5197_v10 }
  0x27   :  { %v7367_v52 = vld [vmem:[#allocation5 + $0xdc] sm:$0xf0]  ;;  %v4999_v56 = vld [vmem:[#allocation5 + $0xe0] sm:$0xf0]  ;;  %v7376_v20 = vld [vmem:[#allocation5 + $0x124] sm:$0xf0] }
  0x28   :  { %v4998_v61 = vor.u32 %v7367_v52, %v4997_v51  ;;  %720 = vmatpush.bf16.msra.mxu1 %v5158_v49  ;;  %v5002_v63 = vor.u32 %v7363_v55, %v4999_v56  ;;  %v4965_v1 = vld [vmem:[#allocation5 + $0x80] sm:$0xf]  ;;  %746 = vmatpush.bf16.msra.mxu3 %v5162_v53  ;;  %v7355_v4 = vld [vmem:[#allocation5 + $0x84] sm:$0xf]  ;;  %v5165_v23 = vld [vmem:[#allocation5 + $0x208] sm:$0xf]  ;;  %v5038_v30 = vor.u32 %v7376_v20, %v5037_v19 }
  0x29   :  { %v7359_v2 = vld [vmem:[#allocation5 + $0x9c] sm:$0xf0]  ;;  %v4967_v5 = vld [vmem:[#allocation5 + $0xa0] sm:$0xf0]  ;;  %v7408_v24 = vld [vmem:[#allocation5 + $0x224] sm:$0xf0] }
  0x2a   :  { %704 = vmatpush.bf16.msra.mxu0 %v4998_v61  ;;  %v4966_v9 = vor.u32 %v7359_v2, %v4965_v1  ;;  %730 = vmatpush.bf16.msra.mxu2 %v5002_v63  ;;  %v4970_v11 = vor.u32 %v7355_v4, %v4967_v5  ;;  %v4933_v13 = vld [vmem:[#allocation5 + $0x40] sm:$0xf]  ;;  %v7347_v17 = vld [vmem:[#allocation5 + $0x44] sm:$0xf]  ;;  %v5141_v25 = vld [vmem:[#allocation5 + $0x1d0] sm:$0xf]  ;;  %v5166_v37 = vor.u32 %v7408_v24, %v5165_v23 }
  0x2b   :  { %v7351_v14 = vld [vmem:[#allocation5 + $0x5c] sm:$0xf0]  ;;  %v4935_v18 = vld [vmem:[#allocation5 + $0x60] sm:$0xf0]  ;;  %v7401_v27 = vld [vmem:[#allocation5 + $0x1ec] sm:$0xf0] }
  0x2c   :  { %752 = vmatpush.bf16.msrb.mxu1 %v5134_v54  ;;  %769 = vmatpush.bf16.msrb.mxu3 %v5262_v58  ;;  %v8161_v15 = vld [vmem:[#allocation1 + $0x9] sm:$0xff]  ;;  %v4934_v22 = vor.u32 %v7351_v14, %v4933_v13  ;;  %v4938_v26 = vor.u32 %v7347_v17, %v4935_v18  ;;  %v5005_v33 = vld [vmem:[#allocation5 + $0xc8] sm:$0xf]  ;;  %v7396_v35 = vld [vmem:[#allocation5 + $0x1cc] sm:$0xf]  ;;  %v5142_v41 = vor.u32 %v7401_v27, %v5141_v25  ;;  %vm4866_vm2 = vcmask 1042434  }
  0x2d   :  { %5284 = vmatmul.msk.bf16.vlgmr.msra.gmra.mxu3 %vm697_vm0, %v8161_v15  ;;  %5283 = vmatmul.msk.bf16.vlgmr.msra.gmra.mxu1 %vm697_vm0, %v8161_v15  ;;  %v4901_v28 = vld [vmem:[#allocation5] sm:$0xf]  ;;  %v7339_v31 = vld [vmem:[#allocation5 + $0x4] sm:$0xf]  ;;  %v7368_v34 = vld [vmem:[#allocation5 + $0xe4] sm:$0xf0] }
  0x2e   :  { %705 = vmatpush.bf16.msra.mxu0 %v4966_v9  ;;  %731 = vmatpush.bf16.msra.mxu2 %v4970_v11  ;;  %v7343_v29 = vld [vmem:[#allocation5 + $0x1c] sm:$0xf0]  ;;  %v4903_v32 = vld [vmem:[#allocation5 + $0x20] sm:$0xf0]  ;;  %v5135_v36 = vld [vmem:[#allocation5 + $0x1e8] sm:$0xf0]  ;;  %v5006_v43 = vor.u32 %v7368_v34, %v5005_v33 }
  0x2f   :  { %v4902_v38 = vor.u32 %v7343_v29, %v4901_v28  ;;  %v7428_v39 = vld [vmem:[#allocation5 + $0x2cc] sm:$0xf]  ;;  %v4906_v42 = vor.u32 %v7339_v31, %v4903_v32  ;;  %v5138_v44 = vor.u32 %v7396_v35, %v5135_v36  ;;  %v5109_v45 = vld [vmem:[#allocation5 + $0x190] sm:$0xf]  ;;  %v4973_v47 = vld [vmem:[#allocation5 + $0x88] sm:$0xf] }
  0x30   :  { %753 = vmatpush.bf16.msrb.mxu1 %v5102_v3  ;;  %770 = vmatpush.bf16.msrb.mxu3 %v5230_v8  ;;  %v5263_v40 = vld [vmem:[#allocation5 + $0x2e8] sm:$0xf0]  ;;  %v7393_v46 = vld [vmem:[#allocation5 + $0x1ac] sm:$0xf0]  ;;  %v7360_v49 = vld [vmem:[#allocation5 + $0xa4] sm:$0xf0] }
  0x31   :  { %v5266_v48 = vor.u32 %v7428_v39, %v5263_v40  ;;  %v7388_v50 = vld [vmem:[#allocation5 + $0x18c] sm:$0xf]  ;;  %v8167_v52 = vld [vmem:[#allocation1] sm:$0xff]  ;;  %v5110_v55 = vor.u32 %v7393_v46, %v5109_v45  ;;  %v4974_v56 = vor.u32 %v7360_v49, %v4973_v47  ;;  %v5077_v58 = vld [vmem:[#allocation5 + $0x150] sm:$0xf]  ;;  %vm4868_vm3 = vcmask 1041408  }
  0x32   :  { %706 = vmatpush.bf16.msra.mxu0 %v4934_v22  ;;  %732 = vmatpush.bf16.msra.mxu2 %v4938_v26  ;;  %v5103_v51 = vld [vmem:[#allocation5 + $0x1a8] sm:$0xf0]  ;;  %v7385_v59 = vld [vmem:[#allocation5 + $0x16c] sm:$0xf0]  ;;  %v4941_v60 = vld [vmem:[#allocation5 + $0x48] sm:$0xf] }
  0x33   :  { %v7420_v53 = vld [vmem:[#allocation5 + $0x28c] sm:$0xf]  ;;  %v5106_v57 = vor.u32 %v7388_v50, %v5103_v51  ;;  %v7352_v62 = vld [vmem:[#allocation5 + $0x64] sm:$0xf0]  ;;  %v5078_v3 = vor.u32 %v7385_v59, %v5077_v58  ;;  %v5045_v4 = vld [vmem:[#allocation5 + $0x110] sm:$0xf] }
  0x34   :  { %754 = vmatpush.bf16.msrb.mxu1 %v5070_v16  ;;  %771 = vmatpush.bf16.msrb.mxu3 %v5198_v21  ;;  %v5231_v54 = vld [vmem:[#allocation5 + $0x2a8] sm:$0xf0]  ;;  %v4942_v5 = vor.u32 %v7352_v62, %v4941_v60  ;;  %v7377_v7 = vld [vmem:[#allocation5 + $0x12c] sm:$0xf0]  ;;  %v4909_v8 = vld [vmem:[#allocation5 + $0x8] sm:$0xf] }
  0x35   :  { %v5234_v61 = vor.u32 %v7420_v53, %v5231_v54  ;;  %v7380_v63 = vld [vmem:[#allocation5 + $0x14c] sm:$0xf]  ;;  %v7344_v9 = vld [vmem:[#allocation5 + $0x24] sm:$0xf0]  ;;  %v5269_v16 = vld [vmem:[#allocation5 + $0x2d0] sm:$0xf]  ;;  %v5046_v18 = vor.u32 %v7377_v7, %v5045_v4 }
  0x36   :  { %707 = vmatpush.bf16.msra.mxu0 %v4902_v38  ;;  %733 = vmatpush.bf16.msra.mxu2 %v4906_v42  ;;  %v5071_v0 = vld [vmem:[#allocation5 + $0x168] sm:$0xf0]  ;;  %v7433_v17 = vld [vmem:[#allocation5 + $0x2ec] sm:$0xf0]  ;;  %v7397_v19 = vld [vmem:[#allocation5 + $0x1d4] sm:$0xf]  ;;  %v4910_v21 = vor.u32 %v7344_v9, %v4909_v8 }
  0x37   :  { %v7412_v1 = vld [vmem:[#allocation5 + $0x24c] sm:$0xf]  ;;  %v5074_v6 = vor.u32 %v7380_v63, %v5071_v0  ;;  %v5143_v20 = vld [vmem:[#allocation5 + $0x1f0] sm:$0xf0]  ;;  %v5013_v23 = vld [vmem:[#allocation5 + $0xd0] sm:$0xf]  ;;  %v5270_v26 = vor.u32 %v7433_v17, %v5269_v16 }
  0x38   :  { %755 = vmatpush.bf16.msrb.mxu1 %v5038_v30  ;;  %772 = vmatpush.bf16.msrb.mxu3 %v5166_v37  ;;  %v5199_v2 = vld [vmem:[#allocation5 + $0x268] sm:$0xf0]  ;;  %v7369_v24 = vld [vmem:[#allocation5 + $0xec] sm:$0xf0]  ;;  %v5146_v29 = vor.u32 %v7397_v19, %v5143_v20  ;;  %v7389_v33 = vld [vmem:[#allocation5 + $0x194] sm:$0xf] }
  0x39   :  { %708 = vmatmul.bf16.vlgmr.msra.gmra.mxu0 %v8167_v52  ;;  %734 = vmatmul.bf16.vlgmr.msra.gmra.mxu2 %v8167_v52  ;;  %v5202_v10 = vor.u32 %v7412_v1, %v5199_v2  ;;  %v7372_v11 = vld [vmem:[#allocation5 + $0x10c] sm:$0xf]  ;;  %v5237_v30 = vld [vmem:[#allocation5 + $0x290] sm:$0xf]  ;;  %v5014_v32 = vor.u32 %v7369_v24, %v5013_v23  ;;  %v5111_v34 = vld [vmem:[#allocation5 + $0x1b0] sm:$0xf0] }
  0x3a   :  { %778 = vmatpush.bf16.msrb.mxu0 %v5138_v44  ;;  %795 = vmatpush.bf16.msrb.mxu2 %v5266_v48  ;;  %v5039_v12 = vld [vmem:[#allocation5 + $0x128] sm:$0xf0]  ;;  %v7425_v31 = vld [vmem:[#allocation5 + $0x2ac] sm:$0xf0]  ;;  %v7381_v45 = vld [vmem:[#allocation5 + $0x154] sm:$0xf] }
  0x3b   :  { %v7404_v13 = vld [vmem:[#allocation5 + $0x20c] sm:$0xf]  ;;  %v5042_v22 = vor.u32 %v7372_v11, %v5039_v12  ;;  %v4981_v36 = vld [vmem:[#allocation5 + $0x90] sm:$0xf]  ;;  %v5238_v38 = vor.u32 %v7425_v31, %v5237_v30  ;;  %v5079_v46 = vld [vmem:[#allocation5 + $0x170] sm:$0xf0] }
  0x3c   :  { %804 = vmatpush.bf16.msra.mxu3 %v5142_v41  ;;  %756 = vmatpush.bf16.msrb.mxu1 %v5006_v43  ;;  %v5167_v14 = vld [vmem:[#allocation5 + $0x228] sm:$0xf0]  ;;  %v7361_v37 = vld [vmem:[#allocation5 + $0xac] sm:$0xf0]  ;;  %v5114_v41 = vor.u32 %v7389_v33, %v5111_v34  ;;  %v5082_v54 = vor.u32 %v7381_v45, %v5079_v46  ;;  %v5047_v59 = vld [vmem:[#allocation5 + $0x130] sm:$0xf0] }
  0x3d   :  { %5285 = vmatmul.msk.bf16.vlgmr.msrb.gmra.mxu3 %vm697_vm0, %v8161_v15  ;;  %v5170_v25 = vor.u32 %v7404_v13, %v5167_v14  ;;  %v7364_v27 = vld [vmem:[#allocation5 + $0xcc] sm:$0xf]  ;;  %v5205_v42 = vld [vmem:[#allocation5 + $0x250] sm:$0xf]  ;;  %v4982_v44 = vor.u32 %v7361_v37, %v4981_v36  ;;  %v5149_v60 = vld [vmem:[#allocation5 + $0x1d8] sm:$0xf] }
  0x3e   :  { %779 = vmatpush.bf16.msrb.mxu0 %v5106_v57  ;;  %796 = vmatpush.bf16.msrb.mxu2 %v5234_v61  ;;  %v5007_v28 = vld [vmem:[#allocation5 + $0xe8] sm:$0xf0]  ;;  %v7417_v43 = vld [vmem:[#allocation5 + $0x26c] sm:$0xf0]  ;;  %v7373_v57 = vld [vmem:[#allocation5 + $0x114] sm:$0xf] }
  0x3f   :  { %v5010_v35 = vor.u32 %v7364_v27, %v5007_v28  ;;  %v7356_v39 = vld [vmem:[#allocation5 + $0x8c] sm:$0xf]  ;;  %v4949_v48 = vld [vmem:[#allocation5 + $0x50] sm:$0xf]  ;;  %v5206_v50 = vor.u32 %v7417_v43, %v5205_v42  ;;  %v7402_v61 = vld [vmem:[#allocation5 + $0x1f4] sm:$0xf0] }
  0x40   :  { %805 = vmatpush.bf16.msra.mxu3 %v5110_v55  ;;  %757 = vmatpush.bf16.msrb.mxu1 %v4974_v56  ;;  %v4975_v40 = vld [vmem:[#allocation5 + $0xa8] sm:$0xf0]  ;;  %v7353_v49 = vld [vmem:[#allocation5 + $0x6c] sm:$0xf0]  ;;  %v7429_v4 = vld [vmem:[#allocation5 + $0x2d4] sm:$0xf]  ;;  %v5150_v7 = vor.u32 %v7402_v61, %v5149_v60 }
  0x41   :  { %v4978_v47 = vor.u32 %v7356_v39, %v4975_v40  ;;  %v7348_v51 = vld [vmem:[#allocation5 + $0x4c] sm:$0xf]  ;;  %v5173_v55 = vld [vmem:[#allocation5 + $0x210] sm:$0xf]  ;;  %v4950_v58 = vor.u32 %v7353_v49, %v4949_v48  ;;  %v7398_v8 = vld [vmem:[#allocation5 + $0x1dc] sm:$0xf] }
  0x42   :  { %780 = vmatpush.bf16.msrb.mxu0 %v5074_v6  ;;  %797 = vmatpush.bf16.msrb.mxu2 %v5202_v10  ;;  %v4943_v53 = vld [vmem:[#allocation5 + $0x68] sm:$0xf0]  ;;  %v7409_v56 = vld [vmem:[#allocation5 + $0x22c] sm:$0xf0]  ;;  %v5050_v6 = vor.u32 %v7373_v57, %v5047_v59  ;;  %v5151_v9 = vld [vmem:[#allocation5 + $0x1f8] sm:$0xf0] }
  0x43   :  { %v4946_v62 = vor.u32 %v7348_v51, %v4943_v53  ;;  %v4917_v63 = vld [vmem:[#allocation5 + $0x10] sm:$0xf]  ;;  %v7340_v1 = vld [vmem:[#allocation5 + $0xc] sm:$0xf]  ;;  %v5174_v2 = vor.u32 %v7409_v56, %v5173_v55  ;;  %v7365_v11 = vld [vmem:[#allocation5 + $0xd4] sm:$0xf]  ;;  %v5154_v20 = vor.u32 %v7398_v8, %v5151_v9 }
  0x44   :  { %806 = vmatpush.bf16.msra.mxu3 %v5078_v3  ;;  %758 = vmatpush.bf16.msrb.mxu1 %v4942_v5  ;;  %v7345_v0 = vld [vmem:[#allocation5 + $0x2c] sm:$0xf0]  ;;  %v4911_v3 = vld [vmem:[#allocation5 + $0x28] sm:$0xf0]  ;;  %v5271_v5 = vld [vmem:[#allocation5 + $0x2f0] sm:$0xf0] }
  0x45   :  { %v4918_v10 = vor.u32 %v7345_v0, %v4917_v63  ;;  %v5015_v12 = vld [vmem:[#allocation5 + $0xf0] sm:$0xf0]  ;;  %v4914_v13 = vor.u32 %v7340_v1, %v4911_v3  ;;  %v5274_v14 = vor.u32 %v7429_v4, %v5271_v5  ;;  %v5117_v16 = vld [vmem:[#allocation5 + $0x198] sm:$0xf]  ;;  %v5119_v23 = vld [vmem:[#allocation5 + $0x1b8] sm:$0xf0] }
  0x46   :  { %781 = vmatpush.bf16.msrb.mxu0 %v5042_v22  ;;  %798 = vmatpush.bf16.msrb.mxu2 %v5170_v25  ;;  %v7394_v17 = vld [vmem:[#allocation5 + $0x1b4] sm:$0xf0]  ;;  %v5239_v19 = vld [vmem:[#allocation5 + $0x2b0] sm:$0xf0]  ;;  %v7390_v22 = vld [vmem:[#allocation5 + $0x19c] sm:$0xf] }
  0x47   :  { %v5118_v24 = vor.u32 %v7394_v17, %v5117_v16  ;;  %v7357_v25 = vld [vmem:[#allocation5 + $0x94] sm:$0xf]  ;;  %v5085_v28 = vld [vmem:[#allocation5 + $0x158] sm:$0xf]  ;;  %v7382_v34 = vld [vmem:[#allocation5 + $0x15c] sm:$0xf] }
  0x48   :  { %807 = vmatpush.bf16.msra.mxu3 %v5046_v18  ;;  %759 = vmatpush.bf16.msrb.mxu1 %v4910_v21  ;;  %v7421_v18 = vld [vmem:[#allocation5 + $0x294] sm:$0xf]  ;;  %v5018_v21 = vor.u32 %v7365_v11, %v5015_v12  ;;  %v5053_v40 = vld [vmem:[#allocation5 + $0x118] sm:$0xf]  ;;  %v7374_v48 = vld [vmem:[#allocation5 + $0x11c] sm:$0xf] }
  0x49   :  { %5286 = vmatmul.msk.bf16.vlgmr.msrb.gmra.mxu2 %vm697_vm0, %v8161_v15  ;;  %v5242_v27 = vor.u32 %v7421_v18, %v5239_v19  ;;  %v7413_v30 = vld [vmem:[#allocation5 + $0x254] sm:$0xf]  ;;  %v5277_v45 = vld [vmem:[#allocation5 + $0x2d8] sm:$0xf]  ;;  %v5055_v49 = vld [vmem:[#allocation5 + $0x138] sm:$0xf0] }
  0x4a   :  { %830 = vmatpush.bf16.msra.mxu2 %v5146_v29  ;;  %782 = vmatpush.bf16.msrb.mxu0 %v5010_v35  ;;  %v7386_v29 = vld [vmem:[#allocation5 + $0x174] sm:$0xf0]  ;;  %v5207_v31 = vld [vmem:[#allocation5 + $0x270] sm:$0xf0]  ;;  %v5087_v35 = vld [vmem:[#allocation5 + $0x178] sm:$0xf0]  ;;  %v5058_v60 = vor.u32 %v7374_v48, %v5055_v49 }
  0x4b   :  { %760 = vmatmul.bf16.vlgmr.msrb.gmra.mxu1 %v8167_v52  ;;  %v5086_v36 = vor.u32 %v7386_v29, %v5085_v28  ;;  %v7349_v37 = vld [vmem:[#allocation5 + $0x54] sm:$0xf]  ;;  %v5210_v39 = vor.u32 %v7413_v30, %v5207_v31  ;;  %v7370_v56 = vld [vmem:[#allocation5 + $0xf4] sm:$0xf0]  ;;  %v7430_v57 = vld [vmem:[#allocation5 + $0x2dc] sm:$0xf] }
  0x4c   :  { %821 = vmatpush.bf16.msra.mxu1 %v5270_v26  ;;  %808 = vmatpush.bf16.msra.mxu3 %v5014_v32  ;;  %v4983_v26 = vld [vmem:[#allocation5 + $0xb0] sm:$0xf0]  ;;  %v5122_v32 = vor.u32 %v7390_v22, %v5119_v23  ;;  %v7426_v63 = vld [vmem:[#allocation5 + $0x2b4] sm:$0xf0]  ;;  %v7366_v3 = vld [vmem:[#allocation5 + $0xdc] sm:$0xf] }
  0x4d   :  { %v4986_v33 = vor.u32 %v7357_v25, %v4983_v26  ;;  %v7405_v42 = vld [vmem:[#allocation5 + $0x214] sm:$0xf]  ;;  %v5023_v4 = vld [vmem:[#allocation5 + $0xf8] sm:$0xf0]  ;;  %v7362_v5 = vld [vmem:[#allocation5 + $0xb4] sm:$0xf0] }
  0x4e   :  { %831 = vmatpush.bf16.msra.mxu2 %v5114_v41  ;;  %783 = vmatpush.bf16.msrb.mxu0 %v4978_v47  ;;  %v7378_v41 = vld [vmem:[#allocation5 + $0x134] sm:$0xf0]  ;;  %v5175_v43 = vld [vmem:[#allocation5 + $0x230] sm:$0xf0]  ;;  %v5026_v9 = vor.u32 %v7366_v3, %v5023_v4  ;;  %v7358_v16 = vld [vmem:[#allocation5 + $0x9c] sm:$0xf] }
  0x4f   :  { %v7434_v47 = vld [vmem:[#allocation5 + $0x2f4] sm:$0xf0]  ;;  %v7341_v51 = vld [vmem:[#allocation5 + $0x14] sm:$0xf]  ;;  %v5178_v55 = vor.u32 %v7405_v42, %v5175_v43  ;;  %v4991_v17 = vld [vmem:[#allocation5 + $0xb8] sm:$0xf0] }
  0x50   :  { %822 = vmatpush.bf16.msra.mxu1 %v5238_v38  ;;  %809 = vmatpush.bf16.msra.mxu3 %v4982_v44  ;;  %v4951_v38 = vld [vmem:[#allocation5 + $0x70] sm:$0xf0]  ;;  %v5090_v44 = vor.u32 %v7382_v34, %v5087_v35  ;;  %v5278_v59 = vor.u32 %v7434_v47, %v5277_v45  ;;  %v7418_v11 = vld [vmem:[#allocation5 + $0x274] sm:$0xf0]  ;;  %v7414_v19 = vld [vmem:[#allocation5 + $0x25c] sm:$0xf]  ;;  %v4994_v22 = vor.u32 %v7358_v16, %v4991_v17 }
  0x51   :  { %v4954_v46 = vor.u32 %v7349_v37, %v4951_v38  ;;  %v4919_v53 = vld [vmem:[#allocation5 + $0x30] sm:$0xf0]  ;;  %v7354_v18 = vld [vmem:[#allocation5 + $0x74] sm:$0xf0]  ;;  %v7350_v26 = vld [vmem:[#allocation5 + $0x5c] sm:$0xf] }
  0x52   :  { %832 = vmatpush.bf16.msra.mxu2 %v5082_v54  ;;  %784 = vmatpush.bf16.msrb.mxu0 %v4946_v62  ;;  %v5021_v54 = vld [vmem:[#allocation5 + $0xd8] sm:$0xf]  ;;  %v4922_v61 = vor.u32 %v7341_v51, %v4919_v53  ;;  %v4959_v29 = vld [vmem:[#allocation5 + $0x78] sm:$0xf0]  ;;  %v5517_v30 = vld [vmem:[#allocation8 + $0x1c0] sm:$0xf] }
  0x53   :  { %v5245_v62 = vld [vmem:[#allocation5 + $0x298] sm:$0xf]  ;;  %v5022_v0 = vor.u32 %v7370_v56, %v5021_v54  ;;  %v7495_v31 = vld [vmem:[#allocation8 + $0x1dc] sm:$0xf0]  ;;  %v5183_v34 = vld [vmem:[#allocation5 + $0x238] sm:$0xf0]  ;;  %v4962_v38 = vor.u32 %v7350_v26, %v4959_v29 }
  0x54   :  { %823 = vmatpush.bf16.msra.mxu1 %v5206_v50  ;;  %810 = vmatpush.bf16.msra.mxu3 %v4950_v58  ;;  %v5054_v50 = vor.u32 %v7378_v41, %v5053_v40  ;;  %v5279_v58 = vld [vmem:[#allocation5 + $0x2f8] sm:$0xf0]  ;;  %v5246_v8 = vor.u32 %v7426_v63, %v5245_v62  ;;  %v4925_v23 = vld [vmem:[#allocation5 + $0x18] sm:$0xf]  ;;  %v7559_v37 = vld [vmem:[#allocation8 + $0x3dc] sm:$0xf0]  ;;  %v5518_v40 = vor.u32 %v7495_v31, %v5517_v30 }
  0x55   :  { %v5282_v1 = vor.u32 %v7430_v57, %v5279_v58  ;;  %v7410_v25 = vld [vmem:[#allocation5 + $0x234] sm:$0xf0]  ;;  %v4927_v43 = vld [vmem:[#allocation5 + $0x38] sm:$0xf0]  ;;  %v7487_v45 = vld [vmem:[#allocation8 + $0x19c] sm:$0xf0] }
  0x56   :  { %833 = vmatpush.bf16.msra.mxu2 %v5050_v6  ;;  %785 = vmatpush.bf16.msrb.mxu0 %v4914_v13  ;;  %v7422_v6 = vld [vmem:[#allocation5 + $0x29c] sm:$0xf]  ;;  %v5741_v47 = vld [vmem:[#allocation8 + $0x380] sm:$0xf]  ;;  %vm4870_vm4 = vcmask 1044484   ;;  %vm4872_vm5 = vcmask 1046534  }
  0x57   :  { %v6029_v48 = vld [vmem:[#allocation8 + $0x5c0] sm:$0xf]  ;;  %vm4874_vm6 = vcmask 1045508   ;;  %s8115_s2 = smov [#allocation11]   ;;  %s4887_s19 = sshll.u32 %s8356_s5, 4  ;;  %vm4876_vm7 = vcmask 1043456   ;;  %s4888_s19 = int_to_ptr.hbm [resolvable:$true] %s4887_s19 }
  0x58   :  { %824 = vmatpush.bf16.msra.mxu1 %v5174_v2  ;;  %811 = vmatpush.bf16.msra.mxu3 %v4918_v10  ;;  %v4989_v2 = vld [vmem:[#allocation5 + $0x98] sm:$0xf]  ;;  %v7623_v49 = vld [vmem:[#allocation8 + $0x5dc] sm:$0xf0]  ;;  %s4885_s4 = sshll.u32 %s8115_s2, 4  ;;  %s4886_s4 = int_to_ptr.vmem [resolvable:$true] %s4885_s4 }
  0x59   :  { %786 = vmatmul.bf16.vlgmr.msrb.gmra.mxu0 %v8167_v52  ;;  %v5213_v10 = vld [vmem:[#allocation5 + $0x258] sm:$0xf]  ;;  %v4990_v12 = vor.u32 %v7362_v5, %v4989_v2  ;;  %v6030_v51 = vor.u32 %v7623_v49, %v6029_v48  ;;  %v6285_v53 = vld [vmem:[#allocation8 + $0x7c0] sm:$0xf] }
  0x5a   :  { %882 = vmatpush.bf16.msra.mxu0 %v5154_v20  ;;  %834 = vmatpush.bf16.msra.mxu2 %v5018_v21  ;;  %v5215_v20 = vld [vmem:[#allocation5 + $0x278] sm:$0xf0]  ;;  %v5214_v21 = vor.u32 %v7418_v11, %v5213_v10  ;;  %v7687_v54 = vld [vmem:[#allocation8 + $0x7dc] sm:$0xf0] }
  0x5b   :  { %812 = vmatmul.bf16.vlgmr.msra.gmra.mxu3 %v8167_v52  ;;  %5287 = vmatmul.msk.bf16.vlgmr.msra.gmra.mxu1 %vm697_vm0, %v8161_v15  ;;  %v5218_v28 = vor.u32 %v7414_v19, %v5215_v20  ;;  %v5453_v57 = vld [vmem:[#allocation8 + $0x140] sm:$0xf] }
  0x5c   :  { %856 = vmatpush.bf16.msrb.mxu1 %v5150_v7  ;;  %847 = vmatpush.bf16.msrb.mxu3 %v5274_v14  ;;  %v5247_v7 = vld [vmem:[#allocation5 + $0x2b8] sm:$0xf0]  ;;  %v4957_v14 = vld [vmem:[#allocation5 + $0x58] sm:$0xf]  ;;  %v7479_v58 = vld [vmem:[#allocation8 + $0x15c] sm:$0xf0] }
  0x5d   :  { %v5250_v13 = vor.u32 %v7422_v6, %v5247_v7  ;;  %v7615_v62 = vld [vmem:[#allocation8 + $0x59c] sm:$0xf0]  ;;  %v5454_v4 = vor.u32 %v7479_v58, %v5453_v57 }
  0x5e   :  { %883 = vmatpush.bf16.msra.mxu0 %v5122_v32  ;;  %835 = vmatpush.bf16.msra.mxu2 %v4986_v33  ;;  %v7346_v32 = vld [vmem:[#allocation5 + $0x34] sm:$0xf0]  ;;  %v7406_v33 = vld [vmem:[#allocation5 + $0x21c] sm:$0xf]  ;;  %v6253_v63 = vld [vmem:[#allocation8 + $0x780] sm:$0xf] }
  0x5f   :  { %v4926_v41 = vor.u32 %v7346_v32, %v4925_v23  ;;  %v5186_v42 = vor.u32 %v7406_v33, %v5183_v34  ;;  %v7679_v3 = vld [vmem:[#allocation8 + $0x79c] sm:$0xf0] }
  0x60   :  { %857 = vmatpush.bf16.msrb.mxu1 %v5118_v24  ;;  %848 = vmatpush.bf16.msrb.mxu3 %v5242_v27  ;;  %v5181_v24 = vld [vmem:[#allocation5 + $0x218] sm:$0xf]  ;;  %v4958_v27 = vor.u32 %v7354_v18, %v4957_v14  ;;  %v6254_v5 = vor.u32 %v7679_v3, %v6253_v63  ;;  %v5421_v6 = vld [vmem:[#allocation8 + $0x100] sm:$0xf] }
  0x61   :  { %v5182_v35 = vor.u32 %v7410_v25, %v5181_v24  ;;  %v7471_v7 = vld [vmem:[#allocation8 + $0x11c] sm:$0xf0] }
  0x62   :  { %884 = vmatpush.bf16.msra.mxu0 %v5090_v44  ;;  %836 = vmatpush.bf16.msra.mxu2 %v4954_v46  ;;  %v5485_v44 = vld [vmem:[#allocation8 + $0x180] sm:$0xf]  ;;  %v5422_v11 = vor.u32 %v7471_v7, %v5421_v6 }
  0x63   :  { %v5486_v56 = vor.u32 %v7487_v45, %v5485_v44  ;;  %v7535_v10 = vld [vmem:[#allocation8 + $0x31c] sm:$0xf0] }
  0x64   :  { %858 = vmatpush.bf16.msrb.mxu1 %v5086_v36  ;;  %849 = vmatpush.bf16.msrb.mxu3 %v5210_v39  ;;  %v5773_v36 = vld [vmem:[#allocation8 + $0x3c0] sm:$0xf]  ;;  %v7342_v39 = vld [vmem:[#allocation5 + $0x1c] sm:$0xf] }
  0x65   :  { %v5774_v46 = vor.u32 %v7559_v37, %v5773_v36  ;;  %v5645_v16 = vld [vmem:[#allocation8 + $0x2c0] sm:$0xf] }
  0x66   :  { %885 = vmatpush.bf16.msra.mxu0 %v5058_v60  ;;  %837 = vmatpush.bf16.msra.mxu2 %v4922_v61  ;;  %v5997_v61 = vld [vmem:[#allocation8 + $0x580] sm:$0xf] }
  0x67   :  { %v5998_v2 = vor.u32 %v7615_v62, %v5997_v61  ;;  %v7527_v17 = vld [vmem:[#allocation8 + $0x2dc] sm:$0xf0] }
  0x68   :  { %859 = vmatpush.bf16.msrb.mxu1 %v5054_v50  ;;  %850 = vmatpush.bf16.msrb.mxu3 %v5178_v55  ;;  %v7551_v50 = vld [vmem:[#allocation8 + $0x39c] sm:$0xf0]  ;;  %v4930_v55 = vor.u32 %v7342_v39, %v4927_v43 }
  0x69   :  { %838 = vmatmul.bf16.vlgmr.msra.gmra.mxu2 %v8167_v52  ;;  %v5742_v60 = vor.u32 %v7551_v50, %v5741_v47  ;;  %v5357_v19 = vld [vmem:[#allocation8 + $0x80] sm:$0xf] }
  0x6a   :  { %899 = vmatpush.bf16.msrb.mxu2 %v5282_v1  ;;  %886 = vmatpush.bf16.msra.mxu0 %v5026_v9  ;;  %v7543_v1 = vld [vmem:[#allocation8 + $0x35c] sm:$0xf0] }
  0x6b   :  { %5288 = vmatmul.msk.bf16.vlgmr.msrb.gmra.mxu3 %vm697_vm0, %v8161_v15  ;;  %v5677_v9 = vld [vmem:[#allocation8 + $0x300] sm:$0xf] }
  0x6c   :  { %873 = vmatpush.bf16.msra.mxu3 %v5278_v59  ;;  %860 = vmatpush.bf16.msrb.mxu1 %v5022_v0  ;;  %v6286_v59 = vor.u32 %v7687_v54, %v6285_v53  ;;  %v5709_v0 = vld [vmem:[#allocation8 + $0x340] sm:$0xf]  ;;  %v5678_v14 = vor.u32 %v7535_v10, %v5677_v9 }
  0x6d   :  { %v7455_v20 = vld [vmem:[#allocation8 + $0x9c] sm:$0xf0] }
  0x6e   :  { %900 = vmatpush.bf16.msrb.mxu2 %v5250_v13  ;;  %887 = vmatpush.bf16.msra.mxu0 %v4994_v22  ;;  %v7463_v13 = vld [vmem:[#allocation8 + $0xdc] sm:$0xf0]  ;;  %v5358_v23 = vor.u32 %v7455_v20, %v5357_v19 }
  0x6f   :  { %v7519_v22 = vld [vmem:[#allocation8 + $0x29c] sm:$0xf0] }
  0x70   :  { %874 = vmatpush.bf16.msra.mxu3 %v5246_v8  ;;  %861 = vmatpush.bf16.msrb.mxu1 %v4990_v12  ;;  %v5710_v8 = vor.u32 %v7543_v1, %v5709_v0  ;;  %v5389_v12 = vld [vmem:[#allocation8 + $0xc0] sm:$0xf] }
  0x71   :  { %v5390_v18 = vor.u32 %v7463_v13, %v5389_v12  ;;  %v7447_v24 = vld [vmem:[#allocation8 + $0x5c] sm:$0xf0] }
  0x72   :  { %901 = vmatpush.bf16.msrb.mxu2 %v5218_v28  ;;  %888 = vmatpush.bf16.msra.mxu0 %v4962_v38  ;;  %v7439_v28 = vld [vmem:[#allocation8 + $0x1c] sm:$0xf0] }
  0x73   :  { %v6541_v29 = vld [vmem:[#allocation8 + $0x9c0] sm:$0xf] }
  0x74   :  { %875 = vmatpush.bf16.msra.mxu3 %v5214_v21  ;;  %862 = vmatpush.bf16.msrb.mxu1 %v4958_v27  ;;  %v5613_v21 = vld [vmem:[#allocation8 + $0x280] sm:$0xf] }
  0x75   :  { %v5614_v25 = vor.u32 %v7519_v22, %v5613_v21  ;;  %v5293_v27 = vld [vmem:[#allocation8] sm:$0xf] }
  0x76   :  { %902 = vmatpush.bf16.msrb.mxu2 %v5186_v42  ;;  %889 = vmatpush.bf16.msra.mxu0 %v4930_v55  ;;  %v7751_v30 = vld [vmem:[#allocation8 + $0x9dc] sm:$0xf0]  ;;  %v5294_v31 = vor.u32 %v7439_v28, %v5293_v27 }
  0x77   :  { %v6542_v32 = vor.u32 %v7751_v30, %v6541_v29  ;;  %v6509_v33 = vld [vmem:[#allocation8 + $0x980] sm:$0xf] }
  0x78   :  { %876 = vmatpush.bf16.msra.mxu3 %v5182_v35  ;;  %863 = vmatpush.bf16.msrb.mxu1 %v4926_v41  ;;  %v7743_v34 = vld [vmem:[#allocation8 + $0x99c] sm:$0xf0] }
  0x79   :  { %5290 = vmatmul.msk.bf16.vlgmr.msrb.gmra.mxu2 %vm697_vm0, %v8161_v15  ;;  %890 = vmatmul.bf16.vlgmr.msra.gmra.mxu0 %v8167_v52  ;;  %v6510_v35 = vor.u32 %v7743_v34, %v6509_v33  ;;  %v6477_v36 = vld [vmem:[#allocation8 + $0x940] sm:$0xf] }
  0x7a   :  { %4043 = vmatpush.bf16.msra.mxu2 %v6030_v51  ;;  %4056 = vmatpush.bf16.msrb.mxu0 %v6286_v59  ;;  %v7735_v37 = vld [vmem:[#allocation8 + $0x95c] sm:$0xf0] }
  0x7b   :  { %864 = vmatmul.bf16.vlgmr.msrb.gmra.mxu1 %v8167_v52  ;;  %5289 = vmatmul.msk.bf16.vlgmr.msra.gmra.mxu3 %vm697_vm0, %v8161_v15  ;;  %v5646_v52 = vor.u32 %v7527_v17, %v5645_v16  ;;  %v5325_v15 = vld [vmem:[#allocation8 + $0x40] sm:$0xf]  ;;  %v6478_v43 = vor.u32 %v7735_v37, %v6477_v36 }
  0x7c   :  { %4017 = vmatpush.bf16.msrb.mxu3 %v5518_v40  ;;  %4030 = vmatpush.bf16.msra.mxu1 %v5774_v46  ;;  %v5326_v26 = vor.u32 %v7447_v24, %v5325_v15  ;;  %v5965_v38 = vld [vmem:[#allocation8 + $0x540] sm:$0xf] }
  0x7d   :  { %v7607_v39 = vld [vmem:[#allocation8 + $0x55c] sm:$0xf0] }
  0x7e   :  { %4044 = vmatpush.bf16.msra.mxu2 %v5998_v2  ;;  %4057 = vmatpush.bf16.msrb.mxu0 %v6254_v5  ;;  %v6221_v40 = vld [vmem:[#allocation8 + $0x740] sm:$0xf]  ;;  %v5966_v41 = vor.u32 %v7607_v39, %v5965_v38 }
  0x7f   :  { %v7671_v42 = vld [vmem:[#allocation8 + $0x75c] sm:$0xf0] }
  0x80   :  { %4018 = vmatpush.bf16.msrb.mxu3 %v5486_v56  ;;  %4031 = vmatpush.bf16.msra.mxu1 %v5742_v60  ;;  %v6222_v44 = vor.u32 %v7671_v42, %v6221_v40  ;;  %v5581_v45 = vld [vmem:[#allocation8 + $0x240] sm:$0xf] }
  0x81   :  { %v7511_v46 = vld [vmem:[#allocation8 + $0x25c] sm:$0xf0] }
  0x82   :  { %v6445_v47 = vld [vmem:[#allocation8 + $0x900] sm:$0xf]  ;;  %4045 = vmatpush.bf16.msra.mxu2 %v5966_v41  ;;  %v5582_v48 = vor.u32 %v7511_v46, %v5581_v45  ;;  %4058 = vmatpush.bf16.msrb.mxu0 %v6222_v44 }
  0x83   :  { %v7727_v49 = vld [vmem:[#allocation8 + $0x91c] sm:$0xf0] }
  0x84   :  { %4019 = vmatpush.bf16.msrb.mxu3 %v5454_v4  ;;  %4032 = vmatpush.bf16.msra.mxu1 %v5710_v8  ;;  %v5933_v50 = vld [vmem:[#allocation8 + $0x500] sm:$0xf]  ;;  %v6446_v59 = vor.u32 %v7727_v49, %v6445_v47 }
  0x85   :  { %v7599_v51 = vld [vmem:[#allocation8 + $0x51c] sm:$0xf0] }
  0x86   :  { %v5934_v53 = vor.u32 %v7599_v51, %v5933_v50  ;;  %v6189_v54 = vld [vmem:[#allocation8 + $0x700] sm:$0xf] }
  0x87   :  { %v7663_v55 = vld [vmem:[#allocation8 + $0x71c] sm:$0xf0] }
  0x88   :  { %4020 = vmatpush.bf16.msrb.mxu3 %v5422_v11  ;;  %4033 = vmatpush.bf16.msra.mxu1 %v5678_v14  ;;  %v5549_v56 = vld [vmem:[#allocation8 + $0x200] sm:$0xf]  ;;  %v6190_v57 = vor.u32 %v7663_v55, %v6189_v54 }
  0x89   :  { %v7503_v58 = vld [vmem:[#allocation8 + $0x21c] sm:$0xf0]  ;;  %4046 = vmatpush.bf16.msra.mxu2 %v5934_v53 }
  0x8a   :  { %v5550_v60 = vor.u32 %v7503_v58, %v5549_v56  ;;  %v6797_v61 = vld [vmem:[#allocation8 + $0xbc0] sm:$0xf]  ;;  %4059 = vmatpush.bf16.msrb.mxu0 %v6190_v57 }
  0x8b   :  { %v7815_v62 = vld [vmem:[#allocation8 + $0xbdc] sm:$0xf0] }
  0x8c   :  { %4021 = vmatpush.bf16.msrb.mxu3 %v5390_v18  ;;  %4034 = vmatpush.bf16.msra.mxu1 %v5646_v52  ;;  %v6413_v63 = vld [vmem:[#allocation8 + $0x8c0] sm:$0xf]  ;;  %v6798_v1 = vor.u32 %v7815_v62, %v6797_v61 }
  0x8d   :  { %v7719_v0 = vld [vmem:[#allocation8 + $0x8dc] sm:$0xf0] }
  0x8e   :  { %v5901_v2 = vld [vmem:[#allocation8 + $0x4c0] sm:$0xf]  ;;  %v6414_v7 = vor.u32 %v7719_v0, %v6413_v63  ;;  %v8189_v63 = vld [vmem:[#allocation7] sm:$0xff] }
  0x8f   :  { %v7591_v3 = vld [vmem:[#allocation8 + $0x4dc] sm:$0xf0] }
  0x90   :  { %4022 = vmatpush.bf16.msrb.mxu3 %v5358_v23  ;;  %4035 = vmatpush.bf16.msra.mxu1 %v5614_v25  ;;  %v6157_v4 = vld [vmem:[#allocation8 + $0x6c0] sm:$0xf]  ;;  %v5902_v5 = vor.u32 %v7591_v3, %v5901_v2 }
  0x91   :  { %v7655_v6 = vld [vmem:[#allocation8 + $0x6dc] sm:$0xf0] }
  0x92   :  { %v6158_v8 = vor.u32 %v7655_v6, %v6157_v4  ;;  %4047 = vmatpush.bf16.msra.mxu2 %v5902_v5  ;;  %v6381_v9 = vld [vmem:[#allocation8 + $0x880] sm:$0xf] }
  0x93   :  { %v7711_v10 = vld [vmem:[#allocation8 + $0x89c] sm:$0xf0] }
  0x94   :  { %4023 = vmatpush.bf16.msrb.mxu3 %v5326_v26  ;;  %4036 = vmatpush.bf16.msra.mxu1 %v5582_v48  ;;  %v6765_v11 = vld [vmem:[#allocation8 + $0xb80] sm:$0xf]  ;;  %v6382_v20 = vor.u32 %v7711_v10, %v6381_v9  ;;  %v8192_v9 = vunpack.c.l.bf16 %v8189_v63 }
  0x95   :  { %4060 = vmatpush.bf16.msrb.mxu0 %v6158_v8  ;;  %v7807_v12 = vld [vmem:[#allocation8 + $0xb9c] sm:$0xf0] }
  0x96   :  { %v5869_v13 = vld [vmem:[#allocation8 + $0x480] sm:$0xf]  ;;  %v6766_v16 = vor.u32 %v7807_v12, %v6765_v11 }
  0x97   :  { %v7583_v14 = vld [vmem:[#allocation8 + $0x49c] sm:$0xf0] }
  0x98   :  { %4024 = vmatpush.bf16.msrb.mxu3 %v5294_v31  ;;  %4037 = vmatpush.bf16.msra.mxu1 %v5550_v60  ;;  %v5870_v17 = vor.u32 %v7583_v14, %v5869_v13  ;;  %v6125_v18 = vld [vmem:[#allocation8 + $0x680] sm:$0xf] }
  0x99   :  { %v7647_v19 = vld [vmem:[#allocation8 + $0x69c] sm:$0xf0] }
  0x9a   :  { %v6126_v52 = vor.u32 %v7647_v19, %v6125_v18  ;;  %4048 = vmatpush.bf16.msra.mxu2 %v5870_v17  ;;  %v6349_v21 = vld [vmem:[#allocation8 + $0x840] sm:$0xf] }
  0x9b   :  { %v7703_v22 = vld [vmem:[#allocation8 + $0x85c] sm:$0xf0] }
  0x9c   :  { %4069 = vmatpush.bf16.msra.mxu3 %v6542_v32  ;;  %4082 = vmatpush.bf16.msrb.mxu1 %v6798_v1  ;;  %v6733_v23 = vld [vmem:[#allocation8 + $0xb40] sm:$0xf]  ;;  %v6350_v29 = vor.u32 %v7703_v22, %v6349_v21  ;;  %v681_v21 = vperm.slane %v8192_v9, 0 }
  0x9d   :  { %4061 = vmatpush.bf16.msrb.mxu0 %v6126_v52  ;;  %v7799_v15 = vld [vmem:[#allocation8 + $0xb5c] sm:$0xf0] }
  0x9e   :  { %v5837_v24 = vld [vmem:[#allocation8 + $0x440] sm:$0xf]  ;;  %v6734_v25 = vor.u32 %v7799_v15, %v6733_v23 }
  0x9f   :  { %v7575_v26 = vld [vmem:[#allocation8 + $0x45c] sm:$0xf0] }
  0xa0   :  { %4070 = vmatpush.bf16.msra.mxu3 %v6510_v35  ;;  %4083 = vmatpush.bf16.msrb.mxu1 %v6766_v16  ;;  %v6093_v27 = vld [vmem:[#allocation8 + $0x640] sm:$0xf]  ;;  %v5838_v30 = vor.u32 %v7575_v26, %v5837_v24 }
  0xa1   :  { %v7639_v28 = vld [vmem:[#allocation8 + $0x65c] sm:$0xf0] }
  0xa2   :  { %v6094_v31 = vor.u32 %v7639_v28, %v6093_v27  ;;  %v6317_v32 = vld [vmem:[#allocation8 + $0x800] sm:$0xf]  ;;  %4049 = vmatpush.bf16.msra.mxu2 %v5838_v30 }
  0xa3   :  { %v7695_v33 = vld [vmem:[#allocation8 + $0x81c] sm:$0xf0] }
  0xa4   :  { %4071 = vmatpush.bf16.msra.mxu3 %v6478_v43  ;;  %4084 = vmatpush.bf16.msrb.mxu1 %v6734_v25  ;;  %v6701_v34 = vld [vmem:[#allocation8 + $0xb00] sm:$0xf]  ;;  %v6318_v42 = vor.u32 %v7695_v33, %v6317_v32 }
  0xa5   :  { %4062 = vmatpush.bf16.msrb.mxu0 %v6094_v31  ;;  %v7791_v35 = vld [vmem:[#allocation8 + $0xb1c] sm:$0xf0] }
  0xa6   :  { %v5805_v36 = vld [vmem:[#allocation8 + $0x400] sm:$0xf]  ;;  %v6702_v38 = vor.u32 %v7791_v35, %v6701_v34 }
  0xa7   :  { %v7567_v37 = vld [vmem:[#allocation8 + $0x41c] sm:$0xf0] }
  0xa8   :  { %4072 = vmatpush.bf16.msra.mxu3 %v6446_v59  ;;  %v5806_v39 = vor.u32 %v7567_v37, %v5805_v36  ;;  %v6061_v40 = vld [vmem:[#allocation8 + $0x600] sm:$0xf]  ;;  %4085 = vmatpush.bf16.msrb.mxu1 %v6702_v38  ;;  %v7491_v37 = vld [vmem:[#allocation8 + $0x1c4] sm:$0xf] }
  0xa9   :  { %v7631_v41 = vld [vmem:[#allocation8 + $0x61c] sm:$0xf0]  ;;  %v5519_v38 = vld [vmem:[#allocation8 + $0x1e0] sm:$0xf0] }
  0xaa   :  { %v6062_v43 = vor.u32 %v7631_v41, %v6061_v40  ;;  %v7053_v44 = vld [vmem:[#allocation8 + $0xdc0] sm:$0xf]  ;;  %4050 = vmatpush.bf16.msra.mxu2 %v5806_v39  ;;  %v722_v62 = vpop.f32.mrf.mxu1  ;;  %v682_v40 = vperm.slane %v8192_v9, 2 }
  0xab   :  { %v7879_v45 = vld [vmem:[#allocation8 + $0xddc] sm:$0xf0] }
  0xac   :  { %4073 = vmatpush.bf16.msra.mxu3 %v6414_v7  ;;  %v7309_v46 = vld [vmem:[#allocation8 + $0xfc0] sm:$0xf]  ;;  %4063 = vmatpush.bf16.msrb.mxu0 %v6062_v43  ;;  %v7054_v48 = vor.u32 %v7879_v45, %v7053_v44  ;;  %v5522_v43 = vor.u32 %v7491_v37, %v5519_v38  ;;  %v5679_v37 = vld [vmem:[#allocation8 + $0x320] sm:$0xf0] }
  0xad   :  { %v7943_v47 = vld [vmem:[#allocation8 + $0xfdc] sm:$0xf0]  ;;  %v7451_v38 = vld [vmem:[#allocation8 + $0x84] sm:$0xf] }
  0xae   :  { %v7310_v49 = vor.u32 %v7943_v47, %v7309_v46  ;;  %v6669_v50 = vld [vmem:[#allocation8 + $0xac0] sm:$0xf]  ;;  %4095 = vmatpush.bf16.msrb.mxu2 %v7054_v48 }
  0xaf   :  { %v7783_v51 = vld [vmem:[#allocation8 + $0xadc] sm:$0xf0] }
  0xb0   :  { %4074 = vmatpush.bf16.msra.mxu3 %v6382_v20  ;;  %v6670_v53 = vor.u32 %v7783_v51, %v6669_v50  ;;  %v7021_v54 = vld [vmem:[#allocation8 + $0xd80] sm:$0xf]  ;;  %4108 = vmatpush.bf16.msra.mxu0 %v7310_v49  ;;  %v748_v17 = vpop.f32.mrf.mxu3  ;;  %v7483_v49 = vld [vmem:[#allocation8 + $0x184] sm:$0xf] }
  0xb1   :  { %v7871_v55 = vld [vmem:[#allocation8 + $0xd9c] sm:$0xf0]  ;;  %v5487_v50 = vld [vmem:[#allocation8 + $0x1a0] sm:$0xf0] }
  0xb2   :  { %v7022_v56 = vor.u32 %v7871_v55, %v7021_v54  ;;  %v7277_v57 = vld [vmem:[#allocation8 + $0xf80] sm:$0xf]  ;;  %4086 = vmatpush.bf16.msrb.mxu1 %v6670_v53  ;;  %v724_v22 = vpop.f32.mrf.mxu1 }
  0xb3   :  { %v7935_v58 = vld [vmem:[#allocation8 + $0xf9c] sm:$0xf0]  ;;  %v6031_v22 = vld [vmem:[#allocation8 + $0x5e0] sm:$0xf0] }
  0xb4   :  { %4075 = vmatpush.bf16.msra.mxu3 %v6350_v29  ;;  %v7278_v59 = vor.u32 %v7935_v58, %v7277_v57  ;;  %v6637_v60 = vld [vmem:[#allocation8 + $0xa80] sm:$0xf]  ;;  %4096 = vmatpush.bf16.msrb.mxu2 %v7022_v56  ;;  %v7555_v56 = vld [vmem:[#allocation8 + $0x3c4] sm:$0xf] }
  0xb5   :  { %v7775_v61 = vld [vmem:[#allocation8 + $0xa9c] sm:$0xf0] }
  0xb6   :  { %v6638_v0 = vor.u32 %v7775_v61, %v6637_v60  ;;  %v6989_v1 = vld [vmem:[#allocation8 + $0xd40] sm:$0xf]  ;;  %4109 = vmatpush.bf16.msra.mxu0 %v7278_v59  ;;  %v709_v28 = vpop.f32.mrf.mxu0  ;;  %v5490_v61 = vor.u32 %v7483_v49, %v5487_v50  ;;  %v684_v49 = vperm.slane %v8192_v9, 6  ;;  %v7443_v50 = vld [vmem:[#allocation8 + $0x44] sm:$0xf] }
  0xb7   :  { %v7863_v2 = vld [vmem:[#allocation8 + $0xd5c] sm:$0xf0]  ;;  %v710_v29 = vadd.f32 %v709_v28, %v681_v21  ;;  %v7619_v21 = vld [vmem:[#allocation8 + $0x5c4] sm:$0xf] }
  0xb8   :  { %4076 = vmatpush.bf16.msra.mxu3 %v6318_v42  ;;  %v7245_v3 = vld [vmem:[#allocation8 + $0xf40] sm:$0xf]  ;;  %v6990_v4 = vor.u32 %v7863_v2, %v6989_v1  ;;  %4087 = vmatpush.bf16.msrb.mxu1 %v6638_v0  ;;  %v750_v32 = vpop.f32.mrf.mxu3  ;;  %v5391_v28 = vld [vmem:[#allocation8 + $0xe0] sm:$0xf0] }
  0xb9   :  { %v7927_v5 = vld [vmem:[#allocation8 + $0xf5c] sm:$0xf0]  ;;  %v723_v36 = vadd.f32 %v722_v62, %v710_v29  ;;  %v5775_v62 = vld [vmem:[#allocation8 + $0x3e0] sm:$0xf0]  ;;  %v6034_v29 = vor.u32 %v7619_v21, %v6031_v22 }
  0xba   :  { %v7246_v6 = vor.u32 %v7927_v5, %v7245_v3  ;;  %v6605_v7 = vld [vmem:[#allocation8 + $0xa40] sm:$0xf]  ;;  %4097 = vmatpush.bf16.msrb.mxu2 %v6990_v4  ;;  %v683_v3 = vperm.slane %v8192_v9, 4  ;;  %v7475_v4 = vld [vmem:[#allocation8 + $0x144] sm:$0xf] }
  0xbb   :  { %v7767_v8 = vld [vmem:[#allocation8 + $0xa5c] sm:$0xf0]  ;;  %v908_v41 = vmax.f32 %v723_v36, 0.0  ;;  %v5455_v5 = vld [vmem:[#allocation8 + $0x160] sm:$0xf0] }
  0xbc   :  { %v6606_v10 = vor.u32 %v7767_v8, %v6605_v7  ;;  %v6957_v11 = vld [vmem:[#allocation8 + $0xd00] sm:$0xf]  ;;  %4110 = vmatpush.bf16.msra.mxu0 %v7246_v6  ;;  %v735_v48 = vpop.f32.mrf.mxu2  ;;  %v5778_v8 = vor.u32 %v7555_v56, %v5775_v62  ;;  %v7611_v32 = vld [vmem:[#allocation8 + $0x584] sm:$0xf] }
  0xbd   :  { %v7855_v12 = vld [vmem:[#allocation8 + $0xd1c] sm:$0xf0]  ;;  %v8196_v47 = vpack.c.bf16 %v908_v41, %v908_v41  ;;  %v736_v54 = vadd.f32 %v735_v48, %v682_v40  ;;  %v7531_v36 = vld [vmem:[#allocation8 + $0x304] sm:$0xf] }
  0xbe   :  { %v7213_v13 = vld [vmem:[#allocation8 + $0xf00] sm:$0xf]  ;;  %v6958_v18 = vor.u32 %v7855_v12, %v6957_v11  ;;  %4088 = vmatpush.bf16.msrb.mxu1 %v6606_v10  ;;  %v711_v55 = vpop.f32.mrf.mxu0  ;;  %v5458_v12 = vor.u32 %v7475_v4, %v5455_v5  ;;  %v5647_v48 = vld [vmem:[#allocation8 + $0x2e0] sm:$0xf0] }
  0xbf   :  { %v7919_v14 = vld [vmem:[#allocation8 + $0xf1c] sm:$0xf0]  ;;  %4025 = vmatmul.bf16.vlgmr.msrb.gmra.mxu3 %v8196_v47  ;;  %v749_v59 = vadd.f32 %v748_v17, %v736_v54  ;;  %v7595_v56 = vld [vmem:[#allocation8 + $0x504] sm:$0xf] }
  0xc0   :  { %v6573_v16 = vld [vmem:[#allocation8 + $0xa00] sm:$0xf]  ;;  %v7214_v20 = vor.u32 %v7919_v14, %v7213_v13  ;;  %4098 = vmatpush.bf16.msrb.mxu2 %v6958_v18  ;;  %v774_v60 = vpop.f32.mrf.mxu3  ;;  %4121 = vmatpush.bf16.msrb.mxu3 %v5522_v43  ;;  %v7547_v13 = vld [vmem:[#allocation8 + $0x384] sm:$0xf] }
  0xc1   :  { %v7759_v19 = vld [vmem:[#allocation8 + $0xa1c] sm:$0xf0]  ;;  %v909_v7 = vmax.f32 %v749_v59, 0.0  ;;  %v5743_v14 = vld [vmem:[#allocation8 + $0x3a0] sm:$0xf0] }
  0xc2   :  { %v6574_v52 = vor.u32 %v7759_v19, %v6573_v16  ;;  %v6925_v23 = vld [vmem:[#allocation8 + $0xcc0] sm:$0xf]  ;;  %4111 = vmatpush.bf16.msra.mxu0 %v7214_v20  ;;  %v7467_v18 = vld [vmem:[#allocation8 + $0x104] sm:$0xf] }
  0xc3   :  { %v7847_v15 = vld [vmem:[#allocation8 + $0xcdc] sm:$0xf0]  ;;  %v8200_v10 = vpack.c.bf16 %v909_v7, %v909_v7  ;;  %v5423_v19 = vld [vmem:[#allocation8 + $0x120] sm:$0xf0] }
  0xc4   :  { %v7181_v24 = vld [vmem:[#allocation8 + $0xec0] sm:$0xf]  ;;  %v6926_v25 = vor.u32 %v7847_v15, %v6925_v23  ;;  %4089 = vmatpush.bf16.msrb.mxu1 %v6574_v52  ;;  %4122 = vmatpush.bf16.msrb.mxu3 %v5490_v61  ;;  %v737_v17 = vpop.f32.mrf.mxu2  ;;  %v5746_v52 = vor.u32 %v7547_v13, %v5743_v14  ;;  %v5426_v15 = vor.u32 %v7467_v18, %v5423_v19  ;;  %v7603_v43 = vld [vmem:[#allocation8 + $0x544] sm:$0xf] }
  0xc5   :  { %v7911_v26 = vld [vmem:[#allocation8 + $0xedc] sm:$0xf0]  ;;  %4038 = vmatmul.bf16.vlgmr.msra.gmra.mxu1 %v8200_v10  ;;  %v5615_v61 = vld [vmem:[#allocation8 + $0x2a0] sm:$0xf0] }
  0xc6   :  { %v7182_v27 = vor.u32 %v7911_v26, %v7181_v24  ;;  %v6893_v30 = vld [vmem:[#allocation8 + $0xc80] sm:$0xf]  ;;  %4099 = vmatpush.bf16.msrb.mxu2 %v6926_v25  ;;  %v7539_v24 = vld [vmem:[#allocation8 + $0x344] sm:$0xf] }
  0xc7   :  { %v7839_v31 = vld [vmem:[#allocation8 + $0xc9c] sm:$0xf0]  ;;  %v5711_v25 = vld [vmem:[#allocation8 + $0x360] sm:$0xf0] }
  0xc8   :  { %v6894_v33 = vor.u32 %v7839_v31, %v6893_v30  ;;  %v7149_v34 = vld [vmem:[#allocation8 + $0xe80] sm:$0xf]  ;;  %4112 = vmatpush.bf16.msra.mxu0 %v7182_v27  ;;  %v761_v11 = vpop.f32.mrf.mxu1  ;;  %4134 = vmatpush.bf16.msra.mxu1 %v5778_v8  ;;  %v776_v23 = vpop.f32.mrf.mxu3  ;;  %v7459_v27 = vld [vmem:[#allocation8 + $0xc4] sm:$0xf]  ;;  %v5714_v31 = vor.u32 %v7539_v24, %v5711_v25 }
  0xc9   :  { %v7903_v35 = vld [vmem:[#allocation8 + $0xe9c] sm:$0xf0]  ;;  %v762_v16 = vadd.f32 %v761_v11, %v683_v3  ;;  %4123 = vmatpush.bf16.msrb.mxu3 %v5458_v12  ;;  %v5295_v9 = vld [vmem:[#allocation8 + $0x20] sm:$0xf0] }
  0xca   :  { %v7150_v39 = vor.u32 %v7903_v35, %v7149_v34  ;;  %v6861_v42 = vld [vmem:[#allocation8 + $0xc40] sm:$0xf]  ;;  %4100 = vmatpush.bf16.msrb.mxu2 %v6894_v33  ;;  %v5999_v33 = vld [vmem:[#allocation8 + $0x5a0] sm:$0xf0]  ;;  %v5394_v35 = vor.u32 %v7459_v27, %v5391_v28 }
  0xcb   :  { %v7831_v44 = vld [vmem:[#allocation8 + $0xc5c] sm:$0xf0]  ;;  %v775_v20 = vadd.f32 %v774_v60, %v762_v16  ;;  %v6002_v41 = vor.u32 %v7611_v32, %v5999_v33  ;;  %v7515_v60 = vld [vmem:[#allocation8 + $0x284] sm:$0xf] }
  0xcc   :  { %v7117_v45 = vld [vmem:[#allocation8 + $0xe40] sm:$0xf]  ;;  %4113 = vmatpush.bf16.msra.mxu0 %v7150_v39  ;;  %v6862_v51 = vor.u32 %v7831_v44, %v6861_v42  ;;  %4135 = vmatpush.bf16.msra.mxu1 %v5746_v52  ;;  %v5359_v39 = vld [vmem:[#allocation8 + $0xa0] sm:$0xf0]  ;;  %v800_v40 = vpop.f32.mrf.mxu2  ;;  %v5682_v42 = vor.u32 %v7531_v36, %v5679_v37  ;;  %v5618_v7 = vor.u32 %v7515_v60, %v5615_v61 }
  0xcd   :  { %v7895_v46 = vld [vmem:[#allocation8 + $0xe5c] sm:$0xf0]  ;;  %v910_v26 = vmax.f32 %v775_v20, 0.0  ;;  %4124 = vmatpush.bf16.msrb.mxu3 %v5426_v15  ;;  %v5967_v44 = vld [vmem:[#allocation8 + $0x560] sm:$0xf0] }
  0xce   :  { %v7118_v53 = vor.u32 %v7895_v46, %v7117_v45  ;;  %v6829_v57 = vld [vmem:[#allocation8 + $0xc00] sm:$0xf]  ;;  %4101 = vmatpush.bf16.msrb.mxu2 %v6862_v51  ;;  %v5362_v45 = vor.u32 %v7451_v38, %v5359_v39  ;;  %v7523_v46 = vld [vmem:[#allocation8 + $0x2c4] sm:$0xf]  ;;  %v5970_v54 = vor.u32 %v7603_v43, %v5967_v44 }
  0xcf   :  { %v7823_v58 = vld [vmem:[#allocation8 + $0xc1c] sm:$0xf0]  ;;  %v8203_v30 = vpack.c.bf16 %v910_v26, %v910_v26  ;;  %v5327_v51 = vld [vmem:[#allocation8 + $0x60] sm:$0xf0]  ;;  %v5650_v55 = vor.u32 %v7523_v46, %v5647_v48 }
  0xd0   :  { %v6830_v0 = vor.u32 %v7823_v58, %v6829_v57  ;;  %v7085_v1 = vld [vmem:[#allocation8 + $0xe00] sm:$0xf]  ;;  %4114 = vmatpush.bf16.msra.mxu0 %v7118_v53  ;;  %v763_v34 = vpop.f32.mrf.mxu1  ;;  %4136 = vmatpush.bf16.msra.mxu1 %v5714_v31  ;;  %v8208_v53 = vunpack.c.h.bf16 %v8189_v63  ;;  %v5935_v57 = vld [vmem:[#allocation8 + $0x520] sm:$0xf0]  ;;  %v5330_v59 = vor.u32 %v7443_v50, %v5327_v51 }
  0xd1   :  { %v7887_v2 = vld [vmem:[#allocation8 + $0xe1c] sm:$0xf0]  ;;  %4051 = vmatmul.bf16.vlgmr.msra.gmra.mxu2 %v8203_v30  ;;  %4125 = vmatpush.bf16.msrb.mxu3 %v5394_v35  ;;  %v7683_v63 = vld [vmem:[#allocation8 + $0x7c4] sm:$0xf]  ;;  %v5938_v4 = vor.u32 %v7595_v56, %v5935_v57 }
  0xd2   :  { %v7086_v6 = vor.u32 %v7887_v2, %v7085_v1  ;;  %4102 = vmatpush.bf16.msrb.mxu2 %v6830_v0  ;;  %v7435_v1 = vld [vmem:[#allocation8 + $0x4] sm:$0xf]  ;;  %v685_v2 = vperm.slane %v8208_v53, 0  ;;  %v686_v56 = vperm.slane %v8208_v53, 2 }
  0xd3   :  { %v7587_v8 = vld [vmem:[#allocation8 + $0x4c4] sm:$0xf]  ;;  %v5298_v12 = vor.u32 %v7435_v1, %v5295_v9 }
  0xd4   :  { %4115 = vmatpush.bf16.msra.mxu0 %v7086_v6  ;;  %4137 = vmatpush.bf16.msra.mxu1 %v5682_v42  ;;  %v802_v3 = vpop.f32.mrf.mxu2  ;;  %v6287_v6 = vld [vmem:[#allocation8 + $0x7e0] sm:$0xf0] }
  0xd5   :  { %4126 = vmatpush.bf16.msrb.mxu3 %v5362_v45  ;;  %v5903_v11 = vld [vmem:[#allocation8 + $0x4e0] sm:$0xf0]  ;;  %v6290_v19 = vor.u32 %v7683_v63, %v6287_v6 }
  0xd6   :  { %4147 = vmatpush.bf16.msra.mxu2 %v6034_v29  ;;  %v787_v58 = vpop.f32.mrf.mxu0  ;;  %v7507_v13 = vld [vmem:[#allocation8 + $0x244] sm:$0xf]  ;;  %v5906_v20 = vor.u32 %v7587_v8, %v5903_v11 }
  0xd7   :  { %v788_v62 = vadd.f32 %v787_v58, %v684_v49  ;;  %v5583_v14 = vld [vmem:[#allocation8 + $0x260] sm:$0xf0] }
  0xd8   :  { %v826_v0 = vpop.f32.mrf.mxu1  ;;  %4138 = vmatpush.bf16.msra.mxu1 %v5650_v55  ;;  %v7747_v21 = vld [vmem:[#allocation8 + $0x9c4] sm:$0xf]  ;;  %v5586_v15 = vor.u32 %v7507_v13, %v5583_v14 }
  0xd9   :  { %v801_v5 = vadd.f32 %v800_v40, %v788_v62  ;;  %4127 = vmatpush.bf16.msrb.mxu3 %v5330_v59  ;;  %v7675_v22 = vld [vmem:[#allocation8 + $0x784] sm:$0xf] }
  0xda   :  { %4148 = vmatpush.bf16.msra.mxu2 %v6002_v41  ;;  %v6255_v23 = vld [vmem:[#allocation8 + $0x7a0] sm:$0xf0] }
  0xdb   :  { %v911_v16 = vmax.f32 %v801_v5, 0.0  ;;  %v6543_v26 = vld [vmem:[#allocation8 + $0x9e0] sm:$0xf0]  ;;  %v6258_v34 = vor.u32 %v7675_v22, %v6255_v23 }
  0xdc   :  { %4139 = vmatpush.bf16.msra.mxu1 %v5618_v7  ;;  %v7499_v27 = vld [vmem:[#allocation8 + $0x204] sm:$0xf]  ;;  %v6546_v35 = vor.u32 %v7747_v21, %v6543_v26 }
  0xdd   :  { %v8211_v52 = vpack.c.bf16 %v911_v16, %v911_v16  ;;  %4128 = vmatpush.bf16.msrb.mxu3 %v5298_v12  ;;  %v5551_v28 = vld [vmem:[#allocation8 + $0x220] sm:$0xf0] }
  0xde   :  { %4149 = vmatpush.bf16.msra.mxu2 %v5970_v54  ;;  %v813_v17 = vpop.f32.mrf.mxu3  ;;  %v789_v25 = vpop.f32.mrf.mxu0  ;;  %v7579_v31 = vld [vmem:[#allocation8 + $0x484] sm:$0xf]  ;;  %v5554_v38 = vor.u32 %v7499_v27, %v5551_v28 }
  0xdf   :  { %v814_v18 = vadd.f32 %v813_v17, %v685_v2  ;;  %4064 = vmatmul.bf16.vlgmr.msrb.gmra.mxu0 %v8211_v52  ;;  %v5871_v32 = vld [vmem:[#allocation8 + $0x4a0] sm:$0xf0] }
  0xe0   :  { %v828_v29 = vpop.f32.mrf.mxu1  ;;  %4160 = vmatpush.bf16.msrb.mxu0 %v6290_v19  ;;  %v7667_v36 = vld [vmem:[#allocation8 + $0x744] sm:$0xf]  ;;  %4140 = vmatpush.bf16.msra.mxu1 %v5586_v15  ;;  %v5874_v42 = vor.u32 %v7579_v31, %v5871_v32  ;;  %v687_v31 = vperm.slane %v8208_v53, 4 }
  0xe1   :  { %v827_v24 = vadd.f32 %v826_v0, %v814_v18  ;;  %v6223_v37 = vld [vmem:[#allocation8 + $0x760] sm:$0xf0]  ;;  %v688_v29 = vperm.slane %v8208_v53, 6 }
  0xe2   :  { %4150 = vmatpush.bf16.msra.mxu2 %v5938_v4  ;;  %v7739_v40 = vld [vmem:[#allocation8 + $0x984] sm:$0xf]  ;;  %v6226_v46 = vor.u32 %v7667_v36, %v6223_v37 }
  0xe3   :  { %v912_v33 = vmax.f32 %v827_v24, 0.0  ;;  %v6511_v41 = vld [vmem:[#allocation8 + $0x9a0] sm:$0xf0] }
  0xe4   :  { %v7571_v44 = vld [vmem:[#allocation8 + $0x444] sm:$0xf]  ;;  %4161 = vmatpush.bf16.msrb.mxu0 %v6258_v34  ;;  %v6514_v48 = vor.u32 %v7739_v40, %v6511_v41  ;;  %4141 = vmatpush.bf16.msra.mxu1 %v5554_v38 }
  0xe5   :  { %v8214_v39 = vpack.c.bf16 %v912_v33, %v912_v33  ;;  %v5839_v45 = vld [vmem:[#allocation8 + $0x460] sm:$0xf0] }
  0xe6   :  { %4151 = vmatpush.bf16.msra.mxu2 %v5906_v20  ;;  %v815_v43 = vpop.f32.mrf.mxu3  ;;  %v7659_v49 = vld [vmem:[#allocation8 + $0x704] sm:$0xf]  ;;  %v5842_v55 = vor.u32 %v7571_v44, %v5839_v45 }
  0xe7   :  { %4077 = vmatmul.bf16.vlgmr.msra.gmra.mxu3 %v8214_v39  ;;  %v6191_v50 = vld [vmem:[#allocation8 + $0x720] sm:$0xf0] }
  0xe8   :  { %4173 = vmatpush.bf16.msra.mxu3 %v6546_v35  ;;  %v7731_v51 = vld [vmem:[#allocation8 + $0x944] sm:$0xf]  ;;  %4162 = vmatpush.bf16.msrb.mxu0 %v6226_v46  ;;  %v6194_v59 = vor.u32 %v7659_v49, %v6191_v50 }
  0xe9   :  { %v6479_v54 = vld [vmem:[#allocation8 + $0x960] sm:$0xf0] }
  0xea   :  { %4152 = vmatpush.bf16.msra.mxu2 %v5874_v42  ;;  %v7563_v57 = vld [vmem:[#allocation8 + $0x404] sm:$0xf]  ;;  %v6482_v60 = vor.u32 %v7731_v51, %v6479_v54 }
  0xeb   :  { %v5807_v58 = vld [vmem:[#allocation8 + $0x420] sm:$0xf0] }
  0xec   :  { %4174 = vmatpush.bf16.msra.mxu3 %v6514_v48  ;;  %v7651_v61 = vld [vmem:[#allocation8 + $0x6c4] sm:$0xf]  ;;  %v839_v0 = vpop.f32.mrf.mxu2  ;;  %v5810_v2 = vor.u32 %v7563_v57, %v5807_v58  ;;  %4163 = vmatpush.bf16.msrb.mxu0 %v6194_v59  ;;  %v5525_v58 = vld [vmem:[#allocation8 + $0x1c8] sm:$0xf] }
  0xed   :  { %v6159_v62 = vld [vmem:[#allocation8 + $0x6e0] sm:$0xf0]  ;;  %v840_v3 = vadd.f32 %v839_v0, %v686_v56  ;;  %v7496_v59 = vld [vmem:[#allocation8 + $0x1e4] sm:$0xf0] }
  0xee   :  { %v7723_v1 = vld [vmem:[#allocation8 + $0x904] sm:$0xf]  ;;  %4153 = vmatpush.bf16.msra.mxu2 %v5842_v55  ;;  %v852_v63 = vpop.f32.mrf.mxu3  ;;  %v6162_v4 = vor.u32 %v7651_v61, %v6159_v62 }
  0xef   :  { %v6447_v9 = vld [vmem:[#allocation8 + $0x920] sm:$0xf0]  ;;  %v853_v5 = vadd.f32 %v852_v63, %v840_v3 }
  0xf0   :  { %4175 = vmatpush.bf16.msra.mxu3 %v6482_v60  ;;  %v6450_v6 = vor.u32 %v7723_v1, %v6447_v9  ;;  %v7715_v7 = vld [vmem:[#allocation8 + $0x8c4] sm:$0xf]  ;;  %4164 = vmatpush.bf16.msrb.mxu0 %v6162_v4 }
  0xf1   :  { %v7811_v8 = vld [vmem:[#allocation8 + $0xbc4] sm:$0xf]  ;;  %v913_v16 = vmax.f32 %v853_v5, 0.0  ;;  %v5526_v5 = vor.u32 %v7496_v59, %v5525_v58  ;;  %v7464_v58 = vld [vmem:[#allocation8 + $0xe4] sm:$0xf0] }
  0xf2   :  { %v6799_v11 = vld [vmem:[#allocation8 + $0xbe0] sm:$0xf0]  ;;  %4154 = vmatpush.bf16.msra.mxu2 %v5810_v2  ;;  %v5781_v59 = vld [vmem:[#allocation8 + $0x3c8] sm:$0xf] }
  0xf3   :  { %v6415_v12 = vld [vmem:[#allocation8 + $0x8e0] sm:$0xf0]  ;;  %v6802_v17 = vor.u32 %v7811_v8, %v6799_v11  ;;  %v8218_v18 = vpack.c.bf16 %v913_v16, %v913_v16 }
  0xf4   :  { %v7643_v13 = vld [vmem:[#allocation8 + $0x684] sm:$0xf]  ;;  %4176 = vmatpush.bf16.msra.mxu3 %v6450_v6  ;;  %v6418_v20 = vor.u32 %v7715_v7, %v6415_v12  ;;  %v841_v24 = vpop.f32.mrf.mxu2 }
  0xf5   :  { %v6127_v14 = vld [vmem:[#allocation8 + $0x6a0] sm:$0xf0]  ;;  %4090 = vmatmul.bf16.vlgmr.msrb.gmra.mxu1 %v8218_v18 }
  0xf6   :  { %v7707_v21 = vld [vmem:[#allocation8 + $0x884] sm:$0xf]  ;;  %v6130_v15 = vor.u32 %v7643_v13, %v6127_v14  ;;  %v854_v28 = vpop.f32.mrf.mxu3  ;;  %4186 = vmatpush.bf16.msrb.mxu1 %v6802_v17  ;;  %v891_v33 = vpop.f32.mrf.mxu0  ;;  %v5493_v13 = vld [vmem:[#allocation8 + $0x188] sm:$0xf] }
  0xf7   :  { %v7803_v22 = vld [vmem:[#allocation8 + $0xb84] sm:$0xf]  ;;  %4129 = vmatmul.bf16.vlgmr.msrb.gmra.mxu3 %v8196_v47  ;;  %v892_v43 = vadd.f32 %v891_v33, %v688_v29  ;;  %v7488_v14 = vld [vmem:[#allocation8 + $0x1a4] sm:$0xf0] }
  0xf8   :  { %v865_v19 = vpop.f32.mrf.mxu1  ;;  %v6767_v23 = vld [vmem:[#allocation8 + $0xba0] sm:$0xf0]  ;;  %4177 = vmatpush.bf16.msra.mxu3 %v6418_v20  ;;  %4165 = vmatpush.bf16.msrb.mxu0 %v6130_v15  ;;  %v5494_v15 = vor.u32 %v7488_v14, %v5493_v13  ;;  %v5461_v29 = vld [vmem:[#allocation8 + $0x148] sm:$0xf] }
  0xf9   :  { %v6383_v25 = vld [vmem:[#allocation8 + $0x8a0] sm:$0xf0]  ;;  %v6770_v32 = vor.u32 %v7803_v22, %v6767_v23  ;;  %v866_v44 = vadd.f32 %v865_v19, %v687_v31  ;;  %v7480_v31 = vld [vmem:[#allocation8 + $0x164] sm:$0xf0] }
  0xfa   :  { %v7635_v26 = vld [vmem:[#allocation8 + $0x644] sm:$0xf]  ;;  %v6386_v34 = vor.u32 %v7707_v21, %v6383_v25 }
  0xfb   :  { %v6095_v27 = vld [vmem:[#allocation8 + $0x660] sm:$0xf0]  ;;  %4187 = vmatpush.bf16.msrb.mxu1 %v6770_v32 }
  0xfc   :  { %v7699_v35 = vld [vmem:[#allocation8 + $0x844] sm:$0xf]  ;;  %v6098_v38 = vor.u32 %v7635_v26, %v6095_v27  ;;  %4178 = vmatpush.bf16.msra.mxu3 %v6386_v34  ;;  %v904_v51 = vpop.f32.mrf.mxu2 }
  0xfd   :  { %v7795_v36 = vld [vmem:[#allocation8 + $0xb44] sm:$0xf]  ;;  %v905_v57 = vadd.f32 %v904_v51, %v892_v43  ;;  %v5429_v43 = vld [vmem:[#allocation8 + $0x108] sm:$0xf] }
  0xfe   :  { %v6735_v37 = vld [vmem:[#allocation8 + $0xb60] sm:$0xf0]  ;;  %4166 = vmatpush.bf16.msrb.mxu0 %v6098_v38  ;;  %v878_v56 = vpop.f32.mrf.mxu3  ;;  %v893_v0 = vpop.f32.mrf.mxu0 }
  0xff   :  { %v6351_v40 = vld [vmem:[#allocation8 + $0x860] sm:$0xf0]  ;;  %v6738_v45 = vor.u32 %v7795_v36, %v6735_v37  ;;  %v879_v61 = vadd.f32 %v878_v56, %v866_v44  ;;  %v915_v3 = vmax.f32 %v905_v57, 0.0  ;;  %v5462_v37 = vor.u32 %v7480_v31, %v5461_v29  ;;  %v7472_v44 = vld [vmem:[#allocation8 + $0x124] sm:$0xf0] }
 0x100   :  { %v7627_v41 = vld [vmem:[#allocation8 + $0x604] sm:$0xf]  ;;  %v867_v53 = vpop.f32.mrf.mxu1  ;;  %v6354_v46 = vor.u32 %v7699_v35, %v6351_v40 }
 0x101   :  { %v6063_v42 = vld [vmem:[#allocation8 + $0x620] sm:$0xf0]  ;;  %4188 = vmatpush.bf16.msrb.mxu1 %v6738_v45  ;;  %v914_v4 = vmax.f32 %v879_v61, 0.0  ;;  %v8224_v8 = vpack.c.bf16 %v915_v3, %v915_v3 }
 0x102   :  { %v7787_v48 = vld [vmem:[#allocation8 + $0xb04] sm:$0xf]  ;;  %v6066_v50 = vor.u32 %v7627_v41, %v6063_v42  ;;  %4179 = vmatpush.bf16.msra.mxu3 %v6354_v46 }
 0x103   :  { %v6703_v49 = vld [vmem:[#allocation8 + $0xb20] sm:$0xf0]  ;;  %v8226_v17 = vpack.c.bf16 %v914_v4, %v914_v4  ;;  %4116 = vmatmul.bf16.vlgmr.msra.gmra.mxu0 %v8224_v8 }
 0x104   :  { %v7691_v54 = vld [vmem:[#allocation8 + $0x804] sm:$0xf]  ;;  %v6706_v62 = vor.u32 %v7787_v48, %v6703_v49  ;;  %4167 = vmatpush.bf16.msrb.mxu0 %v6066_v50  ;;  %v906_v23 = vpop.f32.mrf.mxu2  ;;  %v5430_v50 = vor.u32 %v7472_v44, %v5429_v43  ;;  %v6549_v43 = vld [vmem:[#allocation8 + $0x9c8] sm:$0xf] }
 0x105   :  { %v6319_v55 = vld [vmem:[#allocation8 + $0x820] sm:$0xf0]  ;;  %4103 = vmatmul.bf16.vlgmr.msrb.gmra.mxu2 %v8226_v17  ;;  %4142 = vmatmul.bf16.vlgmr.msra.gmra.mxu1 %v8200_v10  ;;  %v7448_v23 = vld [vmem:[#allocation8 + $0x64] sm:$0xf0] }
 0x106   :  { %v7875_v60 = vld [vmem:[#allocation8 + $0xdc4] sm:$0xf]  ;;  %v6322_v63 = vor.u32 %v7691_v54, %v6319_v55  ;;  %4189 = vmatpush.bf16.msrb.mxu1 %v6706_v62  ;;  %v880_v26 = vpop.f32.mrf.mxu3  ;;  %v5397_v55 = vld [vmem:[#allocation8 + $0xc8] sm:$0xf] }
 0x107   :  { %v7055_v1 = vld [vmem:[#allocation8 + $0xde0] sm:$0xf0]  ;;  %v7752_v44 = vld [vmem:[#allocation8 + $0x9e4] sm:$0xf0] }
 0x108   :  { %v7939_v9 = vld [vmem:[#allocation8 + $0xfc4] sm:$0xf]  ;;  %v7058_v11 = vor.u32 %v7875_v60, %v7055_v1  ;;  %4180 = vmatpush.bf16.msra.mxu3 %v6322_v63  ;;  %v7560_v60 = vld [vmem:[#allocation8 + $0x3e4] sm:$0xf0] }
 0x109   :  { %v7311_v2 = vld [vmem:[#allocation8 + $0xfe0] sm:$0xf0]  ;;  %v5782_v3 = vor.u32 %v7560_v60, %v5781_v59  ;;  %v5365_v63 = vld [vmem:[#allocation8 + $0x88] sm:$0xf] }
 0x10a   :  { %v7779_v6 = vld [vmem:[#allocation8 + $0xac4] sm:$0xf]  ;;  %v7314_v12 = vor.u32 %v7939_v9, %v7311_v2  ;;  %4199 = vmatpush.bf16.msrb.mxu2 %v7058_v11  ;;  %v5398_v2 = vor.u32 %v7464_v58, %v5397_v55  ;;  %v6550_v55 = vor.u32 %v7752_v44, %v6549_v43  ;;  %v6517_v60 = vld [vmem:[#allocation8 + $0x988] sm:$0xf] }
 0x10b   :  { %v6671_v7 = vld [vmem:[#allocation8 + $0xae0] sm:$0xf0]  ;;  %4181 = vmatmul.bf16.vlgmr.msra.gmra.mxu3 %v8214_v39  ;;  %v6165_v43 = vld [vmem:[#allocation8 + $0x6c8] sm:$0xf] }
 0x10c   :  { %v7867_v16 = vld [vmem:[#allocation8 + $0xd84] sm:$0xf]  ;;  %v6674_v22 = vor.u32 %v7779_v6, %v6671_v7  ;;  %4225 = vmatpush.bf16.msrb.mxu3 %v5526_v5  ;;  %4212 = vmatpush.bf16.msra.mxu0 %v7314_v12  ;;  %v7456_v5 = vld [vmem:[#allocation8 + $0xa4] sm:$0xf0] }
 0x10d   :  { %v7023_v19 = vld [vmem:[#allocation8 + $0xda0] sm:$0xf0]  ;;  %v5749_v6 = vld [vmem:[#allocation8 + $0x388] sm:$0xf] }
 0x10e   :  { %v7931_v20 = vld [vmem:[#allocation8 + $0xf84] sm:$0xf]  ;;  %v7026_v27 = vor.u32 %v7867_v16, %v7023_v19  ;;  %4190 = vmatpush.bf16.msrb.mxu1 %v6674_v22  ;;  %v7552_v7 = vld [vmem:[#allocation8 + $0x3a4] sm:$0xf0]  ;;  %v5366_v19 = vor.u32 %v7456_v5, %v5365_v63 }
 0x10f   :  { %v7279_v21 = vld [vmem:[#allocation8 + $0xfa0] sm:$0xf0]  ;;  %v7520_v5 = vld [vmem:[#allocation8 + $0x2a4] sm:$0xf0] }
 0x110   :  { %v7771_v24 = vld [vmem:[#allocation8 + $0xa84] sm:$0xf]  ;;  %v7282_v28 = vor.u32 %v7931_v20, %v7279_v21  ;;  %4226 = vmatpush.bf16.msrb.mxu3 %v5494_v15  ;;  %4200 = vmatpush.bf16.msrb.mxu2 %v7026_v27  ;;  %v5750_v20 = vor.u32 %v7552_v7, %v5749_v6  ;;  %v5333_v21 = vld [vmem:[#allocation8 + $0x48] sm:$0xf] }
 0x111   :  { %v6639_v25 = vld [vmem:[#allocation8 + $0xaa0] sm:$0xf0]  ;;  %v5717_v15 = vld [vmem:[#allocation8 + $0x348] sm:$0xf]  ;;  %v5334_v31 = vor.u32 %v7448_v23, %v5333_v21 }
 0x112   :  { %v7859_v32 = vld [vmem:[#allocation8 + $0xd44] sm:$0xf]  ;;  %v6642_v36 = vor.u32 %v7771_v24, %v6639_v25  ;;  %4213 = vmatpush.bf16.msra.mxu0 %v7282_v28  ;;  %v7544_v24 = vld [vmem:[#allocation8 + $0x364] sm:$0xf0] }
 0x113   :  { %v6991_v33 = vld [vmem:[#allocation8 + $0xd60] sm:$0xf0]  ;;  %4168 = vmatmul.bf16.vlgmr.msrb.gmra.mxu0 %v8211_v52  ;;  %v6485_v7 = vld [vmem:[#allocation8 + $0x948] sm:$0xf] }
 0x114   :  { %v7923_v34 = vld [vmem:[#allocation8 + $0xf44] sm:$0xf]  ;;  %v6994_v41 = vor.u32 %v7859_v32, %v6991_v33  ;;  %4191 = vmatpush.bf16.msrb.mxu1 %v6642_v36  ;;  %4227 = vmatpush.bf16.msrb.mxu3 %v5462_v37  ;;  %v5718_v32 = vor.u32 %v7544_v24, %v5717_v15  ;;  %v5301_v33 = vld [vmem:[#allocation8 + $0x8] sm:$0xf] }
 0x115   :  { %v7247_v35 = vld [vmem:[#allocation8 + $0xf60] sm:$0xf0]  ;;  %4155 = vmatmul.bf16.vlgmr.msra.gmra.mxu2 %v8203_v30  ;;  %v7536_v37 = vld [vmem:[#allocation8 + $0x324] sm:$0xf0] }
 0x116   :  { %v7763_v38 = vld [vmem:[#allocation8 + $0xa44] sm:$0xf]  ;;  %v7250_v42 = vor.u32 %v7923_v34, %v7247_v35  ;;  %4201 = vmatpush.bf16.msrb.mxu2 %v6994_v41  ;;  %v7440_v34 = vld [vmem:[#allocation8 + $0x24] sm:$0xf0] }
 0x117   :  { %v6607_v40 = vld [vmem:[#allocation8 + $0xa60] sm:$0xf0]  ;;  %v5685_v35 = vld [vmem:[#allocation8 + $0x308] sm:$0xf] }
 0x118   :  { %v7851_v45 = vld [vmem:[#allocation8 + $0xd04] sm:$0xf]  ;;  %v6610_v49 = vor.u32 %v7763_v38, %v6607_v40  ;;  %4214 = vmatpush.bf16.msra.mxu0 %v7250_v42  ;;  %4228 = vmatpush.bf16.msrb.mxu3 %v5430_v50  ;;  %v6037_v50 = vld [vmem:[#allocation8 + $0x5c8] sm:$0xf] }
 0x119   :  { %v6959_v53 = vld [vmem:[#allocation8 + $0xd20] sm:$0xf0]  ;;  %v7512_v23 = vld [vmem:[#allocation8 + $0x264] sm:$0xf0] }
 0x11a   :  { %v7915_v46 = vld [vmem:[#allocation8 + $0xf04] sm:$0xf]  ;;  %v6962_v56 = vor.u32 %v7851_v45, %v6959_v53  ;;  %4192 = vmatpush.bf16.msrb.mxu1 %v6610_v49  ;;  %v6293_v53 = vld [vmem:[#allocation8 + $0x7c8] sm:$0xf]  ;;  %v5686_v49 = vor.u32 %v7536_v37, %v5685_v35 }
 0x11b   :  { %v7215_v48 = vld [vmem:[#allocation8 + $0xf20] sm:$0xf0]  ;;  %v6453_v24 = vld [vmem:[#allocation8 + $0x908] sm:$0xf] }
 0x11c   :  { %v7755_v51 = vld [vmem:[#allocation8 + $0xa04] sm:$0xf]  ;;  %v7218_v57 = vor.u32 %v7915_v46, %v7215_v48  ;;  %4202 = vmatpush.bf16.msrb.mxu2 %v6962_v56  ;;  %4229 = vmatpush.bf16.msrb.mxu3 %v5398_v2  ;;  %v7688_v46 = vld [vmem:[#allocation8 + $0x7e4] sm:$0xf0]  ;;  %v5302_v48 = vor.u32 %v7440_v34, %v5301_v33 }
 0x11d   :  { %v6575_v54 = vld [vmem:[#allocation8 + $0xa20] sm:$0xf0]  ;;  %v5653_v56 = vld [vmem:[#allocation8 + $0x2c8] sm:$0xf]  ;;  %v6294_v59 = vor.u32 %v7688_v46, %v6293_v53 }
 0x11e   :  { %v7907_v61 = vld [vmem:[#allocation8 + $0xec4] sm:$0xf]  ;;  %v6578_v0 = vor.u32 %v7755_v51, %v6575_v54  ;;  %4215 = vmatpush.bf16.msra.mxu0 %v7218_v57  ;;  %v7624_v51 = vld [vmem:[#allocation8 + $0x5e4] sm:$0xf0] }
 0x11f   :  { %v7183_v62 = vld [vmem:[#allocation8 + $0xee0] sm:$0xf0]  ;;  %v7528_v57 = vld [vmem:[#allocation8 + $0x2e4] sm:$0xf0] }
 0x120   :  { %v7843_v1 = vld [vmem:[#allocation8 + $0xcc4] sm:$0xf]  ;;  %v7186_v4 = vor.u32 %v7907_v61, %v7183_v62  ;;  %4193 = vmatpush.bf16.msrb.mxu1 %v6578_v0  ;;  %4230 = vmatpush.bf16.msrb.mxu3 %v5366_v19  ;;  %v7744_v61 = vld [vmem:[#allocation8 + $0x9a4] sm:$0xf0]  ;;  %v6038_v62 = vor.u32 %v7624_v51, %v6037_v50 }
 0x121   :  { %v6927_v9 = vld [vmem:[#allocation8 + $0xce0] sm:$0xf0]  ;;  %v6261_v0 = vld [vmem:[#allocation8 + $0x788] sm:$0xf]  ;;  %v6518_v63 = vor.u32 %v7744_v61, %v6517_v60 }
 0x122   :  { %v6930_v11 = vor.u32 %v7843_v1, %v6927_v9  ;;  %v7899_v12 = vld [vmem:[#allocation8 + $0xe84] sm:$0xf]  ;;  %4216 = vmatpush.bf16.msra.mxu0 %v7186_v4  ;;  %v7680_v1 = vld [vmem:[#allocation8 + $0x7a4] sm:$0xf0]  ;;  %v5654_v9 = vor.u32 %v7528_v57, %v5653_v56 }
 0x123   :  { %v7151_v13 = vld [vmem:[#allocation8 + $0xea0] sm:$0xf0]  ;;  %4194 = vmatmul.bf16.vlgmr.msrb.gmra.mxu1 %v8218_v18  ;;  %v6005_v2 = vld [vmem:[#allocation8 + $0x588] sm:$0xf]  ;;  %v6262_v6 = vor.u32 %v7680_v1, %v6261_v0 }
 0x124   :  { %v7835_v14 = vld [vmem:[#allocation8 + $0xc84] sm:$0xf]  ;;  %4238 = vmatpush.bf16.msra.mxu1 %v5782_v3  ;;  %v7154_v22 = vor.u32 %v7899_v12, %v7151_v13  ;;  %4203 = vmatpush.bf16.msrb.mxu2 %v6930_v11  ;;  %v7616_v3 = vld [vmem:[#allocation8 + $0x5a4] sm:$0xf0] }
 0x125   :  { %v6895_v16 = vld [vmem:[#allocation8 + $0xca0] sm:$0xf0]  ;;  %4231 = vmatpush.bf16.msrb.mxu3 %v5334_v31  ;;  %v5621_v4 = vld [vmem:[#allocation8 + $0x288] sm:$0xf]  ;;  %v6006_v12 = vor.u32 %v7616_v3, %v6005_v2 }
 0x126   :  { %v6898_v25 = vor.u32 %v7835_v14, %v6895_v16  ;;  %v7891_v26 = vld [vmem:[#allocation8 + $0xe44] sm:$0xf]  ;;  %4217 = vmatpush.bf16.msra.mxu0 %v7154_v22  ;;  %v7736_v11 = vld [vmem:[#allocation8 + $0x964] sm:$0xf0]  ;;  %v5622_v16 = vor.u32 %v7520_v5, %v5621_v4 }
 0x127   :  { %v7119_v27 = vld [vmem:[#allocation8 + $0xe60] sm:$0xf0]  ;;  %v6229_v13 = vld [vmem:[#allocation8 + $0x748] sm:$0xf]  ;;  %v6486_v21 = vor.u32 %v7736_v11, %v6485_v7 }
 0x128   :  { %v7827_v28 = vld [vmem:[#allocation8 + $0xc44] sm:$0xf]  ;;  %4239 = vmatpush.bf16.msra.mxu1 %v5750_v20  ;;  %v7122_v36 = vor.u32 %v7891_v26, %v7119_v27  ;;  %4204 = vmatpush.bf16.msrb.mxu2 %v6898_v25  ;;  %v7672_v14 = vld [vmem:[#allocation8 + $0x764] sm:$0xf0] }
 0x129   :  { %v6863_v29 = vld [vmem:[#allocation8 + $0xc60] sm:$0xf0]  ;;  %4232 = vmatpush.bf16.msrb.mxu3 %v5302_v48  ;;  %v5973_v19 = vld [vmem:[#allocation8 + $0x548] sm:$0xf]  ;;  %v6230_v15 = vor.u32 %v7672_v14, %v6229_v13 }
 0x12a   :  { %v7819_v38 = vld [vmem:[#allocation8 + $0xc04] sm:$0xf]  ;;  %v6866_v41 = vor.u32 %v7827_v28, %v6863_v29  ;;  %4218 = vmatpush.bf16.msra.mxu0 %v7122_v36  ;;  %v7608_v20 = vld [vmem:[#allocation8 + $0x564] sm:$0xf0] }
 0x12b   :  { %v7883_v40 = vld [vmem:[#allocation8 + $0xe04] sm:$0xf]  ;;  %v5589_v22 = vld [vmem:[#allocation8 + $0x248] sm:$0xf]  ;;  %v5974_v26 = vor.u32 %v7608_v20, %v5973_v19 }
 0x12c   :  { %v7087_v42 = vld [vmem:[#allocation8 + $0xe20] sm:$0xf0]  ;;  %4240 = vmatpush.bf16.msra.mxu1 %v5718_v32  ;;  %4205 = vmatpush.bf16.msrb.mxu2 %v6866_v41  ;;  %v7728_v25 = vld [vmem:[#allocation8 + $0x924] sm:$0xf0]  ;;  %v5590_v29 = vor.u32 %v7512_v23, %v5589_v22 }
 0x12d   :  { %v6831_v45 = vld [vmem:[#allocation8 + $0xc20] sm:$0xf0]  ;;  %v7090_v54 = vor.u32 %v7883_v40, %v7087_v42  ;;  %4277 = vmatpush.bf16.msra.mxu3 %v6550_v55  ;;  %v6197_v27 = vld [vmem:[#allocation8 + $0x708] sm:$0xf]  ;;  %v6454_v33 = vor.u32 %v7728_v25, %v6453_v24  ;;  %v7492_v25 = vld [vmem:[#allocation8 + $0x1cc] sm:$0xf] }
 0x12e   :  { %v6834_v58 = vor.u32 %v7819_v38, %v6831_v45  ;;  %4233 = vmatmul.bf16.vlgmr.msrb.gmra.mxu3 %v8196_v47  ;;  %v7664_v28 = vld [vmem:[#allocation8 + $0x724] sm:$0xf0] }
 0x12f   :  { %4219 = vmatpush.bf16.msra.mxu0 %v7090_v54  ;;  %v5941_v31 = vld [vmem:[#allocation8 + $0x508] sm:$0xf]  ;;  %v6198_v37 = vor.u32 %v7664_v28, %v6197_v27 }
 0x130   :  { %4241 = vmatpush.bf16.msra.mxu1 %v5686_v49  ;;  %4206 = vmatpush.bf16.msrb.mxu2 %v6834_v58  ;;  %v7600_v32 = vld [vmem:[#allocation8 + $0x524] sm:$0xf0] }
 0x131   :  { %4278 = vmatpush.bf16.msra.mxu3 %v6518_v63  ;;  %v5557_v34 = vld [vmem:[#allocation8 + $0x208] sm:$0xf]  ;;  %v5942_v42 = vor.u32 %v7600_v32, %v5941_v31 }
 0x132   :  { %4220 = vmatmul.bf16.vlgmr.msra.gmra.mxu0 %v8224_v8  ;;  %v7504_v35 = vld [vmem:[#allocation8 + $0x224] sm:$0xf0] }
 0x133   :  { %4264 = vmatpush.bf16.msrb.mxu0 %v6294_v59  ;;  %4207 = vmatmul.bf16.vlgmr.msrb.gmra.mxu2 %v8226_v17  ;;  %v6421_v36 = vld [vmem:[#allocation8 + $0x8c8] sm:$0xf]  ;;  %v5558_v45 = vor.u32 %v7504_v35, %v5557_v34 }
 0x134   :  { %4251 = vmatpush.bf16.msra.mxu2 %v6038_v62  ;;  %4242 = vmatpush.bf16.msra.mxu1 %v5654_v9  ;;  %v7720_v38 = vld [vmem:[#allocation8 + $0x8e4] sm:$0xf0] }
 0x135   :  { %4279 = vmatpush.bf16.msra.mxu3 %v6486_v21  ;;  %v6805_v40 = vld [vmem:[#allocation8 + $0xbc8] sm:$0xf]  ;;  %v6422_v48 = vor.u32 %v7720_v38, %v6421_v36 }
 0x136   :  { %v7816_v41 = vld [vmem:[#allocation8 + $0xbe4] sm:$0xf0] }
 0x137   :  { %4265 = vmatpush.bf16.msrb.mxu0 %v6262_v6  ;;  %v7656_v44 = vld [vmem:[#allocation8 + $0x6e4] sm:$0xf0]  ;;  %v6806_v49 = vor.u32 %v7816_v41, %v6805_v40 }
 0x138   :  { %4252 = vmatpush.bf16.msra.mxu2 %v6006_v12  ;;  %4243 = vmatpush.bf16.msra.mxu1 %v5622_v16  ;;  %v5909_v53 = vld [vmem:[#allocation8 + $0x4c8] sm:$0xf]  ;;  %v6166_v51 = vor.u32 %v7656_v44, %v6165_v43  ;;  %v5495_v43 = vld [vmem:[#allocation8 + $0x1a8] sm:$0xf0] }
 0x139   :  { %v7592_v46 = vld [vmem:[#allocation8 + $0x4e4] sm:$0xf0]  ;;  %4280 = vmatpush.bf16.msra.mxu3 %v6454_v33 }
 0x13a   :  { %v6389_v50 = vld [vmem:[#allocation8 + $0x888] sm:$0xf]  ;;  %v5910_v57 = vor.u32 %v7592_v46, %v5909_v53  ;;  %v1436_v46 = vld [vmem:[#allocation10] sm:$0xff] }
 0x13b   :  { %4266 = vmatpush.bf16.msrb.mxu0 %v6230_v15  ;;  %v7712_v54 = vld [vmem:[#allocation8 + $0x8a4] sm:$0xf0] }
 0x13c   :  { %4253 = vmatpush.bf16.msra.mxu2 %v5974_v26  ;;  %4244 = vmatpush.bf16.msra.mxu1 %v5590_v29  ;;  %v6773_v55 = vld [vmem:[#allocation8 + $0xb88] sm:$0xf]  ;;  %v6390_v62 = vor.u32 %v7712_v54, %v6389_v50  ;;  %v5527_v26 = vld [vmem:[#allocation8 + $0x1e8] sm:$0xf0] }
 0x13d   :  { %v7808_v56 = vld [vmem:[#allocation8 + $0xba4] sm:$0xf0]  ;;  %4281 = vmatpush.bf16.msra.mxu3 %v6422_v48  ;;  %v5530_v36 = vor.u32 %v7492_v25, %v5527_v26 }
 0x13e   :  { %v6133_v58 = vld [vmem:[#allocation8 + $0x688] sm:$0xf]  ;;  %v6774_v0 = vor.u32 %v7808_v56, %v6773_v55 }
 0x13f   :  { %4267 = vmatpush.bf16.msrb.mxu0 %v6198_v37  ;;  %v7648_v59 = vld [vmem:[#allocation8 + $0x6a4] sm:$0xf0] }
 0x140   :  { %4254 = vmatpush.bf16.msra.mxu2 %v5942_v42  ;;  %4245 = vmatpush.bf16.msra.mxu1 %v5558_v45  ;;  %v5877_v60 = vld [vmem:[#allocation8 + $0x488] sm:$0xf]  ;;  %v6134_v9 = vor.u32 %v7648_v59, %v6133_v58  ;;  %v7484_v42 = vld [vmem:[#allocation8 + $0x18c] sm:$0xf]  ;;  %v8239_v59 = vunpack.c.l.bf16 %v1436_v46 }
 0x141   :  { %v7584_v61 = vld [vmem:[#allocation8 + $0x4a4] sm:$0xf0]  ;;  %4282 = vmatpush.bf16.msra.mxu3 %v6390_v62  ;;  %v5463_v58 = vld [vmem:[#allocation8 + $0x168] sm:$0xf0] }
 0x142   :  { %v6357_v1 = vld [vmem:[#allocation8 + $0x848] sm:$0xf]  ;;  %v5878_v4 = vor.u32 %v7584_v61, %v5877_v60  ;;  %v4039_v25 = vpop.f32.mrf.mxu1 }
 0x143   :  { %4268 = vmatpush.bf16.msrb.mxu0 %v6166_v51  ;;  %v7704_v2 = vld [vmem:[#allocation8 + $0x864] sm:$0xf0]  ;;  %4246 = vmatmul.bf16.vlgmr.msra.gmra.mxu1 %v8200_v10  ;;  %v5498_v51 = vor.u32 %v7484_v42, %v5495_v43  ;;  %v5367_v43 = vld [vmem:[#allocation8 + $0xa8] sm:$0xf0] }
 0x144   :  { %4290 = vmatpush.bf16.msrb.mxu1 %v6806_v49  ;;  %v6741_v3 = vld [vmem:[#allocation8 + $0xb48] sm:$0xf]  ;;  %4255 = vmatpush.bf16.msra.mxu2 %v5910_v57  ;;  %v6358_v12 = vor.u32 %v7704_v2, %v6357_v1  ;;  %v7476_v57 = vld [vmem:[#allocation8 + $0x14c] sm:$0xf] }
 0x145   :  { %v7800_v63 = vld [vmem:[#allocation8 + $0xb64] sm:$0xf0]  ;;  %v5466_v2 = vor.u32 %v7476_v57, %v5463_v58 }
 0x146   :  { %v6101_v5 = vld [vmem:[#allocation8 + $0x648] sm:$0xf]  ;;  %v6742_v13 = vor.u32 %v7800_v63, %v6741_v3  ;;  %4283 = vmatpush.bf16.msra.mxu3 %v6358_v12 }
 0x147   :  { %v7640_v6 = vld [vmem:[#allocation8 + $0x664] sm:$0xf0]  ;;  %4269 = vmatpush.bf16.msrb.mxu0 %v6134_v9 }
 0x148   :  { %v5845_v7 = vld [vmem:[#allocation8 + $0x448] sm:$0xf]  ;;  %4291 = vmatpush.bf16.msrb.mxu1 %v6774_v0  ;;  %v6102_v20 = vor.u32 %v7640_v6, %v6101_v5  ;;  %4256 = vmatpush.bf16.msra.mxu2 %v5878_v4  ;;  %v4001_v5 = vperm.slane %v8239_v59, 0  ;;  %v7468_v6 = vld [vmem:[#allocation8 + $0x10c] sm:$0xf] }
 0x149   :  { %v7576_v11 = vld [vmem:[#allocation8 + $0x464] sm:$0xf0] }
 0x14a   :  { %v6325_v14 = vld [vmem:[#allocation8 + $0x808] sm:$0xf]  ;;  %v5846_v15 = vor.u32 %v7576_v11, %v5845_v7  ;;  %v5431_v7 = vld [vmem:[#allocation8 + $0x128] sm:$0xf0]  ;;  %v4041_v57 = vpop.f32.mrf.mxu1 }
 0x14b   :  { %v7696_v16 = vld [vmem:[#allocation8 + $0x824] sm:$0xf0]  ;;  %4270 = vmatpush.bf16.msrb.mxu0 %v6102_v20  ;;  %v4026_v20 = vpop.f32.mrf.mxu3  ;;  %v6231_v57 = vld [vmem:[#allocation8 + $0x768] sm:$0xf0] }
 0x14c   :  { %v6709_v19 = vld [vmem:[#allocation8 + $0xb08] sm:$0xf]  ;;  %4292 = vmatpush.bf16.msrb.mxu1 %v6742_v13  ;;  %v6326_v31 = vor.u32 %v7696_v16, %v6325_v14  ;;  %4257 = vmatpush.bf16.msra.mxu2 %v5846_v15  ;;  %v7460_v15 = vld [vmem:[#allocation8 + $0xcc] sm:$0xf] }
 0x14d   :  { %v7792_v21 = vld [vmem:[#allocation8 + $0xb24] sm:$0xf0] }
 0x14e   :  { %v5813_v22 = vld [vmem:[#allocation8 + $0x408] sm:$0xf]  ;;  %v6710_v32 = vor.u32 %v7792_v21, %v6709_v19  ;;  %4284 = vmatpush.bf16.msra.mxu3 %v6326_v31  ;;  %v5434_v21 = vor.u32 %v7468_v6, %v5431_v7  ;;  %v5303_v6 = vld [vmem:[#allocation8 + $0x28] sm:$0xf0] }
 0x14f   :  { %v6069_v23 = vld [vmem:[#allocation8 + $0x608] sm:$0xf]  ;;  %v7532_v7 = vld [vmem:[#allocation8 + $0x30c] sm:$0xf] }
 0x150   :  { %v7632_v24 = vld [vmem:[#allocation8 + $0x624] sm:$0xf0]  ;;  %4293 = vmatpush.bf16.msrb.mxu1 %v6710_v32 }
 0x151   :  { %v7568_v27 = vld [vmem:[#allocation8 + $0x424] sm:$0xf0]  ;;  %v6070_v35 = vor.u32 %v7632_v24, %v6069_v23  ;;  %4285 = vmatmul.bf16.vlgmr.msra.gmra.mxu3 %v8214_v39  ;;  %v4027_v24 = vadd.f32 %v4026_v20, %v4001_v5  ;;  %v7436_v5 = vld [vmem:[#allocation8 + $0xc] sm:$0xf] }
 0x152   :  { %v7317_v28 = vld [vmem:[#allocation8 + $0xfc8] sm:$0xf]  ;;  %v5814_v40 = vor.u32 %v7568_v27, %v5813_v22  ;;  %4329 = vmatpush.bf16.msrb.mxu3 %v5530_v36  ;;  %v5399_v27 = vld [vmem:[#allocation8 + $0xe8] sm:$0xf0] }
 0x153   :  { %v7944_v29 = vld [vmem:[#allocation8 + $0xfe4] sm:$0xf0]  ;;  %4271 = vmatpush.bf16.msrb.mxu0 %v6070_v35 }
 0x154   :  { %v7061_v33 = vld [vmem:[#allocation8 + $0xdc8] sm:$0xf]  ;;  %v7318_v41 = vor.u32 %v7944_v29, %v7317_v28  ;;  %4258 = vmatpush.bf16.msra.mxu2 %v5814_v40  ;;  %v7556_v28 = vld [vmem:[#allocation8 + $0x3cc] sm:$0xf] }
 0x155   :  { %v7880_v34 = vld [vmem:[#allocation8 + $0xde4] sm:$0xf0]  ;;  %v5783_v29 = vld [vmem:[#allocation8 + $0x3e8] sm:$0xf0] }
 0x156   :  { %v6677_v37 = vld [vmem:[#allocation8 + $0xac8] sm:$0xf]  ;;  %v7062_v44 = vor.u32 %v7880_v34, %v7061_v33  ;;  %4272 = vmatmul.bf16.vlgmr.msrb.gmra.mxu0 %v8211_v52  ;;  %4330 = vmatpush.bf16.msrb.mxu3 %v5498_v51  ;;  %v4040_v34 = vadd.f32 %v4039_v25, %v4027_v24  ;;  %v5786_v40 = vor.u32 %v7556_v28, %v5783_v29  ;;  %v7684_v24 = vld [vmem:[#allocation8 + $0x7cc] sm:$0xf] }
 0x157   :  { %v7784_v38 = vld [vmem:[#allocation8 + $0xae4] sm:$0xf0]  ;;  %4316 = vmatpush.bf16.msra.mxu0 %v7318_v41  ;;  %4259 = vmatmul.bf16.vlgmr.msra.gmra.mxu2 %v8203_v30  ;;  %v7452_v41 = vld [vmem:[#allocation8 + $0x8c] sm:$0xf] }
 0x158   :  { %v7285_v45 = vld [vmem:[#allocation8 + $0xf88] sm:$0xf]  ;;  %v6678_v48 = vor.u32 %v7784_v38, %v6677_v37  ;;  %4303 = vmatpush.bf16.msrb.mxu2 %v7062_v44  ;;  %v5402_v38 = vor.u32 %v7460_v15, %v5399_v27  ;;  %v7548_v44 = vld [vmem:[#allocation8 + $0x38c] sm:$0xf]  ;;  %v5370_v51 = vor.u32 %v7452_v41, %v5367_v43 }
 0x159   :  { %v7936_v53 = vld [vmem:[#allocation8 + $0xfa4] sm:$0xf0]  ;;  %v6295_v25 = vld [vmem:[#allocation8 + $0x7e8] sm:$0xf0] }
 0x15a   :  { %v7029_v49 = vld [vmem:[#allocation8 + $0xd88] sm:$0xf]  ;;  %v7286_v56 = vor.u32 %v7936_v53, %v7285_v45  ;;  %4294 = vmatpush.bf16.msrb.mxu1 %v6678_v48  ;;  %4331 = vmatpush.bf16.msrb.mxu3 %v5466_v2  ;;  %v5751_v45 = vld [vmem:[#allocation8 + $0x3a8] sm:$0xf0] }
 0x15b   :  { %v7872_v50 = vld [vmem:[#allocation8 + $0xda4] sm:$0xf0]  ;;  %v7620_v28 = vld [vmem:[#allocation8 + $0x5cc] sm:$0xf] }
 0x15c   :  { %v6645_v54 = vld [vmem:[#allocation8 + $0xa88] sm:$0xf]  ;;  %v7030_v60 = vor.u32 %v7872_v50, %v7029_v49  ;;  %4317 = vmatpush.bf16.msra.mxu0 %v7286_v56  ;;  %v7444_v56 = vld [vmem:[#allocation8 + $0x4c] sm:$0xf] }
 0x15d   :  { %v7776_v55 = vld [vmem:[#allocation8 + $0xaa4] sm:$0xf0]  ;;  %v6039_v29 = vld [vmem:[#allocation8 + $0x5e8] sm:$0xf0] }
 0x15e   :  { %v7253_v61 = vld [vmem:[#allocation8 + $0xf48] sm:$0xf]  ;;  %v6646_v0 = vor.u32 %v7776_v55, %v6645_v54  ;;  %4304 = vmatpush.bf16.msrb.mxu2 %v7030_v60  ;;  %4332 = vmatpush.bf16.msrb.mxu3 %v5434_v21  ;;  %v5754_v54 = vor.u32 %v7548_v44, %v5751_v45  ;;  %v4028_v55 = vpop.f32.mrf.mxu3  ;;  %v5335_v60 = vld [vmem:[#allocation8 + $0x68] sm:$0xf0] }
 0x15f   :  { %v7928_v62 = vld [vmem:[#allocation8 + $0xf64] sm:$0xf0]  ;;  %v7748_v21 = vld [vmem:[#allocation8 + $0x9cc] sm:$0xf] }
 0x160   :  { %v6997_v1 = vld [vmem:[#allocation8 + $0xd48] sm:$0xf]  ;;  %v7254_v4 = vor.u32 %v7928_v62, %v7253_v61  ;;  %4295 = vmatpush.bf16.msrb.mxu1 %v6646_v0  ;;  %v7540_v61 = vld [vmem:[#allocation8 + $0x34c] sm:$0xf] }
 0x161   :  { %v7864_v9 = vld [vmem:[#allocation8 + $0xd64] sm:$0xf0]  ;;  %v5719_v62 = vld [vmem:[#allocation8 + $0x368] sm:$0xf0] }
 0x162   :  { %v6613_v3 = vld [vmem:[#allocation8 + $0xa48] sm:$0xf]  ;;  %v6998_v11 = vor.u32 %v7864_v9, %v6997_v1  ;;  %4318 = vmatpush.bf16.msra.mxu0 %v7254_v4  ;;  %4333 = vmatpush.bf16.msrb.mxu3 %v5402_v38  ;;  %v5722_v4 = vor.u32 %v7540_v61, %v5719_v62  ;;  %v7740_v38 = vld [vmem:[#allocation8 + $0x98c] sm:$0xf] }
 0x163   :  { %v7768_v63 = vld [vmem:[#allocation8 + $0xa64] sm:$0xf0]  ;;  %v7676_v41 = vld [vmem:[#allocation8 + $0x78c] sm:$0xf] }
 0x164   :  { %v7221_v12 = vld [vmem:[#allocation8 + $0xf08] sm:$0xf]  ;;  %v6614_v14 = vor.u32 %v7768_v63, %v6613_v3  ;;  %4305 = vmatpush.bf16.msrb.mxu2 %v6998_v11  ;;  %v5338_v63 = vor.u32 %v7444_v56, %v5335_v60  ;;  %v7612_v44 = vld [vmem:[#allocation8 + $0x58c] sm:$0xf] }
 0x165   :  { %v7920_v13 = vld [vmem:[#allocation8 + $0xf24] sm:$0xf0]  ;;  %v6007_v45 = vld [vmem:[#allocation8 + $0x5a8] sm:$0xf0] }
 0x166   :  { %v6965_v16 = vld [vmem:[#allocation8 + $0xd08] sm:$0xf]  ;;  %v7222_v26 = vor.u32 %v7920_v13, %v7221_v12  ;;  %4296 = vmatpush.bf16.msrb.mxu1 %v6614_v14  ;;  %4334 = vmatpush.bf16.msrb.mxu3 %v5370_v51  ;;  %v5687_v12 = vld [vmem:[#allocation8 + $0x328] sm:$0xf0]  ;;  %v6010_v55 = vor.u32 %v7612_v44, %v6007_v45 }
 0x167   :  { %v7856_v19 = vld [vmem:[#allocation8 + $0xd24] sm:$0xf0]  ;;  %v5690_v27 = vor.u32 %v7532_v7, %v5687_v12  ;;  %v7732_v51 = vld [vmem:[#allocation8 + $0x94c] sm:$0xf] }
 0x168   :  { %v6581_v22 = vld [vmem:[#allocation8 + $0xa08] sm:$0xf]  ;;  %v6966_v31 = vor.u32 %v7856_v19, %v6965_v16  ;;  %4319 = vmatpush.bf16.msra.mxu0 %v7222_v26  ;;  %v4052_v16 = vpop.f32.mrf.mxu2  ;;  %v5306_v26 = vor.u32 %v7436_v5, %v5303_v6  ;;  %v7668_v56 = vld [vmem:[#allocation8 + $0x74c] sm:$0xf] }
 0x169   :  { %v7760_v23 = vld [vmem:[#allocation8 + $0xa24] sm:$0xf0]  ;;  %v7604_v61 = vld [vmem:[#allocation8 + $0x54c] sm:$0xf] }
 0x16a   :  { %v7189_v32 = vld [vmem:[#allocation8 + $0xec8] sm:$0xf]  ;;  %v6582_v35 = vor.u32 %v7760_v23, %v6581_v22  ;;  %4306 = vmatpush.bf16.msrb.mxu2 %v6966_v31  ;;  %v6551_v22 = vld [vmem:[#allocation8 + $0x9e8] sm:$0xf0]  ;;  %v4053_v23 = vadd.f32 %v4052_v16, %v4040_v34  ;;  %4335 = vmatpush.bf16.msrb.mxu3 %v5338_v63  ;;  %v6042_v34 = vor.u32 %v7620_v28, %v6039_v29 }
 0x16b   :  { %v7912_v33 = vld [vmem:[#allocation8 + $0xee4] sm:$0xf0]  ;;  %v5975_v62 = vld [vmem:[#allocation8 + $0x568] sm:$0xf0] }
 0x16c   :  { %v6933_v36 = vld [vmem:[#allocation8 + $0xcc8] sm:$0xf]  ;;  %v7190_v42 = vor.u32 %v7912_v33, %v7189_v32  ;;  %4297 = vmatpush.bf16.msrb.mxu1 %v6582_v35  ;;  %v6554_v32 = vor.u32 %v7748_v21, %v6551_v22  ;;  %v7524_v33 = vld [vmem:[#allocation8 + $0x2cc] sm:$0xf]  ;;  %v5978_v5 = vor.u32 %v7604_v61, %v5975_v62 }
 0x16d   :  { %v7848_v37 = vld [vmem:[#allocation8 + $0xce4] sm:$0xf0]  ;;  %v5655_v35 = vld [vmem:[#allocation8 + $0x2e8] sm:$0xf0] }
 0x16e   :  { %v6934_v53 = vor.u32 %v7848_v37, %v6933_v36  ;;  %v7157_v46 = vld [vmem:[#allocation8 + $0xe88] sm:$0xf]  ;;  %4320 = vmatpush.bf16.msra.mxu0 %v7190_v42  ;;  %v6298_v37 = vor.u32 %v7684_v24, %v6295_v25  ;;  %v6263_v42 = vld [vmem:[#allocation8 + $0x7a8] sm:$0xf0]  ;;  %4336 = vmatpush.bf16.msrb.mxu3 %v5306_v26  ;;  %v5658_v43 = vor.u32 %v7524_v33, %v5655_v35 }
 0x16f   :  { %v7904_v48 = vld [vmem:[#allocation8 + $0xea4] sm:$0xf0]  ;;  %4298 = vmatmul.bf16.vlgmr.msrb.gmra.mxu1 %v8218_v18  ;;  %v7724_v63 = vld [vmem:[#allocation8 + $0x90c] sm:$0xf] }
 0x170   :  { %v6901_v49 = vld [vmem:[#allocation8 + $0xc88] sm:$0xf]  ;;  %4342 = vmatpush.bf16.msra.mxu1 %v5786_v40  ;;  %v7158_v58 = vor.u32 %v7904_v48, %v7157_v46  ;;  %4307 = vmatpush.bf16.msrb.mxu2 %v6934_v53  ;;  %v6519_v40 = vld [vmem:[#allocation8 + $0x9a8] sm:$0xf0] }
 0x171   :  { %v7840_v50 = vld [vmem:[#allocation8 + $0xca4] sm:$0xf0]  ;;  %v6522_v53 = vor.u32 %v7740_v38, %v6519_v40  ;;  %v7516_v46 = vld [vmem:[#allocation8 + $0x28c] sm:$0xf]  ;;  %4337 = vmatmul.bf16.vlgmr.msrb.gmra.mxu3 %v8196_v47 }
 0x172   :  { %v6902_v0 = vor.u32 %v7840_v50, %v6901_v49  ;;  %v7125_v1 = vld [vmem:[#allocation8 + $0xe48] sm:$0xf]  ;;  %4321 = vmatpush.bf16.msra.mxu0 %v7158_v58  ;;  %4381 = vmatpush.bf16.msra.mxu3 %v6554_v32  ;;  %v5623_v48 = vld [vmem:[#allocation8 + $0x2a8] sm:$0xf0]  ;;  %v4054_v49 = vpop.f32.mrf.mxu2  ;;  %v6266_v50 = vor.u32 %v7676_v41, %v6263_v42  ;;  %v4065_v58 = vpop.f32.mrf.mxu0 }
 0x173   :  { %v7896_v9 = vld [vmem:[#allocation8 + $0xe64] sm:$0xf0]  ;;  %v5626_v60 = vor.u32 %v7516_v46, %v5623_v48  ;;  %v7660_v6 = vld [vmem:[#allocation8 + $0x70c] sm:$0xf] }
 0x174   :  { %v6869_v2 = vld [vmem:[#allocation8 + $0xc48] sm:$0xf]  ;;  %4343 = vmatpush.bf16.msra.mxu1 %v5754_v54  ;;  %v7126_v11 = vor.u32 %v7896_v9, %v7125_v1  ;;  %4308 = vmatpush.bf16.msrb.mxu2 %v6902_v0  ;;  %v6487_v54 = vld [vmem:[#allocation8 + $0x968] sm:$0xf0]  ;;  %v4066_v0 = vadd.f32 %v4065_v58, %v4053_v23 }
 0x175   :  { %v7832_v3 = vld [vmem:[#allocation8 + $0xc64] sm:$0xf0]  ;;  %v6490_v1 = vor.u32 %v7732_v51, %v6487_v54  ;;  %v7508_v9 = vld [vmem:[#allocation8 + $0x24c] sm:$0xf] }
 0x176   :  { %v6837_v13 = vld [vmem:[#allocation8 + $0xc08] sm:$0xf]  ;;  %v6870_v19 = vor.u32 %v7832_v3, %v6869_v2  ;;  %4322 = vmatpush.bf16.msra.mxu0 %v7126_v11  ;;  %4382 = vmatpush.bf16.msra.mxu3 %v6522_v53  ;;  %v5591_v2 = vld [vmem:[#allocation8 + $0x268] sm:$0xf0]  ;;  %v6234_v3 = vor.u32 %v7668_v56, %v6231_v57 }
 0x177   :  { %v7093_v14 = vld [vmem:[#allocation8 + $0xe08] sm:$0xf]  ;;  %v6199_v7 = vld [vmem:[#allocation8 + $0x728] sm:$0xf0]  ;;  %v5594_v11 = vor.u32 %v7508_v9, %v5591_v2 }
 0x178   :  { %v7888_v20 = vld [vmem:[#allocation8 + $0xe24] sm:$0xf0]  ;;  %4344 = vmatpush.bf16.msra.mxu1 %v5722_v4  ;;  %4309 = vmatpush.bf16.msrb.mxu2 %v6870_v19  ;;  %v6455_v4 = vld [vmem:[#allocation8 + $0x928] sm:$0xf0]  ;;  %v6202_v21 = vor.u32 %v7660_v6, %v6199_v7 }
 0x179   :  { %v7824_v15 = vld [vmem:[#allocation8 + $0xc24] sm:$0xf0]  ;;  %v7094_v31 = vor.u32 %v7888_v20, %v7093_v14  ;;  %v7596_v12 = vld [vmem:[#allocation8 + $0x50c] sm:$0xf]  ;;  %v6458_v14 = vor.u32 %v7724_v63, %v6455_v4 }
 0x17a   :  { %v6838_v36 = vor.u32 %v7824_v15, %v6837_v13  ;;  %v5943_v13 = vld [vmem:[#allocation8 + $0x528] sm:$0xf0]  ;;  %4383 = vmatpush.bf16.msra.mxu3 %v6490_v1 }
 0x17b   :  { %4323 = vmatpush.bf16.msra.mxu0 %v7094_v31  ;;  %v7500_v16 = vld [vmem:[#allocation8 + $0x20c] sm:$0xf]  ;;  %v5946_v24 = vor.u32 %v7596_v12, %v5943_v13  ;;  %v5533_v12 = vld [vmem:[#allocation8 + $0x1d0] sm:$0xf] }
 0x17c   :  { %4345 = vmatpush.bf16.msra.mxu1 %v5690_v27  ;;  %4310 = vmatpush.bf16.msrb.mxu2 %v6838_v36  ;;  %v5559_v19 = vld [vmem:[#allocation8 + $0x228] sm:$0xf0]  ;;  %v4067_v27 = vpop.f32.mrf.mxu0  ;;  %v7497_v13 = vld [vmem:[#allocation8 + $0x1ec] sm:$0xf0] }
 0x17d   :  { %v7716_v20 = vld [vmem:[#allocation8 + $0x8cc] sm:$0xf]  ;;  %v5562_v28 = vor.u32 %v7500_v16, %v5559_v19 }
 0x17e   :  { %4324 = vmatmul.bf16.vlgmr.msra.gmra.mxu0 %v8224_v8  ;;  %v6423_v22 = vld [vmem:[#allocation8 + $0x8e8] sm:$0xf0]  ;;  %4384 = vmatpush.bf16.msra.mxu3 %v6458_v14  ;;  %v4091_v14 = vpop.f32.mrf.mxu1 }
 0x17f   :  { %4368 = vmatpush.bf16.msrb.mxu0 %v6298_v37  ;;  %4311 = vmatmul.bf16.vlgmr.msrb.gmra.mxu2 %v8226_v17  ;;  %v7812_v23 = vld [vmem:[#allocation8 + $0xbcc] sm:$0xf]  ;;  %v6426_v32 = vor.u32 %v7716_v20, %v6423_v22 }
 0x180   :  { %4355 = vmatpush.bf16.msra.mxu2 %v6042_v34  ;;  %4346 = vmatpush.bf16.msra.mxu1 %v5658_v43  ;;  %v6807_v15 = vld [vmem:[#allocation8 + $0xbe8] sm:$0xf0]  ;;  %v4078_v34 = vpop.f32.mrf.mxu3 }
 0x181   :  { %v7652_v25 = vld [vmem:[#allocation8 + $0x6cc] sm:$0xf]  ;;  %v6810_v33 = vor.u32 %v7812_v23, %v6807_v15  ;;  %v4079_v44 = vadd.f32 %v4078_v34, %v4066_v0 }
 0x182   :  { %v6167_v26 = vld [vmem:[#allocation8 + $0x6e8] sm:$0xf0]  ;;  %4385 = vmatpush.bf16.msra.mxu3 %v6426_v32  ;;  %v5501_v32 = vld [vmem:[#allocation8 + $0x190] sm:$0xf] }
 0x183   :  { %4369 = vmatpush.bf16.msrb.mxu0 %v6266_v50  ;;  %v7588_v29 = vld [vmem:[#allocation8 + $0x4cc] sm:$0xf]  ;;  %v6170_v36 = vor.u32 %v7652_v25, %v6167_v26  ;;  %v5534_v26 = vor.u32 %v7497_v13, %v5533_v12  ;;  %v5405_v13 = vld [vmem:[#allocation8 + $0xd0] sm:$0xf] }
 0x184   :  { %4356 = vmatpush.bf16.msra.mxu2 %v6010_v55  ;;  %4347 = vmatpush.bf16.msra.mxu1 %v5626_v60  ;;  %v5911_v31 = vld [vmem:[#allocation8 + $0x4e8] sm:$0xf0] }
 0x185   :  { %v7708_v35 = vld [vmem:[#allocation8 + $0x88c] sm:$0xf]  ;;  %v5914_v41 = vor.u32 %v7588_v29, %v5911_v31 }
 0x186   :  { %v6391_v37 = vld [vmem:[#allocation8 + $0x8a8] sm:$0xf0] }
 0x187   :  { %4370 = vmatpush.bf16.msrb.mxu0 %v6234_v3  ;;  %v7804_v38 = vld [vmem:[#allocation8 + $0xb8c] sm:$0xf]  ;;  %v6394_v46 = vor.u32 %v7708_v35, %v6391_v37 }
 0x188   :  { %4357 = vmatpush.bf16.msra.mxu2 %v5978_v5  ;;  %4348 = vmatpush.bf16.msra.mxu1 %v5594_v11  ;;  %v6775_v40 = vld [vmem:[#allocation8 + $0xba8] sm:$0xf0]  ;;  %v4080_v6 = vpop.f32.mrf.mxu3 }
 0x189   :  { %v7644_v42 = vld [vmem:[#allocation8 + $0x68c] sm:$0xf]  ;;  %v6778_v48 = vor.u32 %v7804_v38, %v6775_v40  ;;  %4386 = vmatpush.bf16.msra.mxu3 %v6394_v46  ;;  %v7481_v46 = vld [vmem:[#allocation8 + $0x16c] sm:$0xf0]  ;;  %v4117_v6 = vpop.f32.mrf.mxu0 }
 0x18a   :  { %v6135_v43 = vld [vmem:[#allocation8 + $0x6a8] sm:$0xf0] }
 0x18b   :  { %4371 = vmatpush.bf16.msrb.mxu0 %v6202_v21  ;;  %v7580_v45 = vld [vmem:[#allocation8 + $0x48c] sm:$0xf]  ;;  %v6138_v50 = vor.u32 %v7644_v42, %v6135_v43  ;;  %v8250_v21 = vadd.f32 %v4091_v14, %v4079_v44 }
 0x18c   :  { %4358 = vmatpush.bf16.msra.mxu2 %v5946_v24  ;;  %4349 = vmatpush.bf16.msra.mxu1 %v5562_v28  ;;  %v5879_v53 = vld [vmem:[#allocation8 + $0x4a8] sm:$0xf0] }
 0x18d   :  { %v7700_v49 = vld [vmem:[#allocation8 + $0x84c] sm:$0xf]  ;;  %v5882_v56 = vor.u32 %v7580_v45, %v5879_v53  ;;  %v5469_v53 = vld [vmem:[#allocation8 + $0x150] sm:$0xf] }
 0x18e   :  { %v6359_v51 = vld [vmem:[#allocation8 + $0x868] sm:$0xf0] }
 0x18f   :  { %4372 = vmatpush.bf16.msrb.mxu0 %v6170_v36  ;;  %v7796_v54 = vld [vmem:[#allocation8 + $0xb4c] sm:$0xf]  ;;  %4350 = vmatmul.bf16.vlgmr.msra.gmra.mxu1 %v8200_v10  ;;  %v6362_v62 = vor.u32 %v7700_v49, %v6359_v51 }
 0x190   :  { %4394 = vmatpush.bf16.msrb.mxu1 %v6810_v33  ;;  %v6743_v55 = vld [vmem:[#allocation8 + $0xb68] sm:$0xf0]  ;;  %4359 = vmatpush.bf16.msra.mxu2 %v5914_v41  ;;  %v7489_v33 = vld [vmem:[#allocation8 + $0x1ac] sm:$0xf0]  ;;  %v4130_v44 = vpop.f32.mrf.mxu3 }
 0x191   :  { %v7636_v57 = vld [vmem:[#allocation8 + $0x64c] sm:$0xf]  ;;  %v6746_v0 = vor.u32 %v7796_v54, %v6743_v55  ;;  %4387 = vmatpush.bf16.msra.mxu3 %v6362_v62  ;;  %v5502_v41 = vor.u32 %v7489_v33, %v5501_v32  ;;  %v5437_v62 = vld [vmem:[#allocation8 + $0x110] sm:$0xf] }
 0x192   :  { %v6103_v58 = vld [vmem:[#allocation8 + $0x668] sm:$0xf0] }
 0x193   :  { %v7572_v60 = vld [vmem:[#allocation8 + $0x44c] sm:$0xf]  ;;  %4373 = vmatpush.bf16.msrb.mxu0 %v6138_v50  ;;  %v6106_v3 = vor.u32 %v7636_v57, %v6103_v58  ;;  %v5470_v57 = vor.u32 %v7481_v46, %v5469_v53  ;;  %v4119_v46 = vpop.f32.mrf.mxu0 }
 0x194   :  { %v5847_v61 = vld [vmem:[#allocation8 + $0x468] sm:$0xf0]  ;;  %4395 = vmatpush.bf16.msrb.mxu1 %v6778_v48  ;;  %4360 = vmatpush.bf16.msra.mxu2 %v5882_v56  ;;  %v4093_v48 = vpop.f32.mrf.mxu1 }
 0x195   :  { %v7692_v1 = vld [vmem:[#allocation8 + $0x80c] sm:$0xf]  ;;  %v5850_v7 = vor.u32 %v7572_v60, %v5847_v61 }
 0x196   :  { %v6327_v9 = vld [vmem:[#allocation8 + $0x828] sm:$0xf0] }
 0x197   :  { %v7788_v2 = vld [vmem:[#allocation8 + $0xb0c] sm:$0xf]  ;;  %v6330_v22 = vor.u32 %v7692_v1, %v6327_v9  ;;  %4374 = vmatpush.bf16.msrb.mxu0 %v6106_v3  ;;  %v4002_v1 = vperm.slane %v8239_v59, 2 }
 0x198   :  { %v6711_v63 = vld [vmem:[#allocation8 + $0xb28] sm:$0xf0]  ;;  %4396 = vmatpush.bf16.msrb.mxu1 %v6746_v0  ;;  %4361 = vmatpush.bf16.msra.mxu2 %v5850_v7  ;;  %v7473_v0 = vld [vmem:[#allocation8 + $0x12c] sm:$0xf0]  ;;  %v4132_v14 = vpop.f32.mrf.mxu3 }
 0x199   :  { %v7564_v4 = vld [vmem:[#allocation8 + $0x40c] sm:$0xf]  ;;  %v6714_v23 = vor.u32 %v7788_v2, %v6711_v63  ;;  %4388 = vmatpush.bf16.msra.mxu3 %v6330_v22  ;;  %v5438_v7 = vor.u32 %v7473_v0, %v5437_v62  ;;  %v7561_v22 = vld [vmem:[#allocation8 + $0x3ec] sm:$0xf0] }
 0x19a   :  { %v7628_v5 = vld [vmem:[#allocation8 + $0x60c] sm:$0xf]  ;;  %v6557_v14 = vld [vmem:[#allocation8 + $0x9d0] sm:$0xf] }
 0x19b   :  { %v6071_v11 = vld [vmem:[#allocation8 + $0x628] sm:$0xf0] }
 0x19c   :  { %v5815_v16 = vld [vmem:[#allocation8 + $0x428] sm:$0xf0]  ;;  %v6074_v25 = vor.u32 %v7628_v5, %v6071_v11  ;;  %4397 = vmatpush.bf16.msrb.mxu1 %v6714_v23  ;;  %4389 = vmatmul.bf16.vlgmr.msra.gmra.mxu3 %v8214_v39  ;;  %v4131_v23 = vadd.f32 %v4130_v44, %v4002_v1 }
 0x19d   :  { %v7940_v19 = vld [vmem:[#allocation8 + $0xfcc] sm:$0xf]  ;;  %v5818_v29 = vor.u32 %v7564_v4, %v5815_v16  ;;  %4433 = vmatpush.bf16.msrb.mxu3 %v5534_v26  ;;  %v4143_v26 = vpop.f32.mrf.mxu1 }
 0x19e   :  { %v7319_v20 = vld [vmem:[#allocation8 + $0xfe8] sm:$0xf0]  ;;  %4375 = vmatpush.bf16.msrb.mxu0 %v6074_v25 }
 0x19f   :  { %v7876_v15 = vld [vmem:[#allocation8 + $0xdcc] sm:$0xf]  ;;  %v7322_v31 = vor.u32 %v7940_v19, %v7319_v20  ;;  %4362 = vmatpush.bf16.msra.mxu2 %v5818_v29  ;;  %v7465_v19 = vld [vmem:[#allocation8 + $0xec] sm:$0xf0] }
 0x1a0   :  { %v7063_v24 = vld [vmem:[#allocation8 + $0xde8] sm:$0xf0]  ;;  %v5789_v20 = vld [vmem:[#allocation8 + $0x3d0] sm:$0xf]  ;;  %v5406_v32 = vor.u32 %v7465_v19, %v5405_v13 }
 0x1a1   :  { %v7780_v27 = vld [vmem:[#allocation8 + $0xacc] sm:$0xf]  ;;  %v7066_v35 = vor.u32 %v7876_v15, %v7063_v24  ;;  %4376 = vmatmul.bf16.vlgmr.msrb.gmra.mxu0 %v8211_v52  ;;  %4434 = vmatpush.bf16.msrb.mxu3 %v5502_v41  ;;  %v5790_v33 = vor.u32 %v7561_v22, %v5789_v20  ;;  %v6301_v22 = vld [vmem:[#allocation8 + $0x7d0] sm:$0xf] }
 0x1a2   :  { %v6679_v28 = vld [vmem:[#allocation8 + $0xae8] sm:$0xf0]  ;;  %4420 = vmatpush.bf16.msra.mxu0 %v7322_v31  ;;  %4363 = vmatmul.bf16.vlgmr.msra.gmra.mxu2 %v8203_v30  ;;  %v8256_v31 = vadd.f32 %v4143_v26, %v4131_v23  ;;  %v7689_v23 = vld [vmem:[#allocation8 + $0x7ec] sm:$0xf0] }
 0x1a3   :  { %v7932_v36 = vld [vmem:[#allocation8 + $0xf8c] sm:$0xf]  ;;  %v6682_v38 = vor.u32 %v7780_v27, %v6679_v28  ;;  %4407 = vmatpush.bf16.msrb.mxu2 %v7066_v35  ;;  %v5373_v35 = vld [vmem:[#allocation8 + $0x90] sm:$0xf] }
 0x1a4   :  { %v7287_v37 = vld [vmem:[#allocation8 + $0xfa8] sm:$0xf0]  ;;  %v6045_v26 = vld [vmem:[#allocation8 + $0x5d0] sm:$0xf] }
 0x1a5   :  { %v7868_v40 = vld [vmem:[#allocation8 + $0xd8c] sm:$0xf]  ;;  %v7290_v45 = vor.u32 %v7932_v36, %v7287_v37  ;;  %4398 = vmatpush.bf16.msrb.mxu1 %v6682_v38  ;;  %4435 = vmatpush.bf16.msrb.mxu3 %v5470_v57  ;;  %v7457_v37 = vld [vmem:[#allocation8 + $0xac] sm:$0xf0]  ;;  %v4145_v62 = vpop.f32.mrf.mxu1 }
 0x1a6   :  { %v7031_v34 = vld [vmem:[#allocation8 + $0xda8] sm:$0xf0]  ;;  %v5757_v38 = vld [vmem:[#allocation8 + $0x390] sm:$0xf]  ;;  %v5374_v48 = vor.u32 %v7457_v37, %v5373_v35  ;;  %v6302_v37 = vor.u32 %v7689_v23, %v6301_v22 }
 0x1a7   :  { %v7772_v42 = vld [vmem:[#allocation8 + $0xa8c] sm:$0xf]  ;;  %v7034_v49 = vor.u32 %v7868_v40, %v7031_v34  ;;  %4421 = vmatpush.bf16.msra.mxu0 %v7290_v45  ;;  %v7553_v40 = vld [vmem:[#allocation8 + $0x3ac] sm:$0xf0] }
 0x1a8   :  { %v6647_v43 = vld [vmem:[#allocation8 + $0xaa8] sm:$0xf0]  ;;  %v7545_v57 = vld [vmem:[#allocation8 + $0x36c] sm:$0xf0] }
 0x1a9   :  { %v7924_v50 = vld [vmem:[#allocation8 + $0xf4c] sm:$0xf]  ;;  %v6650_v54 = vor.u32 %v7772_v42, %v6647_v43  ;;  %4408 = vmatpush.bf16.msrb.mxu2 %v7034_v49  ;;  %4436 = vmatpush.bf16.msrb.mxu3 %v5438_v7  ;;  %v4104_v43 = vpop.f32.mrf.mxu2  ;;  %v5758_v49 = vor.u32 %v7553_v40, %v5757_v38  ;;  %v7529_v35 = vld [vmem:[#allocation8 + $0x2ec] sm:$0xf0] }
 0x1aa   :  { %v7255_v51 = vld [vmem:[#allocation8 + $0xf68] sm:$0xf0]  ;;  %v4105_v53 = vadd.f32 %v4104_v43, %v8250_v21  ;;  %v6525_v38 = vld [vmem:[#allocation8 + $0x990] sm:$0xf] }
 0x1ab   :  { %v7860_v55 = vld [vmem:[#allocation8 + $0xd4c] sm:$0xf]  ;;  %v7258_v61 = vor.u32 %v7924_v50, %v7255_v51  ;;  %4399 = vmatpush.bf16.msrb.mxu1 %v6650_v54  ;;  %v5341_v50 = vld [vmem:[#allocation8 + $0x50] sm:$0xf]  ;;  %v8259_v51 = vpop.f32.mrf.mxu3 }
 0x1ac   :  { %v6999_v56 = vld [vmem:[#allocation8 + $0xd68] sm:$0xf0]  ;;  %v7745_v40 = vld [vmem:[#allocation8 + $0x9ac] sm:$0xf0] }
 0x1ad   :  { %v7764_v58 = vld [vmem:[#allocation8 + $0xa4c] sm:$0xf]  ;;  %v7002_v9 = vor.u32 %v7860_v55, %v6999_v56  ;;  %4422 = vmatpush.bf16.msra.mxu0 %v7258_v61  ;;  %4437 = vmatpush.bf16.msrb.mxu3 %v5406_v32  ;;  %v7449_v55 = vld [vmem:[#allocation8 + $0x6c] sm:$0xf0]  ;;  %v6526_v46 = vor.u32 %v7745_v40, %v6525_v38 }
 0x1ae   :  { %v6615_v60 = vld [vmem:[#allocation8 + $0xa68] sm:$0xf0]  ;;  %v5725_v56 = vld [vmem:[#allocation8 + $0x350] sm:$0xf] }
 0x1af   :  { %v7916_v2 = vld [vmem:[#allocation8 + $0xf0c] sm:$0xf]  ;;  %v6618_v63 = vor.u32 %v7764_v58, %v6615_v60  ;;  %4409 = vmatpush.bf16.msrb.mxu2 %v7002_v9  ;;  %v8261_v58 = vadd.f32 %v4117_v6, %v4105_v53  ;;  %v5342_v9 = vor.u32 %v7449_v55, %v5341_v50  ;;  %v7537_v6 = vld [vmem:[#allocation8 + $0x32c] sm:$0xf0] }
 0x1b0   :  { %v7223_v3 = vld [vmem:[#allocation8 + $0xf28] sm:$0xf0]  ;;  %v7681_v43 = vld [vmem:[#allocation8 + $0x7ac] sm:$0xf0] }
 0x1b1   :  { %v7852_v4 = vld [vmem:[#allocation8 + $0xd0c] sm:$0xf]  ;;  %v7226_v16 = vor.u32 %v7916_v2, %v7223_v3  ;;  %4400 = vmatpush.bf16.msrb.mxu1 %v6618_v63  ;;  %4438 = vmatpush.bf16.msrb.mxu3 %v5374_v48  ;;  %v5726_v2 = vor.u32 %v7545_v57, %v5725_v56  ;;  %v5309_v3 = vld [vmem:[#allocation8 + $0x10] sm:$0xf]  ;;  %v4106_v19 = vpop.f32.mrf.mxu2 }
 0x1b2   :  { %v6967_v5 = vld [vmem:[#allocation8 + $0xd28] sm:$0xf0]  ;;  %v7441_v63 = vld [vmem:[#allocation8 + $0x2c] sm:$0xf0] }
 0x1b3   :  { %v7756_v11 = vld [vmem:[#allocation8 + $0xa0c] sm:$0xf]  ;;  %v6970_v15 = vor.u32 %v7852_v4, %v6967_v5  ;;  %4423 = vmatpush.bf16.msra.mxu0 %v7226_v16  ;;  %v5693_v4 = vld [vmem:[#allocation8 + $0x310] sm:$0xf] }
 0x1b4   :  { %v6583_v12 = vld [vmem:[#allocation8 + $0xa28] sm:$0xf0]  ;;  %v7753_v16 = vld [vmem:[#allocation8 + $0x9ec] sm:$0xf0] }
 0x1b5   :  { %v7908_v24 = vld [vmem:[#allocation8 + $0xecc] sm:$0xf]  ;;  %v6586_v27 = vor.u32 %v7756_v11, %v6583_v12  ;;  %4410 = vmatpush.bf16.msrb.mxu2 %v6970_v15  ;;  %4439 = vmatpush.bf16.msrb.mxu3 %v5342_v9  ;;  %v4169_v15 = vpop.f32.mrf.mxu0  ;;  %v6558_v32 = vor.u32 %v7753_v16, %v6557_v14  ;;  %v7617_v53 = vld [vmem:[#allocation8 + $0x5ac] sm:$0xf0] }
 0x1b6   :  { %v7191_v25 = vld [vmem:[#allocation8 + $0xee8] sm:$0xf0]  ;;  %v5629_v48 = vld [vmem:[#allocation8 + $0x290] sm:$0xf] }
 0x1b7   :  { %v7844_v28 = vld [vmem:[#allocation8 + $0xccc] sm:$0xf]  ;;  %v7194_v36 = vor.u32 %v7908_v24, %v7191_v25  ;;  %4401 = vmatpush.bf16.msrb.mxu1 %v6586_v27  ;;  %v5310_v24 = vor.u32 %v7441_v63, %v5309_v3  ;;  %v5694_v25 = vor.u32 %v7537_v6, %v5693_v4  ;;  %v7625_v27 = vld [vmem:[#allocation8 + $0x5ec] sm:$0xf0] }
 0x1b8   :  { %v6935_v29 = vld [vmem:[#allocation8 + $0xce8] sm:$0xf0]  ;;  %v7737_v55 = vld [vmem:[#allocation8 + $0x96c] sm:$0xf0] }
 0x1b9   :  { %v6938_v34 = vor.u32 %v7844_v28, %v6935_v29  ;;  %v7900_v41 = vld [vmem:[#allocation8 + $0xe8c] sm:$0xf]  ;;  %4424 = vmatpush.bf16.msra.mxu0 %v7194_v36  ;;  %v4184_v28 = vpop.f32.mrf.mxu3  ;;  %4440 = vmatpush.bf16.msrb.mxu3 %v5310_v24  ;;  %v6237_v57 = vld [vmem:[#allocation8 + $0x750] sm:$0xf] }
 0x1ba   :  { %v7159_v42 = vld [vmem:[#allocation8 + $0xea8] sm:$0xf0]  ;;  %4402 = vmatmul.bf16.vlgmr.msrb.gmra.mxu1 %v8218_v18  ;;  %v5597_v3 = vld [vmem:[#allocation8 + $0x250] sm:$0xf] }
 0x1bb   :  { %v7836_v44 = vld [vmem:[#allocation8 + $0xc8c] sm:$0xf]  ;;  %4446 = vmatpush.bf16.msra.mxu1 %v5790_v33  ;;  %v7162_v54 = vor.u32 %v7900_v41, %v7159_v42  ;;  %4411 = vmatpush.bf16.msrb.mxu2 %v6938_v34  ;;  %v5661_v33 = vld [vmem:[#allocation8 + $0x2d0] sm:$0xf]  ;;  %v8264_v34 = vpop.f32.mrf.mxu1  ;;  %v6046_v41 = vor.u32 %v7625_v27, %v6045_v26 }
 0x1bc   :  { %v6903_v45 = vld [vmem:[#allocation8 + $0xca8] sm:$0xf0]  ;;  %v6269_v42 = vld [vmem:[#allocation8 + $0x790] sm:$0xf]  ;;  %4441 = vmatmul.bf16.vlgmr.msrb.gmra.mxu3 %v8196_v47 }
 0x1bd   :  { %v6906_v60 = vor.u32 %v7836_v44, %v6903_v45  ;;  %v7892_v21 = vld [vmem:[#allocation8 + $0xe4c] sm:$0xf]  ;;  %4425 = vmatpush.bf16.msra.mxu0 %v7162_v54  ;;  %v5662_v44 = vor.u32 %v7529_v35, %v5661_v33  ;;  %v6013_v45 = vld [vmem:[#allocation8 + $0x590] sm:$0xf]  ;;  %4485 = vmatpush.bf16.msra.mxu3 %v6558_v32  ;;  %v6270_v50 = vor.u32 %v7681_v43, %v6269_v42 }
 0x1be   :  { %v7127_v61 = vld [vmem:[#allocation8 + $0xe68] sm:$0xf0]  ;;  %v6493_v54 = vld [vmem:[#allocation8 + $0x950] sm:$0xf]  ;;  %v6014_v56 = vor.u32 %v7617_v53, %v6013_v45 }
 0x1bf   :  { %v7828_v0 = vld [vmem:[#allocation8 + $0xc4c] sm:$0xf]  ;;  %4447 = vmatpush.bf16.msra.mxu1 %v5758_v49  ;;  %v7130_v5 = vor.u32 %v7892_v21, %v7127_v61  ;;  %4412 = vmatpush.bf16.msrb.mxu2 %v6906_v60  ;;  %v7521_v49 = vld [vmem:[#allocation8 + $0x2ac] sm:$0xf0]  ;;  %v4156_v21 = vpop.f32.mrf.mxu2  ;;  %v4171_v61 = vpop.f32.mrf.mxu0 }
 0x1c0   :  { %v6871_v1 = vld [vmem:[#allocation8 + $0xc68] sm:$0xf0]  ;;  %v7673_v60 = vld [vmem:[#allocation8 + $0x76c] sm:$0xf0]  ;;  %v5630_v62 = vor.u32 %v7521_v49, %v5629_v48  ;;  %v4157_v9 = vadd.f32 %v4156_v21, %v8256_v31 }
 0x1c1   :  { %v7820_v7 = vld [vmem:[#allocation8 + $0xc0c] sm:$0xf]  ;;  %v6874_v12 = vor.u32 %v7828_v0, %v6871_v1  ;;  %4426 = vmatpush.bf16.msra.mxu0 %v7130_v5  ;;  %v5981_v0 = vld [vmem:[#allocation8 + $0x550] sm:$0xf]  ;;  %4486 = vmatpush.bf16.msra.mxu3 %v6526_v46  ;;  %v6238_v4 = vor.u32 %v7673_v60, %v6237_v57  ;;  %v4234_v60 = vpop.f32.mrf.mxu3 }
 0x1c2   :  { %v7884_v11 = vld [vmem:[#allocation8 + $0xe0c] sm:$0xf]  ;;  %v7609_v1 = vld [vmem:[#allocation8 + $0x56c] sm:$0xf0] }
 0x1c3   :  { %v7095_v13 = vld [vmem:[#allocation8 + $0xe28] sm:$0xf0]  ;;  %4448 = vmatpush.bf16.msra.mxu1 %v5726_v2  ;;  %4413 = vmatpush.bf16.msrb.mxu2 %v6874_v12  ;;  %v6494_v2 = vor.u32 %v7737_v55, %v6493_v54  ;;  %v7513_v63 = vld [vmem:[#allocation8 + $0x26c] sm:$0xf0]  ;;  %v5982_v12 = vor.u32 %v7609_v1, %v5981_v0 }
 0x1c4   :  { %v6839_v20 = vld [vmem:[#allocation8 + $0xc28] sm:$0xf0]  ;;  %v7098_v29 = vor.u32 %v7884_v11, %v7095_v13  ;;  %v6461_v5 = vld [vmem:[#allocation8 + $0x910] sm:$0xf]  ;;  %v4197_v11 = vpop.f32.mrf.mxu1  ;;  %v5598_v16 = vor.u32 %v7513_v63, %v5597_v3  ;;  %v4003_v3 = vperm.slane %v8239_v59, 4 }
 0x1c5   :  { %v6842_v36 = vor.u32 %v7820_v7, %v6839_v20  ;;  %v7729_v6 = vld [vmem:[#allocation8 + $0x92c] sm:$0xf0]  ;;  %v4170_v7 = vadd.f32 %v4169_v15, %v4157_v9  ;;  %4487 = vmatpush.bf16.msra.mxu3 %v6494_v2 }
 0x1c6   :  { %4427 = vmatpush.bf16.msra.mxu0 %v7098_v29  ;;  %v6205_v13 = vld [vmem:[#allocation8 + $0x710] sm:$0xf]  ;;  %v6462_v20 = vor.u32 %v7729_v6, %v6461_v5 }
 0x1c7   :  { %4449 = vmatpush.bf16.msra.mxu1 %v5694_v25  ;;  %4414 = vmatpush.bf16.msrb.mxu2 %v6842_v36  ;;  %v7665_v14 = vld [vmem:[#allocation8 + $0x72c] sm:$0xf0]  ;;  %v4183_v25 = vadd.f32 %v8259_v51, %v4170_v7  ;;  %v4158_v36 = vpop.f32.mrf.mxu2 }
 0x1c8   :  { %v5949_v19 = vld [vmem:[#allocation8 + $0x510] sm:$0xf]  ;;  %v6206_v26 = vor.u32 %v7665_v14, %v6205_v13 }
 0x1c9   :  { %4428 = vmatmul.bf16.vlgmr.msra.gmra.mxu0 %v8224_v8  ;;  %v7601_v31 = vld [vmem:[#allocation8 + $0x52c] sm:$0xf0]  ;;  %v4196_v35 = vadd.f32 %v8264_v34, %v4183_v25  ;;  %4488 = vmatpush.bf16.msra.mxu3 %v6462_v20 }
 0x1ca   :  { %4472 = vmatpush.bf16.msrb.mxu0 %v6302_v37  ;;  %4415 = vmatmul.bf16.vlgmr.msrb.gmra.mxu2 %v8226_v17  ;;  %v5565_v22 = vld [vmem:[#allocation8 + $0x210] sm:$0xf]  ;;  %v5950_v29 = vor.u32 %v7601_v31, %v5949_v19 }
 0x1cb   :  { %4459 = vmatpush.bf16.msra.mxu2 %v6046_v41  ;;  %4450 = vmatpush.bf16.msra.mxu1 %v5662_v44  ;;  %v7505_v23 = vld [vmem:[#allocation8 + $0x22c] sm:$0xf0]  ;;  %v4221_v41 = vpop.f32.mrf.mxu0 }
 0x1cc   :  { %v6429_v24 = vld [vmem:[#allocation8 + $0x8d0] sm:$0xf]  ;;  %v5566_v37 = vor.u32 %v7505_v23, %v5565_v22 }
 0x1cd   :  { %v7721_v27 = vld [vmem:[#allocation8 + $0x8ec] sm:$0xf0] }
 0x1ce   :  { %4473 = vmatpush.bf16.msrb.mxu0 %v6270_v50  ;;  %v6813_v15 = vld [vmem:[#allocation8 + $0xbd0] sm:$0xf]  ;;  %v6430_v42 = vor.u32 %v7721_v27, %v6429_v24  ;;  %v5535_v27 = vld [vmem:[#allocation8 + $0x1f0] sm:$0xf0] }
 0x1cf   :  { %4460 = vmatpush.bf16.msra.mxu2 %v6014_v56  ;;  %4451 = vmatpush.bf16.msra.mxu1 %v5630_v62  ;;  %v7817_v28 = vld [vmem:[#allocation8 + $0xbec] sm:$0xf0]  ;;  %v4208_v63 = vpop.f32.mrf.mxu2 }
 0x1d0   :  { %v6173_v32 = vld [vmem:[#allocation8 + $0x6d0] sm:$0xf]  ;;  %v6814_v51 = vor.u32 %v7817_v28, %v6813_v15  ;;  %4489 = vmatpush.bf16.msra.mxu3 %v6430_v42  ;;  %v4209_v6 = vadd.f32 %v4208_v63, %v4196_v35 }
 0x1d1   :  { %v7657_v33 = vld [vmem:[#allocation8 + $0x6ec] sm:$0xf0] }
 0x1d2   :  { %4474 = vmatpush.bf16.msrb.mxu0 %v6238_v4  ;;  %v5917_v38 = vld [vmem:[#allocation8 + $0x4d0] sm:$0xf]  ;;  %v6174_v44 = vor.u32 %v7657_v33, %v6173_v32  ;;  %v4222_v23 = vadd.f32 %v4221_v41, %v4209_v6 }
 0x1d3   :  { %4461 = vmatpush.bf16.msra.mxu2 %v5982_v12  ;;  %4452 = vmatpush.bf16.msra.mxu1 %v5598_v16  ;;  %v7593_v40 = vld [vmem:[#allocation8 + $0x4ec] sm:$0xf0]  ;;  %v4223_v7 = vpop.f32.mrf.mxu0 }
 0x1d4   :  { %v6397_v43 = vld [vmem:[#allocation8 + $0x890] sm:$0xf]  ;;  %v5918_v48 = vor.u32 %v7593_v40, %v5917_v38  ;;  %v4857_v32 = vrot.slane %v4222_v23, 7  ;;  %v4236_v38 = vpop.f32.mrf.mxu3 }
 0x1d5   :  { %v7713_v45 = vld [vmem:[#allocation8 + $0x8ac] sm:$0xf0] }
 0x1d6   :  { %4475 = vmatpush.bf16.msrb.mxu0 %v6206_v26  ;;  %v6781_v53 = vld [vmem:[#allocation8 + $0xb90] sm:$0xf]  ;;  %v6398_v55 = vor.u32 %v7713_v45, %v6397_v43  ;;  %v7493_v26 = vld [vmem:[#allocation8 + $0x1d4] sm:$0xf]  ;;  %v4235_v43 = vadd.f32 %v4234_v60, %v4003_v3 }
 0x1d7   :  { %v7809_v46 = vld [vmem:[#allocation8 + $0xbac] sm:$0xf0]  ;;  %4462 = vmatpush.bf16.msra.mxu2 %v5950_v29  ;;  %4453 = vmatpush.bf16.msra.mxu1 %v5566_v37  ;;  %v5538_v42 = vor.u32 %v7493_v26, %v5535_v27 }
 0x1d8   :  { %v6141_v49 = vld [vmem:[#allocation8 + $0x690] sm:$0xf]  ;;  %v6782_v56 = vor.u32 %v7809_v46, %v6781_v53  ;;  %4490 = vmatpush.bf16.msra.mxu3 %v6398_v55  ;;  %v7485_v46 = vld [vmem:[#allocation8 + $0x194] sm:$0xf] }
 0x1d9   :  { %v7649_v50 = vld [vmem:[#allocation8 + $0x6ac] sm:$0xf0] }
 0x1da   :  { %v5885_v34 = vld [vmem:[#allocation8 + $0x490] sm:$0xf]  ;;  %4476 = vmatpush.bf16.msrb.mxu0 %v6174_v44  ;;  %v6142_v21 = vor.u32 %v7649_v50, %v6141_v49  ;;  %4454 = vmatmul.bf16.vlgmr.msra.gmra.mxu1 %v8200_v10  ;;  %v8276_v44 = vsel %vm4864_vm1, %v8261_v58, %v4857_v32  ;;  %v4210_v49 = vpop.f32.mrf.mxu2  ;;  %v4247_v50 = vpop.f32.mrf.mxu1  ;;  %v5407_v32 = vld [vmem:[#allocation8 + $0xf0] sm:$0xf0] }
 0x1db   :  { %v7585_v54 = vld [vmem:[#allocation8 + $0x4ac] sm:$0xf0]  ;;  %4498 = vmatpush.bf16.msrb.mxu1 %v6814_v51  ;;  %4463 = vmatpush.bf16.msra.mxu2 %v5918_v48  ;;  %v5503_v48 = vld [vmem:[#allocation8 + $0x1b0] sm:$0xf0] }
 0x1dc   :  { %v6365_v57 = vld [vmem:[#allocation8 + $0x850] sm:$0xf]  ;;  %v5886_v1 = vor.u32 %v7585_v54, %v5885_v34  ;;  %v5506_v58 = vor.u32 %v7485_v46, %v5503_v48  ;;  %v5375_v48 = vld [vmem:[#allocation8 + $0xb0] sm:$0xf0] }
 0x1dd   :  { %v7705_v61 = vld [vmem:[#allocation8 + $0x86c] sm:$0xf0]  ;;  %v7549_v49 = vld [vmem:[#allocation8 + $0x394] sm:$0xf] }
 0x1de   :  { %v6749_v62 = vld [vmem:[#allocation8 + $0xb50] sm:$0xf]  ;;  %v6366_v11 = vor.u32 %v7705_v61, %v6365_v57  ;;  %4477 = vmatpush.bf16.msrb.mxu0 %v6142_v21 }
 0x1df   :  { %v7801_v0 = vld [vmem:[#allocation8 + $0xb6c] sm:$0xf0]  ;;  %4499 = vmatpush.bf16.msrb.mxu1 %v6782_v56  ;;  %4464 = vmatpush.bf16.msra.mxu2 %v5886_v1  ;;  %v8278_v56 = vadd.f32 %v4247_v50, %v4235_v43  ;;  %v7477_v1 = vld [vmem:[#allocation8 + $0x154] sm:$0xf] }
 0x1e0   :  { %v6109_v9 = vld [vmem:[#allocation8 + $0x650] sm:$0xf]  ;;  %v6750_v12 = vor.u32 %v7801_v0, %v6749_v62  ;;  %4491 = vmatpush.bf16.msra.mxu3 %v6366_v11  ;;  %v5759_v50 = vld [vmem:[#allocation8 + $0x3b0] sm:$0xf0] }
 0x1e1   :  { %v7641_v2 = vld [vmem:[#allocation8 + $0x66c] sm:$0xf0] }
 0x1e2   :  { %v5853_v4 = vld [vmem:[#allocation8 + $0x450] sm:$0xf]  ;;  %v6110_v19 = vor.u32 %v7641_v2, %v6109_v9  ;;  %v5471_v9 = vld [vmem:[#allocation8 + $0x170] sm:$0xf0] }
 0x1e3   :  { %v7577_v5 = vld [vmem:[#allocation8 + $0x46c] sm:$0xf0]  ;;  %4500 = vmatpush.bf16.msrb.mxu1 %v6750_v12  ;;  %v5474_v7 = vor.u32 %v7477_v1, %v5471_v9  ;;  %v5343_v1 = vld [vmem:[#allocation8 + $0x70] sm:$0xf0] }
 0x1e4   :  { %v6333_v13 = vld [vmem:[#allocation8 + $0x810] sm:$0xf]  ;;  %v5854_v24 = vor.u32 %v7577_v5, %v5853_v4  ;;  %4478 = vmatpush.bf16.msrb.mxu0 %v6110_v19  ;;  %v4249_v19 = vpop.f32.mrf.mxu1  ;;  %v7541_v9 = vld [vmem:[#allocation8 + $0x354] sm:$0xf] }
 0x1e5   :  { %v7697_v14 = vld [vmem:[#allocation8 + $0x82c] sm:$0xf0]  ;;  %v5311_v19 = vld [vmem:[#allocation8 + $0x30] sm:$0xf0] }
 0x1e6   :  { %v6717_v16 = vld [vmem:[#allocation8 + $0xb10] sm:$0xf]  ;;  %v6334_v33 = vor.u32 %v7697_v14, %v6333_v13  ;;  %4465 = vmatpush.bf16.msra.mxu2 %v5854_v24  ;;  %v7469_v14 = vld [vmem:[#allocation8 + $0x114] sm:$0xf] }
 0x1e7   :  { %v7793_v31 = vld [vmem:[#allocation8 + $0xb2c] sm:$0xf0] }
 0x1e8   :  { %v5821_v20 = vld [vmem:[#allocation8 + $0x410] sm:$0xf]  ;;  %v6718_v35 = vor.u32 %v7793_v31, %v6717_v16  ;;  %4492 = vmatpush.bf16.msra.mxu3 %v6334_v33  ;;  %v5439_v16 = vld [vmem:[#allocation8 + $0x130] sm:$0xf0] }
 0x1e9   :  { %v6077_v22 = vld [vmem:[#allocation8 + $0x610] sm:$0xf]  ;;  %v5442_v26 = vor.u32 %v7469_v14, %v5439_v16  ;;  %v7557_v33 = vld [vmem:[#allocation8 + $0x3d4] sm:$0xf] }
 0x1ea   :  { %v7633_v25 = vld [vmem:[#allocation8 + $0x62c] sm:$0xf0]  ;;  %4501 = vmatpush.bf16.msrb.mxu1 %v6718_v35  ;;  %v5791_v35 = vld [vmem:[#allocation8 + $0x3f0] sm:$0xf0] }
 0x1eb   :  { %v7569_v15 = vld [vmem:[#allocation8 + $0x42c] sm:$0xf0]  ;;  %v6078_v40 = vor.u32 %v7633_v25, %v6077_v22  ;;  %4493 = vmatmul.bf16.vlgmr.msra.gmra.mxu3 %v8214_v39  ;;  %v7437_v16 = vld [vmem:[#allocation8 + $0x14] sm:$0xf] }
 0x1ec   :  { %v7325_v28 = vld [vmem:[#allocation8 + $0xfd0] sm:$0xf]  ;;  %v5822_v45 = vor.u32 %v7569_v15, %v5821_v20  ;;  %4537 = vmatpush.bf16.msrb.mxu3 %v5538_v42 }
 0x1ed   :  { %v7945_v29 = vld [vmem:[#allocation8 + $0xfec] sm:$0xf0]  ;;  %4479 = vmatpush.bf16.msrb.mxu0 %v6078_v40 }
 0x1ee   :  { %v7069_v36 = vld [vmem:[#allocation8 + $0xdd0] sm:$0xf]  ;;  %v7326_v53 = vor.u32 %v7945_v29, %v7325_v28  ;;  %4466 = vmatpush.bf16.msra.mxu2 %v5822_v45  ;;  %v7461_v28 = vld [vmem:[#allocation8 + $0xd4] sm:$0xf]  ;;  %v5794_v45 = vor.u32 %v7557_v33, %v5791_v35  ;;  %v5314_v35 = vor.u32 %v7437_v16, %v5311_v19 }
 0x1ef   :  { %v7881_v37 = vld [vmem:[#allocation8 + $0xdec] sm:$0xf0]  ;;  %v5410_v43 = vor.u32 %v7461_v28, %v5407_v32  ;;  %v6559_v28 = vld [vmem:[#allocation8 + $0x9f0] sm:$0xf0] }
 0x1f0   :  { %v6685_v41 = vld [vmem:[#allocation8 + $0xad0] sm:$0xf]  ;;  %v7070_v34 = vor.u32 %v7881_v37, %v7069_v36  ;;  %4480 = vmatmul.bf16.vlgmr.msrb.gmra.mxu0 %v8211_v52  ;;  %4538 = vmatpush.bf16.msrb.mxu3 %v5506_v58  ;;  %v5762_v58 = vor.u32 %v7549_v49, %v5759_v50  ;;  %v6303_v32 = vld [vmem:[#allocation8 + $0x7f0] sm:$0xf0]  ;;  %v4299_v50 = vpop.f32.mrf.mxu1 }
 0x1f1   :  { %v7785_v51 = vld [vmem:[#allocation8 + $0xaec] sm:$0xf0]  ;;  %4524 = vmatpush.bf16.msra.mxu0 %v7326_v53  ;;  %4467 = vmatmul.bf16.vlgmr.msra.gmra.mxu2 %v8203_v30  ;;  %v7453_v53 = vld [vmem:[#allocation8 + $0x94] sm:$0xf] }
 0x1f2   :  { %v7293_v54 = vld [vmem:[#allocation8 + $0xf90] sm:$0xf]  ;;  %v6686_v57 = vor.u32 %v7785_v51, %v6685_v41  ;;  %4511 = vmatpush.bf16.msrb.mxu2 %v7070_v34  ;;  %v4273_v51 = vpop.f32.mrf.mxu0  ;;  %v7725_v16 = vld [vmem:[#allocation8 + $0x914] sm:$0xf] }
 0x1f3   :  { %v7937_v55 = vld [vmem:[#allocation8 + $0xfac] sm:$0xf0]  ;;  %v6463_v19 = vld [vmem:[#allocation8 + $0x930] sm:$0xf0] }
 0x1f4   :  { %v7037_v60 = vld [vmem:[#allocation8 + $0xd90] sm:$0xf]  ;;  %v7294_v0 = vor.u32 %v7937_v55, %v7293_v54  ;;  %4502 = vmatpush.bf16.msrb.mxu1 %v6686_v57  ;;  %4539 = vmatpush.bf16.msrb.mxu3 %v5474_v7 }
 0x1f5   :  { %v7873_v21 = vld [vmem:[#allocation8 + $0xdac] sm:$0xf0] }
 0x1f6   :  { %v6653_v61 = vld [vmem:[#allocation8 + $0xa90] sm:$0xf]  ;;  %v7038_v2 = vor.u32 %v7873_v21, %v7037_v60  ;;  %4525 = vmatpush.bf16.msra.mxu0 %v7294_v0  ;;  %v5378_v21 = vor.u32 %v7453_v53, %v5375_v48  ;;  %v6527_v48 = vld [vmem:[#allocation8 + $0x9b0] sm:$0xf0] }
 0x1f7   :  { %v7777_v62 = vld [vmem:[#allocation8 + $0xaac] sm:$0xf0] }
 0x1f8   :  { %v7261_v3 = vld [vmem:[#allocation8 + $0xf50] sm:$0xf]  ;;  %v6654_v4 = vor.u32 %v7777_v62, %v6653_v61  ;;  %4512 = vmatpush.bf16.msrb.mxu2 %v7038_v2  ;;  %4540 = vmatpush.bf16.msrb.mxu3 %v5442_v26  ;;  %v7445_v61 = vld [vmem:[#allocation8 + $0x54] sm:$0xf]  ;;  %v4286_v62 = vpop.f32.mrf.mxu3 }
 0x1f9   :  { %v7929_v63 = vld [vmem:[#allocation8 + $0xf6c] sm:$0xf0]  ;;  %v5727_v2 = vld [vmem:[#allocation8 + $0x370] sm:$0xf0] }
 0x1fa   :  { %v7005_v5 = vld [vmem:[#allocation8 + $0xd50] sm:$0xf]  ;;  %v7262_v13 = vor.u32 %v7929_v63, %v7261_v3  ;;  %4503 = vmatpush.bf16.msrb.mxu1 %v6654_v4  ;;  %v5730_v14 = vor.u32 %v7541_v9, %v5727_v2  ;;  %v7733_v9 = vld [vmem:[#allocation8 + $0x954] sm:$0xf] }
 0x1fb   :  { %v7865_v6 = vld [vmem:[#allocation8 + $0xd6c] sm:$0xf0]  ;;  %v6495_v2 = vld [vmem:[#allocation8 + $0x970] sm:$0xf0] }
 0x1fc   :  { %v6621_v11 = vld [vmem:[#allocation8 + $0xa50] sm:$0xf]  ;;  %v7006_v31 = vor.u32 %v7865_v6, %v7005_v5  ;;  %4526 = vmatpush.bf16.msra.mxu0 %v7262_v13  ;;  %4541 = vmatpush.bf16.msrb.mxu3 %v5410_v43  ;;  %v4260_v5 = vpop.f32.mrf.mxu2  ;;  %v5346_v13 = vor.u32 %v7445_v61, %v5343_v1  ;;  %v5663_v43 = vld [vmem:[#allocation8 + $0x2f0] sm:$0xf0] }
 0x1fd   :  { %v7769_v12 = vld [vmem:[#allocation8 + $0xa6c] sm:$0xf0] }
 0x1fe   :  { %v7229_v20 = vld [vmem:[#allocation8 + $0xf10] sm:$0xf]  ;;  %v6622_v23 = vor.u32 %v7769_v12, %v6621_v11  ;;  %4513 = vmatpush.bf16.msrb.mxu2 %v7006_v31  ;;  %v4261_v11 = vadd.f32 %v4260_v5, %v8278_v56  ;;  %v4275_v12 = vpop.f32.mrf.mxu0  ;;  %v7533_v31 = vld [vmem:[#allocation8 + $0x314] sm:$0xf] }
 0x1ff   :  { %v7921_v22 = vld [vmem:[#allocation8 + $0xf2c] sm:$0xf0]  ;;  %v7509_v12 = vld [vmem:[#allocation8 + $0x254] sm:$0xf] }
 0x200   :  { %v6973_v24 = vld [vmem:[#allocation8 + $0xd10] sm:$0xf]  ;;  %v7230_v29 = vor.u32 %v7921_v22, %v7229_v20  ;;  %4504 = vmatpush.bf16.msrb.mxu1 %v6622_v23  ;;  %4542 = vmatpush.bf16.msrb.mxu3 %v5378_v21  ;;  %v5695_v22 = vld [vmem:[#allocation8 + $0x330] sm:$0xf0] }
 0x201   :  { %v7857_v25 = vld [vmem:[#allocation8 + $0xd2c] sm:$0xf0]  ;;  %v7613_v21 = vld [vmem:[#allocation8 + $0x594] sm:$0xf] }
 0x202   :  { %v6589_v27 = vld [vmem:[#allocation8 + $0xa10] sm:$0xf]  ;;  %v6974_v36 = vor.u32 %v7857_v25, %v6973_v24  ;;  %4527 = vmatpush.bf16.msra.mxu0 %v7230_v29  ;;  %v4274_v25 = vadd.f32 %v4273_v51, %v4261_v11  ;;  %v7685_v29 = vld [vmem:[#allocation8 + $0x7d4] sm:$0xf]  ;;  %v6498_v11 = vor.u32 %v7733_v9, %v6495_v2 }
 0x203   :  { %v7761_v15 = vld [vmem:[#allocation8 + $0xa2c] sm:$0xf0]  ;;  %v7525_v51 = vld [vmem:[#allocation8 + $0x2d4] sm:$0xf]  ;;  %v6306_v53 = vor.u32 %v7685_v29, %v6303_v32 }
 0x204   :  { %v7197_v37 = vld [vmem:[#allocation8 + $0xed0] sm:$0xf]  ;;  %v6590_v40 = vor.u32 %v7761_v15, %v6589_v27  ;;  %4514 = vmatpush.bf16.msrb.mxu2 %v6974_v36  ;;  %v7749_v15 = vld [vmem:[#allocation8 + $0x9d4] sm:$0xf]  ;;  %4543 = vmatpush.bf16.msrb.mxu3 %v5346_v13  ;;  %v4287_v33 = vadd.f32 %v4286_v62, %v4274_v25  ;;  %v5698_v36 = vor.u32 %v7533_v31, %v5695_v22  ;;  %v4262_v49 = vpop.f32.mrf.mxu2  ;;  %v4301_v31 = vpop.f32.mrf.mxu1 }
 0x205   :  { %v7913_v38 = vld [vmem:[#allocation8 + $0xeec] sm:$0xf0]  ;;  %v7517_v62 = vld [vmem:[#allocation8 + $0x294] sm:$0xf] }
 0x206   :  { %v6941_v42 = vld [vmem:[#allocation8 + $0xcd0] sm:$0xf]  ;;  %v7198_v46 = vor.u32 %v7913_v38, %v7197_v37  ;;  %4505 = vmatpush.bf16.msrb.mxu1 %v6590_v40  ;;  %v7621_v37 = vld [vmem:[#allocation8 + $0x5d4] sm:$0xf]  ;;  %v4288_v40 = vpop.f32.mrf.mxu3 }
 0x207   :  { %v7849_v41 = vld [vmem:[#allocation8 + $0xcec] sm:$0xf0]  ;;  %v6047_v38 = vld [vmem:[#allocation8 + $0x5f0] sm:$0xf0] }
 0x208   :  { %v6942_v34 = vor.u32 %v7849_v41, %v6941_v42  ;;  %v7165_v54 = vld [vmem:[#allocation8 + $0xe90] sm:$0xf]  ;;  %4528 = vmatpush.bf16.msra.mxu0 %v7198_v46  ;;  %v6562_v41 = vor.u32 %v7749_v15, %v6559_v28  ;;  %v7741_v46 = vld [vmem:[#allocation8 + $0x994] sm:$0xf]  ;;  %4544 = vmatpush.bf16.msrb.mxu3 %v5314_v35 }
 0x209   :  { %v7905_v55 = vld [vmem:[#allocation8 + $0xeac] sm:$0xf0]  ;;  %4506 = vmatmul.bf16.vlgmr.msrb.gmra.mxu1 %v8218_v18  ;;  %v6530_v61 = vor.u32 %v7741_v46, %v6527_v48  ;;  %v5599_v13 = vld [vmem:[#allocation8 + $0x270] sm:$0xf0] }
 0x20a   :  { %v6909_v57 = vld [vmem:[#allocation8 + $0xc90] sm:$0xf]  ;;  %4550 = vmatpush.bf16.msra.mxu1 %v5794_v45  ;;  %v7166_v0 = vor.u32 %v7905_v55, %v7165_v54  ;;  %4515 = vmatpush.bf16.msrb.mxu2 %v6942_v34  ;;  %v6050_v34 = vor.u32 %v7621_v37, %v6047_v38  ;;  %v7677_v54 = vld [vmem:[#allocation8 + $0x794] sm:$0xf] }
 0x20b   :  { %v7841_v60 = vld [vmem:[#allocation8 + $0xcac] sm:$0xf0]  ;;  %v6271_v55 = vld [vmem:[#allocation8 + $0x7b0] sm:$0xf0]  ;;  %4545 = vmatmul.bf16.vlgmr.msrb.gmra.mxu3 %v8196_v47 }
 0x20c   :  { %v6910_v3 = vor.u32 %v7841_v60, %v6909_v57  ;;  %v7133_v63 = vld [vmem:[#allocation8 + $0xe50] sm:$0xf]  ;;  %4529 = vmatpush.bf16.msra.mxu0 %v7166_v0  ;;  %v8285_v57 = vadd.f32 %v4299_v50, %v4287_v33  ;;  %v5666_v60 = vor.u32 %v7525_v51, %v5663_v43  ;;  %4589 = vmatpush.bf16.msra.mxu3 %v6562_v41  ;;  %v5631_v0 = vld [vmem:[#allocation8 + $0x2b0] sm:$0xf0]  ;;  %v4325_v51 = vpop.f32.mrf.mxu0 }
 0x20d   :  { %v7897_v4 = vld [vmem:[#allocation8 + $0xe6c] sm:$0xf0]  ;;  %v6274_v1 = vor.u32 %v7677_v54, %v6271_v55  ;;  %v5634_v5 = vor.u32 %v7517_v62, %v5631_v0  ;;  %v7661_v22 = vld [vmem:[#allocation8 + $0x714] sm:$0xf] }
 0x20e   :  { %v6877_v6 = vld [vmem:[#allocation8 + $0xc50] sm:$0xf]  ;;  %4551 = vmatpush.bf16.msra.mxu1 %v5762_v58  ;;  %v7134_v20 = vor.u32 %v7897_v4, %v7133_v63  ;;  %4516 = vmatpush.bf16.msrb.mxu2 %v6910_v3  ;;  %v6015_v58 = vld [vmem:[#allocation8 + $0x5b0] sm:$0xf0]  ;;  %v4338_v0 = vpop.f32.mrf.mxu3 }
 0x20f   :  { %v7833_v7 = vld [vmem:[#allocation8 + $0xc6c] sm:$0xf0]  ;;  %v6018_v3 = vor.u32 %v7613_v21, %v6015_v58  ;;  %v7669_v63 = vld [vmem:[#allocation8 + $0x754] sm:$0xf] }
 0x210   :  { %v6845_v23 = vld [vmem:[#allocation8 + $0xc10] sm:$0xf]  ;;  %v6878_v26 = vor.u32 %v7833_v7, %v6877_v6  ;;  %4530 = vmatpush.bf16.msra.mxu0 %v7134_v20  ;;  %v6239_v4 = vld [vmem:[#allocation8 + $0x770] sm:$0xf0]  ;;  %4590 = vmatpush.bf16.msra.mxu3 %v6530_v61 }
 0x211   :  { %v7101_v24 = vld [vmem:[#allocation8 + $0xe10] sm:$0xf]  ;;  %v7605_v6 = vld [vmem:[#allocation8 + $0x554] sm:$0xf] }
 0x212   :  { %v7889_v27 = vld [vmem:[#allocation8 + $0xe2c] sm:$0xf0]  ;;  %4552 = vmatpush.bf16.msra.mxu1 %v5730_v14  ;;  %4517 = vmatpush.bf16.msrb.mxu2 %v6878_v26  ;;  %v5983_v7 = vld [vmem:[#allocation8 + $0x570] sm:$0xf0]  ;;  %v6242_v14 = vor.u32 %v7669_v63, %v6239_v4 }
 0x213   :  { %v7825_v56 = vld [vmem:[#allocation8 + $0xc2c] sm:$0xf0]  ;;  %v7102_v42 = vor.u32 %v7889_v27, %v7101_v24  ;;  %v5986_v20 = vor.u32 %v7605_v6, %v5983_v7  ;;  %v5602_v24 = vor.u32 %v7509_v12, %v5599_v13  ;;  %v7597_v25 = vld [vmem:[#allocation8 + $0x514] sm:$0xf]  ;;  %v6466_v27 = vor.u32 %v7725_v16, %v6463_v19  ;;  %v4312_v7 = vpop.f32.mrf.mxu2 }
 0x214   :  { %v6846_v45 = vor.u32 %v7825_v56, %v6845_v23  ;;  %v6207_v23 = vld [vmem:[#allocation8 + $0x730] sm:$0xf0]  ;;  %4591 = vmatpush.bf16.msra.mxu3 %v6498_v11  ;;  %v4004_v6 = vperm.slane %v8239_v59, 6  ;;  %v4313_v13 = vadd.f32 %v4312_v7, %v8285_v57  ;;  %v7498_v57 = vld [vmem:[#allocation8 + $0x1f4] sm:$0xf0] }
 0x215   :  { %4531 = vmatpush.bf16.msra.mxu0 %v7102_v42  ;;  %v5951_v26 = vld [vmem:[#allocation8 + $0x530] sm:$0xf0]  ;;  %v6210_v29 = vor.u32 %v7661_v22, %v6207_v23 }
 0x216   :  { %4553 = vmatpush.bf16.msra.mxu1 %v5698_v36  ;;  %4518 = vmatpush.bf16.msrb.mxu2 %v6846_v45  ;;  %v7501_v15 = vld [vmem:[#allocation8 + $0x214] sm:$0xf]  ;;  %v5954_v36 = vor.u32 %v7597_v25, %v5951_v26 }
 0x217   :  { %v5567_v28 = vld [vmem:[#allocation8 + $0x230] sm:$0xf0] }
 0x218   :  { %4532 = vmatmul.bf16.vlgmr.msra.gmra.mxu0 %v8224_v8  ;;  %v7717_v56 = vld [vmem:[#allocation8 + $0x8d4] sm:$0xf]  ;;  %v5570_v40 = vor.u32 %v7501_v15, %v5567_v28  ;;  %4592 = vmatpush.bf16.msra.mxu3 %v6466_v27  ;;  %v8293_v27 = vadd.f32 %v4325_v51, %v4313_v13  ;;  %v5541_v28 = vld [vmem:[#allocation8 + $0x1d8] sm:$0xf] }
 0x219   :  { %4576 = vmatpush.bf16.msrb.mxu0 %v6306_v53  ;;  %4519 = vmatmul.bf16.vlgmr.msrb.gmra.mxu2 %v8226_v17  ;;  %v6431_v32 = vld [vmem:[#allocation8 + $0x8f0] sm:$0xf0] }
 0x21a   :  { %4563 = vmatpush.bf16.msra.mxu2 %v6050_v34  ;;  %4554 = vmatpush.bf16.msra.mxu1 %v5666_v60  ;;  %v7813_v33 = vld [vmem:[#allocation8 + $0xbd4] sm:$0xf]  ;;  %v6434_v43 = vor.u32 %v7717_v56, %v6431_v32 }
 0x21b   :  { %v6815_v35 = vld [vmem:[#allocation8 + $0xbf0] sm:$0xf0] }
 0x21c   :  { %v7653_v37 = vld [vmem:[#allocation8 + $0x6d4] sm:$0xf]  ;;  %v6818_v45 = vor.u32 %v7813_v33, %v6815_v35  ;;  %4593 = vmatpush.bf16.msra.mxu3 %v6434_v43  ;;  %v4339_v43 = vadd.f32 %v4338_v0, %v4004_v6 }
 0x21d   :  { %4577 = vmatpush.bf16.msrb.mxu0 %v6274_v1  ;;  %v6175_v38 = vld [vmem:[#allocation8 + $0x6f0] sm:$0xf0] }
 0x21e   :  { %4564 = vmatpush.bf16.msra.mxu2 %v6018_v3  ;;  %4555 = vmatpush.bf16.msra.mxu1 %v5634_v5  ;;  %v7589_v42 = vld [vmem:[#allocation8 + $0x4d4] sm:$0xf]  ;;  %v6178_v46 = vor.u32 %v7653_v37, %v6175_v38  ;;  %v4340_v38 = vpop.f32.mrf.mxu3 }
 0x21f   :  { %v5919_v41 = vld [vmem:[#allocation8 + $0x4f0] sm:$0xf0] }
 0x220   :  { %v7709_v53 = vld [vmem:[#allocation8 + $0x894] sm:$0xf]  ;;  %v5922_v34 = vor.u32 %v7589_v42, %v5919_v41  ;;  %v5542_v42 = vor.u32 %v7498_v57, %v5541_v28 }
 0x221   :  { %4578 = vmatpush.bf16.msrb.mxu0 %v6242_v14  ;;  %v6399_v48 = vld [vmem:[#allocation8 + $0x8b0] sm:$0xf0]  ;;  %v4327_v14 = vpop.f32.mrf.mxu0 }
 0x222   :  { %4565 = vmatpush.bf16.msra.mxu2 %v5986_v20  ;;  %4556 = vmatpush.bf16.msra.mxu1 %v5602_v24  ;;  %v7805_v49 = vld [vmem:[#allocation8 + $0xb94] sm:$0xf]  ;;  %v6402_v58 = vor.u32 %v7709_v53, %v6399_v48  ;;  %v7490_v48 = vld [vmem:[#allocation8 + $0x1b4] sm:$0xf0] }
 0x223   :  { %v6783_v50 = vld [vmem:[#allocation8 + $0xbb0] sm:$0xf0] }
 0x224   :  { %v7645_v54 = vld [vmem:[#allocation8 + $0x694] sm:$0xf]  ;;  %v6786_v61 = vor.u32 %v7805_v49, %v6783_v50  ;;  %4594 = vmatpush.bf16.msra.mxu3 %v6402_v58  ;;  %v4314_v49 = vpop.f32.mrf.mxu2  ;;  %v4351_v50 = vpop.f32.mrf.mxu1 }
 0x225   :  { %4579 = vmatpush.bf16.msrb.mxu0 %v6210_v29  ;;  %v6143_v55 = vld [vmem:[#allocation8 + $0x6b0] sm:$0xf0]  ;;  %v5765_v49 = vld [vmem:[#allocation8 + $0x398] sm:$0xf] }
 0x226   :  { %4566 = vmatpush.bf16.msra.mxu2 %v5954_v36  ;;  %4557 = vmatpush.bf16.msra.mxu1 %v5570_v40  ;;  %v7581_v60 = vld [vmem:[#allocation8 + $0x494] sm:$0xf]  ;;  %v6146_v1 = vor.u32 %v7645_v54, %v6143_v55 }
 0x227   :  { %v5887_v21 = vld [vmem:[#allocation8 + $0x4b0] sm:$0xf0] }
 0x228   :  { %v7701_v62 = vld [vmem:[#allocation8 + $0x854] sm:$0xf]  ;;  %v5890_v63 = vor.u32 %v7581_v60, %v5887_v21  ;;  %v8295_v60 = vadd.f32 %v4351_v50, %v4339_v43  ;;  %v7554_v50 = vld [vmem:[#allocation8 + $0x3b4] sm:$0xf0] }
 0x229   :  { %4580 = vmatpush.bf16.msrb.mxu0 %v6178_v46  ;;  %v6367_v9 = vld [vmem:[#allocation8 + $0x870] sm:$0xf0]  ;;  %4558 = vmatmul.bf16.vlgmr.msra.gmra.mxu1 %v8200_v10  ;;  %v5509_v46 = vld [vmem:[#allocation8 + $0x198] sm:$0xf] }
 0x22a   :  { %4602 = vmatpush.bf16.msrb.mxu1 %v6818_v45  ;;  %v7797_v2 = vld [vmem:[#allocation8 + $0xb54] sm:$0xf]  ;;  %4567 = vmatpush.bf16.msra.mxu2 %v5922_v34  ;;  %v6370_v16 = vor.u32 %v7701_v62, %v6367_v9  ;;  %v5510_v62 = vor.u32 %v7490_v48, %v5509_v46  ;;  %v7458_v48 = vld [vmem:[#allocation8 + $0xb4] sm:$0xf0] }
 0x22b   :  { %v6751_v3 = vld [vmem:[#allocation8 + $0xb70] sm:$0xf0] }
 0x22c   :  { %v7637_v4 = vld [vmem:[#allocation8 + $0x654] sm:$0xf]  ;;  %v6754_v19 = vor.u32 %v7797_v2, %v6751_v3  ;;  %4595 = vmatpush.bf16.msra.mxu3 %v6370_v16  ;;  %v5477_v2 = vld [vmem:[#allocation8 + $0x158] sm:$0xf] }
 0x22d   :  { %v6111_v5 = vld [vmem:[#allocation8 + $0x670] sm:$0xf0]  ;;  %4581 = vmatpush.bf16.msrb.mxu0 %v6146_v1  ;;  %v7482_v3 = vld [vmem:[#allocation8 + $0x174] sm:$0xf0] }
 0x22e   :  { %v7573_v11 = vld [vmem:[#allocation8 + $0x454] sm:$0xf]  ;;  %4603 = vmatpush.bf16.msrb.mxu1 %v6786_v61  ;;  %v6114_v23 = vor.u32 %v7637_v4, %v6111_v5  ;;  %4568 = vmatpush.bf16.msra.mxu2 %v5890_v63 }
 0x22f   :  { %v5855_v12 = vld [vmem:[#allocation8 + $0x470] sm:$0xf0] }
 0x230   :  { %v7693_v31 = vld [vmem:[#allocation8 + $0x814] sm:$0xf]  ;;  %v5858_v59 = vor.u32 %v7573_v11, %v5855_v12  ;;  %v5478_v12 = vor.u32 %v7482_v3, %v5477_v2  ;;  %v7450_v2 = vld [vmem:[#allocation8 + $0x74] sm:$0xf0] }
 0x231   :  { %v6335_v20 = vld [vmem:[#allocation8 + $0x830] sm:$0xf0]  ;;  %4582 = vmatpush.bf16.msrb.mxu0 %v6114_v23  ;;  %v5733_v3 = vld [vmem:[#allocation8 + $0x358] sm:$0xf] }
 0x232   :  { %v7789_v22 = vld [vmem:[#allocation8 + $0xb14] sm:$0xf]  ;;  %4604 = vmatpush.bf16.msrb.mxu1 %v6754_v19  ;;  %v6338_v33 = vor.u32 %v7693_v31, %v6335_v20  ;;  %4569 = vmatpush.bf16.msra.mxu2 %v5858_v59  ;;  %v5445_v19 = vld [vmem:[#allocation8 + $0x118] sm:$0xf]  ;;  %v4353_v20 = vpop.f32.mrf.mxu1 }
 0x233   :  { %v6719_v24 = vld [vmem:[#allocation8 + $0xb30] sm:$0xf0]  ;;  %v7474_v31 = vld [vmem:[#allocation8 + $0x134] sm:$0xf0] }
 0x234   :  { %v7565_v25 = vld [vmem:[#allocation8 + $0x414] sm:$0xf]  ;;  %v6722_v35 = vor.u32 %v7789_v22, %v6719_v24  ;;  %4596 = vmatpush.bf16.msra.mxu3 %v6338_v33  ;;  %v5797_v33 = vld [vmem:[#allocation8 + $0x3d8] sm:$0xf] }
 0x235   :  { %v7629_v26 = vld [vmem:[#allocation8 + $0x614] sm:$0xf]  ;;  %v7442_v20 = vld [vmem:[#allocation8 + $0x34] sm:$0xf0] }
 0x236   :  { %v6079_v15 = vld [vmem:[#allocation8 + $0x630] sm:$0xf0]  ;;  %4605 = vmatpush.bf16.msrb.mxu1 %v6722_v35  ;;  %v7562_v35 = vld [vmem:[#allocation8 + $0x3f4] sm:$0xf0] }
 0x237   :  { %v5823_v56 = vld [vmem:[#allocation8 + $0x430] sm:$0xf0]  ;;  %v6082_v40 = vor.u32 %v7629_v26, %v6079_v15  ;;  %4597 = vmatmul.bf16.vlgmr.msra.gmra.mxu3 %v8214_v39  ;;  %v5446_v15 = vor.u32 %v7474_v31, %v5445_v19  ;;  %v5317_v31 = vld [vmem:[#allocation8 + $0x18] sm:$0xf] }
 0x238   :  { %v7941_v29 = vld [vmem:[#allocation8 + $0xfd4] sm:$0xf]  ;;  %v5826_v45 = vor.u32 %v7565_v25, %v5823_v56  ;;  %4641 = vmatpush.bf16.msrb.mxu3 %v5542_v42  ;;  %v5413_v56 = vld [vmem:[#allocation8 + $0xd8] sm:$0xf] }
 0x239   :  { %v7327_v32 = vld [vmem:[#allocation8 + $0xff0] sm:$0xf0]  ;;  %4583 = vmatpush.bf16.msrb.mxu0 %v6082_v40 }
 0x23a   :  { %v7877_v36 = vld [vmem:[#allocation8 + $0xdd4] sm:$0xf]  ;;  %v7330_v53 = vor.u32 %v7941_v29, %v7327_v32  ;;  %4570 = vmatpush.bf16.msra.mxu2 %v5826_v45  ;;  %v7466_v32 = vld [vmem:[#allocation8 + $0xf4] sm:$0xf0]  ;;  %v5798_v45 = vor.u32 %v7562_v35, %v5797_v33  ;;  %v5318_v35 = vor.u32 %v7442_v20, %v5317_v31 }
 0x23b   :  { %v7071_v37 = vld [vmem:[#allocation8 + $0xdf0] sm:$0xf0]  ;;  %v5414_v43 = vor.u32 %v7466_v32, %v5413_v56  ;;  %v7754_v56 = vld [vmem:[#allocation8 + $0x9f4] sm:$0xf0] }
 0x23c   :  { %v7781_v41 = vld [vmem:[#allocation8 + $0xad4] sm:$0xf]  ;;  %v7074_v34 = vor.u32 %v7877_v36, %v7071_v37  ;;  %4584 = vmatmul.bf16.vlgmr.msrb.gmra.mxu0 %v8211_v52  ;;  %4642 = vmatpush.bf16.msrb.mxu3 %v5510_v62  ;;  %v5766_v62 = vor.u32 %v7554_v50, %v5765_v49  ;;  %v7690_v32 = vld [vmem:[#allocation8 + $0x7f4] sm:$0xf0]  ;;  %v4403_v50 = vpop.f32.mrf.mxu1 }
 0x23d   :  { %v6687_v51 = vld [vmem:[#allocation8 + $0xaf0] sm:$0xf0]  ;;  %4628 = vmatpush.bf16.msra.mxu0 %v7330_v53  ;;  %4571 = vmatmul.bf16.vlgmr.msra.gmra.mxu2 %v8203_v30  ;;  %v5381_v53 = vld [vmem:[#allocation8 + $0x98] sm:$0xf] }
 0x23e   :  { %v7933_v54 = vld [vmem:[#allocation8 + $0xf94] sm:$0xf]  ;;  %v6690_v21 = vor.u32 %v7781_v41, %v6687_v51  ;;  %4615 = vmatpush.bf16.msrb.mxu2 %v7074_v34  ;;  %v4377_v51 = vpop.f32.mrf.mxu0  ;;  %v6469_v31 = vld [vmem:[#allocation8 + $0x918] sm:$0xf] }
 0x23f   :  { %v7295_v55 = vld [vmem:[#allocation8 + $0xfb0] sm:$0xf0]  ;;  %v7730_v20 = vld [vmem:[#allocation8 + $0x934] sm:$0xf0] }
 0x240   :  { %v7869_v58 = vld [vmem:[#allocation8 + $0xd94] sm:$0xf]  ;;  %v7298_v9 = vor.u32 %v7933_v54, %v7295_v55  ;;  %4606 = vmatpush.bf16.msrb.mxu1 %v6690_v21  ;;  %4643 = vmatpush.bf16.msrb.mxu3 %v5478_v12 }
 0x241   :  { %v7039_v61 = vld [vmem:[#allocation8 + $0xdb0] sm:$0xf0] }
 0x242   :  { %v7773_v0 = vld [vmem:[#allocation8 + $0xa94] sm:$0xf]  ;;  %v7042_v63 = vor.u32 %v7869_v58, %v7039_v61  ;;  %4629 = vmatpush.bf16.msra.mxu0 %v7298_v9  ;;  %v5382_v61 = vor.u32 %v7458_v48, %v5381_v53  ;;  %v7746_v48 = vld [vmem:[#allocation8 + $0x9b4] sm:$0xf0] }
 0x243   :  { %v6655_v1 = vld [vmem:[#allocation8 + $0xab0] sm:$0xf0] }
 0x244   :  { %v7925_v4 = vld [vmem:[#allocation8 + $0xf54] sm:$0xf]  ;;  %v6658_v6 = vor.u32 %v7773_v0, %v6655_v1  ;;  %4616 = vmatpush.bf16.msrb.mxu2 %v7042_v63  ;;  %4644 = vmatpush.bf16.msrb.mxu3 %v5446_v15  ;;  %v5349_v0 = vld [vmem:[#allocation8 + $0x58] sm:$0xf]  ;;  %v4390_v1 = vpop.f32.mrf.mxu3 }
 0x245   :  { %v7263_v5 = vld [vmem:[#allocation8 + $0xf70] sm:$0xf0]  ;;  %v7546_v63 = vld [vmem:[#allocation8 + $0x374] sm:$0xf0] }
 0x246   :  { %v7861_v7 = vld [vmem:[#allocation8 + $0xd54] sm:$0xf]  ;;  %v7266_v16 = vor.u32 %v7925_v4, %v7263_v5  ;;  %4607 = vmatpush.bf16.msrb.mxu1 %v6658_v6  ;;  %v5734_v19 = vor.u32 %v7546_v63, %v5733_v3  ;;  %v6501_v3 = vld [vmem:[#allocation8 + $0x958] sm:$0xf] }
 0x247   :  { %v7007_v11 = vld [vmem:[#allocation8 + $0xd70] sm:$0xf0]  ;;  %v7738_v63 = vld [vmem:[#allocation8 + $0x974] sm:$0xf0] }
 0x248   :  { %v7765_v13 = vld [vmem:[#allocation8 + $0xa54] sm:$0xf]  ;;  %v7010_v22 = vor.u32 %v7861_v7, %v7007_v11  ;;  %4630 = vmatpush.bf16.msra.mxu0 %v7266_v16  ;;  %4645 = vmatpush.bf16.msrb.mxu3 %v5414_v43  ;;  %v4364_v7 = vpop.f32.mrf.mxu2  ;;  %v5350_v16 = vor.u32 %v7450_v2, %v5349_v0  ;;  %v7530_v43 = vld [vmem:[#allocation8 + $0x2f4] sm:$0xf0] }
 0x249   :  { %v6623_v14 = vld [vmem:[#allocation8 + $0xa70] sm:$0xf0] }
 0x24a   :  { %v7917_v23 = vld [vmem:[#allocation8 + $0xf14] sm:$0xf]  ;;  %v6626_v25 = vor.u32 %v7765_v13, %v6623_v14  ;;  %4617 = vmatpush.bf16.msrb.mxu2 %v7010_v22  ;;  %v4365_v13 = vadd.f32 %v4364_v7, %v8295_v60  ;;  %v4379_v14 = vpop.f32.mrf.mxu0  ;;  %v5701_v22 = vld [vmem:[#allocation8 + $0x318] sm:$0xf] }
 0x24b   :  { %v7231_v24 = vld [vmem:[#allocation8 + $0xf30] sm:$0xf0]  ;;  %v5605_v14 = vld [vmem:[#allocation8 + $0x258] sm:$0xf] }
 0x24c   :  { %v7853_v26 = vld [vmem:[#allocation8 + $0xd14] sm:$0xf]  ;;  %v7234_v29 = vor.u32 %v7917_v23, %v7231_v24  ;;  %4608 = vmatpush.bf16.msrb.mxu1 %v6626_v25  ;;  %4646 = vmatpush.bf16.msrb.mxu3 %v5382_v61  ;;  %v7538_v24 = vld [vmem:[#allocation8 + $0x334] sm:$0xf0] }
 0x24d   :  { %v6975_v59 = vld [vmem:[#allocation8 + $0xd30] sm:$0xf0]  ;;  %v6021_v61 = vld [vmem:[#allocation8 + $0x598] sm:$0xf] }
 0x24e   :  { %v7757_v28 = vld [vmem:[#allocation8 + $0xa14] sm:$0xf]  ;;  %v6978_v36 = vor.u32 %v7853_v26, %v6975_v59  ;;  %4631 = vmatpush.bf16.msra.mxu0 %v7234_v29  ;;  %v4378_v59 = vadd.f32 %v4377_v51, %v4365_v13  ;;  %v6309_v29 = vld [vmem:[#allocation8 + $0x7d8] sm:$0xf]  ;;  %v6502_v13 = vor.u32 %v7738_v63, %v6501_v3 }
 0x24f   :  { %v6591_v57 = vld [vmem:[#allocation8 + $0xa30] sm:$0xf0]  ;;  %v5669_v51 = vld [vmem:[#allocation8 + $0x2d8] sm:$0xf]  ;;  %v6310_v53 = vor.u32 %v7690_v32, %v6309_v29 }
 0x250   :  { %v7909_v37 = vld [vmem:[#allocation8 + $0xed4] sm:$0xf]  ;;  %v6594_v40 = vor.u32 %v7757_v28, %v6591_v57  ;;  %4618 = vmatpush.bf16.msrb.mxu2 %v6978_v36  ;;  %v6565_v57 = vld [vmem:[#allocation8 + $0x9d8] sm:$0xf]  ;;  %4647 = vmatpush.bf16.msrb.mxu3 %v5350_v16  ;;  %v4391_v33 = vadd.f32 %v4390_v1, %v4378_v59  ;;  %v5702_v36 = vor.u32 %v7538_v24, %v5701_v22  ;;  %v4366_v49 = vpop.f32.mrf.mxu2  ;;  %v4405_v22 = vpop.f32.mrf.mxu1 }
 0x251   :  { %v7199_v38 = vld [vmem:[#allocation8 + $0xef0] sm:$0xf0]  ;;  %v5637_v1 = vld [vmem:[#allocation8 + $0x298] sm:$0xf] }
 0x252   :  { %v7845_v42 = vld [vmem:[#allocation8 + $0xcd4] sm:$0xf]  ;;  %v7202_v46 = vor.u32 %v7909_v37, %v7199_v38  ;;  %4609 = vmatpush.bf16.msrb.mxu1 %v6594_v40  ;;  %v6053_v37 = vld [vmem:[#allocation8 + $0x5d8] sm:$0xf]  ;;  %v4392_v40 = vpop.f32.mrf.mxu3 }
 0x253   :  { %v6943_v41 = vld [vmem:[#allocation8 + $0xcf0] sm:$0xf0]  ;;  %v7626_v38 = vld [vmem:[#allocation8 + $0x5f4] sm:$0xf0] }
 0x254   :  { %v6946_v34 = vor.u32 %v7845_v42, %v6943_v41  ;;  %v7901_v54 = vld [vmem:[#allocation8 + $0xe94] sm:$0xf]  ;;  %4632 = vmatpush.bf16.msra.mxu0 %v7202_v46  ;;  %v6566_v41 = vor.u32 %v7754_v56, %v6565_v57  ;;  %v6533_v46 = vld [vmem:[#allocation8 + $0x998] sm:$0xf]  ;;  %4648 = vmatpush.bf16.msrb.mxu3 %v5318_v35 }
 0x255   :  { %v7167_v55 = vld [vmem:[#allocation8 + $0xeb0] sm:$0xf0]  ;;  %4610 = vmatmul.bf16.vlgmr.msrb.gmra.mxu1 %v8218_v18  ;;  %v6534_v0 = vor.u32 %v7746_v48, %v6533_v46  ;;  %v7514_v16 = vld [vmem:[#allocation8 + $0x274] sm:$0xf0] }
 0x256   :  { %v7837_v21 = vld [vmem:[#allocation8 + $0xc94] sm:$0xf]  ;;  %4654 = vmatpush.bf16.msra.mxu1 %v5798_v45  ;;  %v7170_v9 = vor.u32 %v7901_v54, %v7167_v55  ;;  %4619 = vmatpush.bf16.msrb.mxu2 %v6946_v34  ;;  %v6054_v34 = vor.u32 %v7626_v38, %v6053_v37  ;;  %v6277_v54 = vld [vmem:[#allocation8 + $0x798] sm:$0xf] }
 0x257   :  { %v6911_v58 = vld [vmem:[#allocation8 + $0xcb0] sm:$0xf0]  ;;  %v7682_v55 = vld [vmem:[#allocation8 + $0x7b4] sm:$0xf0]  ;;  %4649 = vmatmul.bf16.vlgmr.msrb.gmra.mxu3 %v8196_v47 }
 0x258   :  { %v6914_v4 = vor.u32 %v7837_v21, %v6911_v58  ;;  %v7893_v5 = vld [vmem:[#allocation8 + $0xe54] sm:$0xf]  ;;  %4633 = vmatpush.bf16.msra.mxu0 %v7170_v9  ;;  %v8302_v21 = vadd.f32 %v4403_v50, %v4391_v33  ;;  %v5670_v58 = vor.u32 %v7530_v43, %v5669_v51  ;;  %4693 = vmatpush.bf16.msra.mxu3 %v6566_v41  ;;  %v7522_v9 = vld [vmem:[#allocation8 + $0x2b4] sm:$0xf0]  ;;  %v4429_v51 = vpop.f32.mrf.mxu0 }
 0x259   :  { %v7135_v6 = vld [vmem:[#allocation8 + $0xe70] sm:$0xf0]  ;;  %v6278_v2 = vor.u32 %v7682_v55, %v6277_v54  ;;  %v5638_v7 = vor.u32 %v7522_v9, %v5637_v1  ;;  %v6213_v24 = vld [vmem:[#allocation8 + $0x718] sm:$0xf] }
 0x25a   :  { %v7829_v11 = vld [vmem:[#allocation8 + $0xc54] sm:$0xf]  ;;  %4655 = vmatpush.bf16.msra.mxu1 %v5766_v62  ;;  %v7138_v23 = vor.u32 %v7893_v5, %v7135_v6  ;;  %4620 = vmatpush.bf16.msrb.mxu2 %v6914_v4  ;;  %v7618_v62 = vld [vmem:[#allocation8 + $0x5b4] sm:$0xf0]  ;;  %v4442_v3 = vpop.f32.mrf.mxu3 }
 0x25b   :  { %v6879_v12 = vld [vmem:[#allocation8 + $0xc70] sm:$0xf0]  ;;  %v6022_v4 = vor.u32 %v7618_v62, %v6021_v61  ;;  %v6245_v5 = vld [vmem:[#allocation8 + $0x758] sm:$0xf] }
 0x25c   :  { %v7821_v25 = vld [vmem:[#allocation8 + $0xc14] sm:$0xf]  ;;  %v6882_v15 = vor.u32 %v7829_v11, %v6879_v12  ;;  %4634 = vmatpush.bf16.msra.mxu0 %v7138_v23  ;;  %v7674_v6 = vld [vmem:[#allocation8 + $0x774] sm:$0xf0]  ;;  %4694 = vmatpush.bf16.msra.mxu3 %v6534_v0 }
 0x25d   :  { %v7885_v26 = vld [vmem:[#allocation8 + $0xe14] sm:$0xf]  ;;  %v5989_v11 = vld [vmem:[#allocation8 + $0x558] sm:$0xf] }
 0x25e   :  { %v7103_v28 = vld [vmem:[#allocation8 + $0xe30] sm:$0xf0]  ;;  %4656 = vmatpush.bf16.msra.mxu1 %v5734_v19  ;;  %4621 = vmatpush.bf16.msrb.mxu2 %v6882_v15  ;;  %v7610_v12 = vld [vmem:[#allocation8 + $0x574] sm:$0xf0]  ;;  %v6246_v19 = vor.u32 %v7674_v6, %v6245_v5 }
 0x25f   :  { %v6847_v60 = vld [vmem:[#allocation8 + $0xc30] sm:$0xf0]  ;;  %v7106_v42 = vor.u32 %v7885_v26, %v7103_v28  ;;  %v5990_v23 = vor.u32 %v7610_v12, %v5989_v11  ;;  %v5606_v26 = vor.u32 %v7514_v16, %v5605_v14  ;;  %v5957_v59 = vld [vmem:[#allocation8 + $0x518] sm:$0xf]  ;;  %v6470_v28 = vor.u32 %v7730_v20, %v6469_v31  ;;  %v4416_v16 = vpop.f32.mrf.mxu2 }
 0x260   :  { %v6850_v45 = vor.u32 %v7821_v25, %v6847_v60  ;;  %v7666_v25 = vld [vmem:[#allocation8 + $0x734] sm:$0xf0]  ;;  %4695 = vmatpush.bf16.msra.mxu3 %v6502_v13  ;;  %v4417_v20 = vadd.f32 %v4416_v16, %v8302_v21  ;;  %v4431_v22 = vpop.f32.mrf.mxu0 }
 0x261   :  { %4635 = vmatpush.bf16.msra.mxu0 %v7106_v42  ;;  %v7602_v15 = vld [vmem:[#allocation8 + $0x534] sm:$0xf0]  ;;  %v6214_v29 = vor.u32 %v7666_v25, %v6213_v24 }
 0x262   :  { %4657 = vmatpush.bf16.msra.mxu1 %v5702_v36  ;;  %4622 = vmatpush.bf16.msrb.mxu2 %v6850_v45  ;;  %v5573_v57 = vld [vmem:[#allocation8 + $0x218] sm:$0xf]  ;;  %v5958_v36 = vor.u32 %v7602_v15, %v5957_v59 }
 0x263   :  { %v7506_v56 = vld [vmem:[#allocation8 + $0x234] sm:$0xf0] }
 0x264   :  { %4636 = vmatmul.bf16.vlgmr.msra.gmra.mxu0 %v8224_v8  ;;  %v6437_v60 = vld [vmem:[#allocation8 + $0x8d8] sm:$0xf]  ;;  %v5574_v40 = vor.u32 %v7506_v56, %v5573_v57  ;;  %4696 = vmatpush.bf16.msra.mxu3 %v6470_v28  ;;  %v4430_v56 = vadd.f32 %v4429_v51, %v4417_v20 }
 0x265   :  { %4680 = vmatpush.bf16.msrb.mxu0 %v6310_v53  ;;  %4623 = vmatmul.bf16.vlgmr.msrb.gmra.mxu2 %v8226_v17  ;;  %v7722_v32 = vld [vmem:[#allocation8 + $0x8f4] sm:$0xf0] }
 0x266   :  { %4667 = vmatpush.bf16.msra.mxu2 %v6054_v34  ;;  %4658 = vmatpush.bf16.msra.mxu1 %v5670_v58  ;;  %v6821_v33 = vld [vmem:[#allocation8 + $0xbd8] sm:$0xf]  ;;  %v6438_v43 = vor.u32 %v7722_v32, %v6437_v60  ;;  %v7955_v58 = vld [vmem:[#allocation10] sm:$0xff]  ;;  %v7494_v32 = vld [vmem:[#allocation8 + $0x1dc] sm:$0xf] }
 0x267   :  { %v7818_v35 = vld [vmem:[#allocation8 + $0xbf4] sm:$0xf0]  ;;  %v8307_v61 = vunpack.c.h.bf16 %v7955_v58  ;;  %v4418_v58 = vpop.f32.mrf.mxu2 }
 0x268   :  { %v6181_v37 = vld [vmem:[#allocation8 + $0x6d8] sm:$0xf]  ;;  %v6822_v45 = vor.u32 %v7818_v35, %v6821_v33  ;;  %4697 = vmatpush.bf16.msra.mxu3 %v6438_v43  ;;  %v5543_v33 = vld [vmem:[#allocation8 + $0x1f8] sm:$0xf0]  ;;  %v4444_v43 = vpop.f32.mrf.mxu3 }
 0x269   :  { %4681 = vmatpush.bf16.msrb.mxu0 %v6278_v2  ;;  %v7658_v38 = vld [vmem:[#allocation8 + $0x6f4] sm:$0xf0]  ;;  %v4005_v14 = vperm.slane %v8307_v61, 0  ;;  %v5546_v51 = vor.u32 %v7494_v32, %v5543_v33  ;;  %v7550_v58 = vld [vmem:[#allocation8 + $0x39c] sm:$0xf] }
 0x26a   :  { %4668 = vmatpush.bf16.msra.mxu2 %v6022_v4  ;;  %4659 = vmatpush.bf16.msra.mxu1 %v5638_v7  ;;  %v5925_v42 = vld [vmem:[#allocation8 + $0x4d8] sm:$0xf]  ;;  %v6182_v46 = vor.u32 %v7658_v38, %v6181_v37  ;;  %v4858_v7 = vrot.slane %v8293_v27, 6  ;;  %v4859_v37 = vrot.slane %v4430_v56, 5 }
 0x26b   :  { %v7594_v41 = vld [vmem:[#allocation8 + $0x4f4] sm:$0xf0] }
 0x26c   :  { %v6405_v53 = vld [vmem:[#allocation8 + $0x898] sm:$0xf]  ;;  %v5926_v34 = vor.u32 %v7594_v41, %v5925_v42 }
 0x26d   :  { %4682 = vmatpush.bf16.msrb.mxu0 %v6246_v19  ;;  %v7714_v48 = vld [vmem:[#allocation8 + $0x8b4] sm:$0xf0] }
 0x26e   :  { %4669 = vmatpush.bf16.msra.mxu2 %v5990_v23  ;;  %4660 = vmatpush.bf16.msra.mxu1 %v5606_v26  ;;  %v6789_v49 = vld [vmem:[#allocation8 + $0xb98] sm:$0xf]  ;;  %v6406_v1 = vor.u32 %v7714_v48, %v6405_v53  ;;  %v4443_v48 = vadd.f32 %v4442_v3, %v4005_v14  ;;  %v5479_v14 = vld [vmem:[#allocation8 + $0x178] sm:$0xf0] }
 0x26f   :  { %v7810_v50 = vld [vmem:[#allocation8 + $0xbb4] sm:$0xf0] }
 0x270   :  { %v6149_v54 = vld [vmem:[#allocation8 + $0x698] sm:$0xf]  ;;  %v6790_v9 = vor.u32 %v7810_v50, %v6789_v49  ;;  %4698 = vmatpush.bf16.msra.mxu3 %v6406_v1  ;;  %v4867_v49 = vsel %vm4866_vm2, %v4858_v7, %v4859_v37 }
 0x271   :  { %4683 = vmatpush.bf16.msrb.mxu0 %v6214_v29  ;;  %v7650_v55 = vld [vmem:[#allocation8 + $0x6b4] sm:$0xf0] }
 0x272   :  { %4670 = vmatpush.bf16.msra.mxu2 %v5958_v36  ;;  %4661 = vmatpush.bf16.msra.mxu1 %v5574_v40  ;;  %v5893_v62 = vld [vmem:[#allocation8 + $0x498] sm:$0xf]  ;;  %v6150_v63 = vor.u32 %v7650_v55, %v6149_v54  ;;  %v7486_v54 = vld [vmem:[#allocation8 + $0x19c] sm:$0xf] }
 0x273   :  { %v7586_v0 = vld [vmem:[#allocation8 + $0x4b4] sm:$0xf0]  ;;  %v5511_v55 = vld [vmem:[#allocation8 + $0x1b8] sm:$0xf0] }
 0x274   :  { %v6373_v2 = vld [vmem:[#allocation8 + $0x858] sm:$0xf]  ;;  %v5894_v11 = vor.u32 %v7586_v0, %v5893_v62  ;;  %v4455_v62 = vpop.f32.mrf.mxu1 }
 0x275   :  { %4684 = vmatpush.bf16.msrb.mxu0 %v6182_v46  ;;  %v7706_v4 = vld [vmem:[#allocation8 + $0x874] sm:$0xf0]  ;;  %4662 = vmatmul.bf16.vlgmr.msra.gmra.mxu1 %v8200_v10 }
 0x276   :  { %4706 = vmatpush.bf16.msrb.mxu1 %v6822_v45  ;;  %v6757_v5 = vld [vmem:[#allocation8 + $0xb58] sm:$0xf]  ;;  %4671 = vmatpush.bf16.msra.mxu2 %v5926_v34  ;;  %v6374_v23 = vor.u32 %v7706_v4, %v6373_v2  ;;  %v8316_v2 = vsel %vm4868_vm3, %v8276_v44, %v4867_v49 }
 0x277   :  { %v7802_v6 = vld [vmem:[#allocation8 + $0xb74] sm:$0xf0] }
 0x278   :  { %v6117_v12 = vld [vmem:[#allocation8 + $0x658] sm:$0xf]  ;;  %v6758_v24 = vor.u32 %v7802_v6, %v6757_v5  ;;  %4699 = vmatpush.bf16.msra.mxu3 %v6374_v23  ;;  %v5514_v6 = vor.u32 %v7486_v54, %v5511_v55  ;;  %v5383_v55 = vld [vmem:[#allocation8 + $0xb8] sm:$0xf0] }
 0x279   :  { %v7642_v13 = vld [vmem:[#allocation8 + $0x674] sm:$0xf0]  ;;  %4685 = vmatpush.bf16.msrb.mxu0 %v6150_v63  ;;  %v8318_v63 = vadd.f32 %v4455_v62, %v4443_v48  ;;  %v4481_v48 = vpop.f32.mrf.mxu0  ;;  %v5767_v62 = vld [vmem:[#allocation8 + $0x3b8] sm:$0xf0] }
 0x27a   :  { %v5861_v19 = vld [vmem:[#allocation8 + $0x458] sm:$0xf]  ;;  %4707 = vmatpush.bf16.msrb.mxu1 %v6790_v9  ;;  %v6118_v59 = vor.u32 %v7642_v13, %v6117_v12  ;;  %4672 = vmatpush.bf16.msra.mxu2 %v5894_v11  ;;  %v7478_v13 = vld [vmem:[#allocation8 + $0x15c] sm:$0xf] }
 0x27b   :  { %v7578_v31 = vld [vmem:[#allocation8 + $0x474] sm:$0xf0]  ;;  %v5482_v23 = vor.u32 %v7478_v13, %v5479_v14  ;;  %v5351_v13 = vld [vmem:[#allocation8 + $0x78] sm:$0xf0] }
 0x27c   :  { %v6341_v27 = vld [vmem:[#allocation8 + $0x818] sm:$0xf]  ;;  %v5862_v60 = vor.u32 %v7578_v31, %v5861_v19  ;;  %v7542_v14 = vld [vmem:[#allocation8 + $0x35c] sm:$0xf] }
 0x27d   :  { %v7698_v25 = vld [vmem:[#allocation8 + $0x834] sm:$0xf0]  ;;  %4686 = vmatpush.bf16.msrb.mxu0 %v6118_v59  ;;  %v5447_v59 = vld [vmem:[#allocation8 + $0x138] sm:$0xf0] }
 0x27e   :  { %v6725_v26 = vld [vmem:[#allocation8 + $0xb18] sm:$0xf]  ;;  %4708 = vmatpush.bf16.msrb.mxu1 %v6758_v24  ;;  %v6342_v38 = vor.u32 %v7698_v25, %v6341_v27  ;;  %4673 = vmatpush.bf16.msra.mxu2 %v5862_v60 }
 0x27f   :  { %v7794_v15 = vld [vmem:[#allocation8 + $0xb34] sm:$0xf0] }
 0x280   :  { %v5829_v28 = vld [vmem:[#allocation8 + $0x418] sm:$0xf]  ;;  %v6726_v40 = vor.u32 %v7794_v15, %v6725_v26  ;;  %4700 = vmatpush.bf16.msra.mxu3 %v6342_v38  ;;  %v7470_v26 = vld [vmem:[#allocation8 + $0x11c] sm:$0xf]  ;;  %v4457_v15 = vpop.f32.mrf.mxu1 }
 0x281   :  { %v6085_v57 = vld [vmem:[#allocation8 + $0x618] sm:$0xf]  ;;  %v5450_v33 = vor.u32 %v7470_v26, %v5447_v59  ;;  %v5415_v38 = vld [vmem:[#allocation8 + $0xf8] sm:$0xf0] }
 0x282   :  { %v7634_v29 = vld [vmem:[#allocation8 + $0x634] sm:$0xf0]  ;;  %4709 = vmatpush.bf16.msrb.mxu1 %v6726_v40  ;;  %v7558_v40 = vld [vmem:[#allocation8 + $0x3dc] sm:$0xf] }
 0x283   :  { %v7570_v21 = vld [vmem:[#allocation8 + $0x434] sm:$0xf0]  ;;  %v6086_v45 = vor.u32 %v7634_v29, %v6085_v57  ;;  %4701 = vmatmul.bf16.vlgmr.msra.gmra.mxu3 %v8214_v39  ;;  %v7438_v59 = vld [vmem:[#allocation8 + $0x1c] sm:$0xf] }
 0x284   :  { %v7333_v35 = vld [vmem:[#allocation8 + $0xfd8] sm:$0xf]  ;;  %v5830_v50 = vor.u32 %v7570_v21, %v5829_v28  ;;  %4745 = vmatpush.bf16.msrb.mxu3 %v5546_v51  ;;  %v5319_v15 = vld [vmem:[#allocation8 + $0x38] sm:$0xf0] }
 0x285   :  { %v7946_v36 = vld [vmem:[#allocation8 + $0xff4] sm:$0xf0]  ;;  %4687 = vmatpush.bf16.msrb.mxu0 %v6086_v45 }
 0x286   :  { %v7077_v42 = vld [vmem:[#allocation8 + $0xdd8] sm:$0xf]  ;;  %v7334_v34 = vor.u32 %v7946_v36, %v7333_v35  ;;  %4674 = vmatpush.bf16.msra.mxu2 %v5830_v50  ;;  %v7462_v36 = vld [vmem:[#allocation8 + $0xdc] sm:$0xf] }
 0x287   :  { %v7882_v41 = vld [vmem:[#allocation8 + $0xdf4] sm:$0xf0]  ;;  %v5418_v49 = vor.u32 %v7462_v36, %v5415_v38  ;;  %v6567_v36 = vld [vmem:[#allocation8 + $0x9f8] sm:$0xf0] }
 0x288   :  { %v6693_v53 = vld [vmem:[#allocation8 + $0xad8] sm:$0xf]  ;;  %v7078_v0 = vor.u32 %v7882_v41, %v7077_v42  ;;  %4688 = vmatmul.bf16.vlgmr.msrb.gmra.mxu0 %v8211_v52  ;;  %4746 = vmatpush.bf16.msrb.mxu3 %v5514_v6  ;;  %v5799_v42 = vld [vmem:[#allocation8 + $0x3f8] sm:$0xf0]  ;;  %v5770_v6 = vor.u32 %v7550_v58, %v5767_v62  ;;  %v4507_v62 = vpop.f32.mrf.mxu1 }
 0x289   :  { %v7786_v46 = vld [vmem:[#allocation8 + $0xaf4] sm:$0xf0]  ;;  %4732 = vmatpush.bf16.msra.mxu0 %v7334_v34  ;;  %4675 = vmatmul.bf16.vlgmr.msra.gmra.mxu2 %v8203_v30  ;;  %v5802_v50 = vor.u32 %v7558_v40, %v5799_v42  ;;  %v7454_v34 = vld [vmem:[#allocation8 + $0x9c] sm:$0xf]  ;;  %v5322_v42 = vor.u32 %v7438_v59, %v5319_v15 }
 0x28a   :  { %v7301_v1 = vld [vmem:[#allocation8 + $0xf98] sm:$0xf]  ;;  %v6694_v3 = vor.u32 %v7786_v46, %v6693_v53  ;;  %4719 = vmatpush.bf16.msrb.mxu2 %v7078_v0  ;;  %v6311_v38 = vld [vmem:[#allocation8 + $0x7f8] sm:$0xf0] }
 0x28b   :  { %v7938_v9 = vld [vmem:[#allocation8 + $0xfb4] sm:$0xf0]  ;;  %v7726_v59 = vld [vmem:[#allocation8 + $0x91c] sm:$0xf] }
 0x28c   :  { %v7045_v4 = vld [vmem:[#allocation8 + $0xd98] sm:$0xf]  ;;  %v7302_v12 = vor.u32 %v7938_v9, %v7301_v1  ;;  %4710 = vmatpush.bf16.msrb.mxu1 %v6694_v3  ;;  %4747 = vmatpush.bf16.msrb.mxu3 %v5482_v23  ;;  %v6471_v15 = vld [vmem:[#allocation8 + $0x938] sm:$0xf0] }
 0x28d   :  { %v7874_v5 = vld [vmem:[#allocation8 + $0xdb4] sm:$0xf0] }
 0x28e   :  { %v6661_v7 = vld [vmem:[#allocation8 + $0xa98] sm:$0xf]  ;;  %v7046_v44 = vor.u32 %v7874_v5, %v7045_v4  ;;  %4733 = vmatpush.bf16.msra.mxu0 %v7302_v12  ;;  %v5386_v5 = vor.u32 %v7454_v34, %v5383_v55  ;;  %v6535_v55 = vld [vmem:[#allocation8 + $0x9b8] sm:$0xf0] }
 0x28f   :  { %v7778_v11 = vld [vmem:[#allocation8 + $0xab4] sm:$0xf0] }
 0x290   :  { %v7269_v16 = vld [vmem:[#allocation8 + $0xf58] sm:$0xf]  ;;  %v6662_v31 = vor.u32 %v7778_v11, %v6661_v7  ;;  %4720 = vmatpush.bf16.msrb.mxu2 %v7046_v44  ;;  %4748 = vmatpush.bf16.msrb.mxu3 %v5450_v33  ;;  %v7446_v7 = vld [vmem:[#allocation8 + $0x5c] sm:$0xf]  ;;  %v4494_v11 = vpop.f32.mrf.mxu3 }
 0x291   :  { %v7930_v19 = vld [vmem:[#allocation8 + $0xf74] sm:$0xf0]  ;;  %v5735_v44 = vld [vmem:[#allocation8 + $0x378] sm:$0xf0] }
 0x292   :  { %v7013_v20 = vld [vmem:[#allocation8 + $0xd58] sm:$0xf]  ;;  %v7270_v25 = vor.u32 %v7930_v19, %v7269_v16  ;;  %4711 = vmatpush.bf16.msrb.mxu1 %v6662_v31  ;;  %v5738_v26 = vor.u32 %v7542_v14, %v5735_v44  ;;  %v7734_v14 = vld [vmem:[#allocation8 + $0x95c] sm:$0xf] }
 0x293   :  { %v7866_v22 = vld [vmem:[#allocation8 + $0xd74] sm:$0xf0]  ;;  %v6503_v44 = vld [vmem:[#allocation8 + $0x978] sm:$0xf0] }
 0x294   :  { %v6629_v24 = vld [vmem:[#allocation8 + $0xa58] sm:$0xf]  ;;  %v7014_v28 = vor.u32 %v7866_v22, %v7013_v20  ;;  %4734 = vmatpush.bf16.msra.mxu0 %v7270_v25  ;;  %4749 = vmatpush.bf16.msrb.mxu3 %v5418_v49  ;;  %v4468_v20 = vpop.f32.mrf.mxu2  ;;  %v5354_v25 = vor.u32 %v7446_v7, %v5351_v13  ;;  %v5671_v49 = vld [vmem:[#allocation8 + $0x2f8] sm:$0xf0] }
 0x295   :  { %v7770_v27 = vld [vmem:[#allocation8 + $0xa74] sm:$0xf0] }
 0x296   :  { %v7237_v57 = vld [vmem:[#allocation8 + $0xf18] sm:$0xf]  ;;  %v6630_v60 = vor.u32 %v7770_v27, %v6629_v24  ;;  %4721 = vmatpush.bf16.msrb.mxu2 %v7014_v28  ;;  %v4469_v24 = vadd.f32 %v4468_v20, %v8318_v63  ;;  %v4483_v27 = vpop.f32.mrf.mxu0  ;;  %v7534_v28 = vld [vmem:[#allocation8 + $0x31c] sm:$0xf] }
 0x297   :  { %v7922_v56 = vld [vmem:[#allocation8 + $0xf34] sm:$0xf0]  ;;  %v7510_v27 = vld [vmem:[#allocation8 + $0x25c] sm:$0xf] }
 0x298   :  { %v6981_v29 = vld [vmem:[#allocation8 + $0xd18] sm:$0xf]  ;;  %v7238_v37 = vor.u32 %v7922_v56, %v7237_v57  ;;  %4712 = vmatpush.bf16.msrb.mxu1 %v6630_v60  ;;  %4750 = vmatpush.bf16.msrb.mxu3 %v5386_v5  ;;  %v5703_v56 = vld [vmem:[#allocation8 + $0x338] sm:$0xf0] }
 0x299   :  { %v7858_v32 = vld [vmem:[#allocation8 + $0xd34] sm:$0xf0]  ;;  %v7614_v5 = vld [vmem:[#allocation8 + $0x59c] sm:$0xf] }
 0x29a   :  { %v6597_v21 = vld [vmem:[#allocation8 + $0xa18] sm:$0xf]  ;;  %v6982_v41 = vor.u32 %v7858_v32, %v6981_v29  ;;  %4735 = vmatpush.bf16.msra.mxu0 %v7238_v37  ;;  %v4482_v32 = vadd.f32 %v4481_v48, %v4469_v24  ;;  %v7686_v37 = vld [vmem:[#allocation8 + $0x7dc] sm:$0xf]  ;;  %v6506_v24 = vor.u32 %v7734_v14, %v6503_v44 }
 0x29b   :  { %v7762_v35 = vld [vmem:[#allocation8 + $0xa34] sm:$0xf0]  ;;  %v7526_v48 = vld [vmem:[#allocation8 + $0x2dc] sm:$0xf]  ;;  %v6314_v34 = vor.u32 %v7686_v37, %v6311_v38 }
 0x29c   :  { %v7205_v43 = vld [vmem:[#allocation8 + $0xed8] sm:$0xf]  ;;  %v6598_v51 = vor.u32 %v7762_v35, %v6597_v21  ;;  %4722 = vmatpush.bf16.msrb.mxu2 %v6982_v41  ;;  %v7750_v35 = vld [vmem:[#allocation8 + $0x9dc] sm:$0xf]  ;;  %4751 = vmatpush.bf16.msrb.mxu3 %v5354_v25  ;;  %v4495_v40 = vadd.f32 %v4494_v11, %v4482_v32  ;;  %v5706_v41 = vor.u32 %v7534_v28, %v5703_v56  ;;  %v4470_v58 = vpop.f32.mrf.mxu2 }
 0x29d   :  { %v7914_v45 = vld [vmem:[#allocation8 + $0xef4] sm:$0xf0]  ;;  %v7518_v11 = vld [vmem:[#allocation8 + $0x29c] sm:$0xf] }
 0x29e   :  { %v6949_v53 = vld [vmem:[#allocation8 + $0xcd8] sm:$0xf]  ;;  %v7206_v54 = vor.u32 %v7914_v45, %v7205_v43  ;;  %4713 = vmatpush.bf16.msrb.mxu1 %v6598_v51  ;;  %v7622_v43 = vld [vmem:[#allocation8 + $0x5dc] sm:$0xf]  ;;  %v4496_v51 = vpop.f32.mrf.mxu3 }
 0x29f   :  { %v7850_v46 = vld [vmem:[#allocation8 + $0xcf4] sm:$0xf0]  ;;  %v6055_v45 = vld [vmem:[#allocation8 + $0x5f8] sm:$0xf0] }
 0x2a0   :  { %v6950_v0 = vor.u32 %v7850_v46, %v6949_v53  ;;  %v7173_v1 = vld [vmem:[#allocation8 + $0xe98] sm:$0xf]  ;;  %4736 = vmatpush.bf16.msra.mxu0 %v7206_v54  ;;  %v6570_v46 = vor.u32 %v7750_v35, %v6567_v36  ;;  %v7742_v54 = vld [vmem:[#allocation8 + $0x99c] sm:$0xf]  ;;  %4752 = vmatpush.bf16.msrb.mxu3 %v5322_v42 }
 0x2a1   :  { %v7906_v9 = vld [vmem:[#allocation8 + $0xeb4] sm:$0xf0]  ;;  %4714 = vmatmul.bf16.vlgmr.msrb.gmra.mxu1 %v8218_v18  ;;  %v6538_v7 = vor.u32 %v7742_v54, %v6535_v55  ;;  %v5607_v25 = vld [vmem:[#allocation8 + $0x278] sm:$0xf0] }
 0x2a2   :  { %v6917_v3 = vld [vmem:[#allocation8 + $0xc98] sm:$0xf]  ;;  %4758 = vmatpush.bf16.msra.mxu1 %v5802_v50  ;;  %v7174_v12 = vor.u32 %v7906_v9, %v7173_v1  ;;  %4723 = vmatpush.bf16.msrb.mxu2 %v6950_v0  ;;  %v6058_v0 = vor.u32 %v7622_v43, %v6055_v45  ;;  %v7678_v1 = vld [vmem:[#allocation8 + $0x79c] sm:$0xf] }
 0x2a3   :  { %v7842_v4 = vld [vmem:[#allocation8 + $0xcb4] sm:$0xf0]  ;;  %v6279_v9 = vld [vmem:[#allocation8 + $0x7b8] sm:$0xf0]  ;;  %4753 = vmatmul.bf16.vlgmr.msrb.gmra.mxu3 %v8196_v47  ;;  %v4509_v47 = vpop.f32.mrf.mxu1 }
 0x2a4   :  { %v6918_v16 = vor.u32 %v7842_v4, %v6917_v3  ;;  %v7141_v19 = vld [vmem:[#allocation8 + $0xe58] sm:$0xf]  ;;  %4737 = vmatpush.bf16.msra.mxu0 %v7174_v12  ;;  %v8325_v3 = vadd.f32 %v4507_v62, %v4495_v40  ;;  %v5674_v4 = vor.u32 %v7526_v48, %v5671_v49  ;;  %4797 = vmatpush.bf16.msra.mxu3 %v6570_v46  ;;  %v5639_v12 = vld [vmem:[#allocation8 + $0x2b8] sm:$0xf0]  ;;  %v4533_v46 = vpop.f32.mrf.mxu0 }
 0x2a5   :  { %v7898_v31 = vld [vmem:[#allocation8 + $0xe74] sm:$0xf0]  ;;  %v6282_v13 = vor.u32 %v7678_v1, %v6279_v9  ;;  %v5642_v20 = vor.u32 %v7518_v11, %v5639_v12  ;;  %v6215_v56 = vld [vmem:[#allocation8 + $0x738] sm:$0xf0] }
 0x2a6   :  { %v6885_v22 = vld [vmem:[#allocation8 + $0xc58] sm:$0xf]  ;;  %4759 = vmatpush.bf16.msra.mxu1 %v5770_v6  ;;  %v7142_v57 = vor.u32 %v7898_v31, %v7141_v19  ;;  %4724 = vmatpush.bf16.msrb.mxu2 %v6918_v16  ;;  %v6023_v6 = vld [vmem:[#allocation8 + $0x5b8] sm:$0xf0]  ;;  %v4546_v11 = vpop.f32.mrf.mxu3 }
 0x2a7   :  { %v7834_v23 = vld [vmem:[#allocation8 + $0xc74] sm:$0xf0]  ;;  %v6026_v16 = vor.u32 %v7614_v5, %v6023_v6  ;;  %v7670_v19 = vld [vmem:[#allocation8 + $0x75c] sm:$0xf] }
 0x2a8   :  { %v6853_v60 = vld [vmem:[#allocation8 + $0xc18] sm:$0xf]  ;;  %v6886_v33 = vor.u32 %v7834_v23, %v6885_v22  ;;  %4738 = vmatpush.bf16.msra.mxu0 %v7142_v57  ;;  %v6247_v31 = vld [vmem:[#allocation8 + $0x778] sm:$0xf0]  ;;  %4798 = vmatpush.bf16.msra.mxu3 %v6538_v7 }
 0x2a9   :  { %v7109_v29 = vld [vmem:[#allocation8 + $0xe18] sm:$0xf]  ;;  %v7606_v22 = vld [vmem:[#allocation8 + $0x55c] sm:$0xf] }
 0x2aa   :  { %v7890_v21 = vld [vmem:[#allocation8 + $0xe34] sm:$0xf0]  ;;  %4760 = vmatpush.bf16.msra.mxu1 %v5738_v26  ;;  %4725 = vmatpush.bf16.msrb.mxu2 %v6886_v33  ;;  %v5991_v23 = vld [vmem:[#allocation8 + $0x578] sm:$0xf0]  ;;  %v6250_v26 = vor.u32 %v7670_v19, %v6247_v31  ;;  %v6474_v33 = vor.u32 %v7726_v59, %v6471_v15 }
 0x2ab   :  { %v7826_v63 = vld [vmem:[#allocation8 + $0xc34] sm:$0xf0]  ;;  %v7110_v53 = vor.u32 %v7890_v21, %v7109_v29  ;;  %v5994_v28 = vor.u32 %v7606_v22, %v5991_v23  ;;  %v7662_v57 = vld [vmem:[#allocation8 + $0x71c] sm:$0xf] }
 0x2ac   :  { %v6854_v50 = vor.u32 %v7826_v63, %v6853_v60  ;;  %v5610_v60 = vor.u32 %v7510_v27, %v5607_v25  ;;  %v7598_v29 = vld [vmem:[#allocation8 + $0x51c] sm:$0xf]  ;;  %4799 = vmatpush.bf16.msra.mxu3 %v6506_v24  ;;  %v6218_v63 = vor.u32 %v7662_v57, %v6215_v56  ;;  %v4006_v24 = vperm.slane %v8307_v61, 2  ;;  %v4535_v25 = vpop.f32.mrf.mxu0 }
 0x2ad   :  { %4739 = vmatpush.bf16.msra.mxu0 %v7110_v53  ;;  %v5959_v32 = vld [vmem:[#allocation8 + $0x538] sm:$0xf0] }
 0x2ae   :  { %4761 = vmatpush.bf16.msra.mxu1 %v5706_v41  ;;  %4726 = vmatpush.bf16.msrb.mxu2 %v6854_v50  ;;  %v7502_v21 = vld [vmem:[#allocation8 + $0x21c] sm:$0xf]  ;;  %v5962_v42 = vor.u32 %v7598_v29, %v5959_v32 }
 0x2af   :  { %v5575_v35 = vld [vmem:[#allocation8 + $0x238] sm:$0xf0] }
 0x2b0   :  { %4740 = vmatmul.bf16.vlgmr.msra.gmra.mxu0 %v8224_v8  ;;  %v7718_v36 = vld [vmem:[#allocation8 + $0x8dc] sm:$0xf]  ;;  %v5578_v45 = vor.u32 %v7502_v21, %v5575_v35  ;;  %4800 = vmatpush.bf16.msra.mxu3 %v6474_v33 }
 0x2b1   :  { %4784 = vmatpush.bf16.msrb.mxu0 %v6314_v34  ;;  %4727 = vmatmul.bf16.vlgmr.msrb.gmra.mxu2 %v8226_v17  ;;  %v6439_v37 = vld [vmem:[#allocation8 + $0x8f8] sm:$0xf0] }
 0x2b2   :  { %4771 = vmatpush.bf16.msra.mxu2 %v6058_v0  ;;  %4762 = vmatpush.bf16.msra.mxu1 %v5674_v4  ;;  %v7814_v38 = vld [vmem:[#allocation8 + $0xbdc] sm:$0xf]  ;;  %v6442_v48 = vor.u32 %v7718_v36, %v6439_v37 }
 0x2b3   :  { %v6823_v40 = vld [vmem:[#allocation8 + $0xbf8] sm:$0xf0] }
 0x2b4   :  { %v7654_v41 = vld [vmem:[#allocation8 + $0x6dc] sm:$0xf]  ;;  %v6826_v49 = vor.u32 %v7814_v38, %v6823_v40  ;;  %4801 = vmatpush.bf16.msra.mxu3 %v6442_v48  ;;  %v4548_v40 = vpop.f32.mrf.mxu3  ;;  %v4559_v48 = vpop.f32.mrf.mxu1 }
 0x2b5   :  { %4785 = vmatpush.bf16.msrb.mxu0 %v6282_v13  ;;  %v6183_v43 = vld [vmem:[#allocation8 + $0x6f8] sm:$0xf0] }
 0x2b6   :  { %4772 = vmatpush.bf16.msra.mxu2 %v6026_v16  ;;  %4763 = vmatpush.bf16.msra.mxu1 %v5642_v20  ;;  %v7590_v51 = vld [vmem:[#allocation8 + $0x4dc] sm:$0xf]  ;;  %v6186_v34 = vor.u32 %v7654_v41, %v6183_v43  ;;  %v4520_v20 = vpop.f32.mrf.mxu2 }
 0x2b7   :  { %v5927_v53 = vld [vmem:[#allocation8 + $0x4f8] sm:$0xf0]  ;;  %v4521_v27 = vadd.f32 %v4520_v20, %v8325_v3 }
 0x2b8   :  { %v7710_v50 = vld [vmem:[#allocation8 + $0x89c] sm:$0xf]  ;;  %v5930_v62 = vor.u32 %v7590_v51, %v5927_v53 }
 0x2b9   :  { %4786 = vmatpush.bf16.msrb.mxu0 %v6250_v26  ;;  %v6407_v54 = vld [vmem:[#allocation8 + $0x8b8] sm:$0xf0]  ;;  %v8333_v56 = vadd.f32 %v4533_v46, %v4521_v27 }
 0x2ba   :  { %4773 = vmatpush.bf16.msra.mxu2 %v5994_v28  ;;  %4764 = vmatpush.bf16.msra.mxu1 %v5610_v60  ;;  %v7806_v55 = vld [vmem:[#allocation8 + $0xb9c] sm:$0xf]  ;;  %v6410_v5 = vor.u32 %v7710_v50, %v6407_v54 }
 0x2bb   :  { %v6791_v58 = vld [vmem:[#allocation8 + $0xbb8] sm:$0xf0] }
 0x2bc   :  { %v7646_v0 = vld [vmem:[#allocation8 + $0x69c] sm:$0xf]  ;;  %v6794_v6 = vor.u32 %v7806_v55, %v6791_v58  ;;  %4802 = vmatpush.bf16.msra.mxu3 %v6410_v5 }
 0x2bd   :  { %4787 = vmatpush.bf16.msrb.mxu0 %v6218_v63  ;;  %v6151_v1 = vld [vmem:[#allocation8 + $0x6b8] sm:$0xf0] }
 0x2be   :  { %4774 = vmatpush.bf16.msra.mxu2 %v5962_v42  ;;  %4765 = vmatpush.bf16.msra.mxu1 %v5578_v45  ;;  %v7582_v9 = vld [vmem:[#allocation8 + $0x49c] sm:$0xf]  ;;  %v6154_v12 = vor.u32 %v7646_v0, %v6151_v1  ;;  %v4547_v45 = vadd.f32 %v4546_v11, %v4006_v24  ;;  %v4522_v46 = vpop.f32.mrf.mxu2 }
 0x2bf   :  { %v5895_v4 = vld [vmem:[#allocation8 + $0x4b8] sm:$0xf0] }
 0x2c0   :  { %v7702_v7 = vld [vmem:[#allocation8 + $0x85c] sm:$0xf]  ;;  %v5898_v16 = vor.u32 %v7582_v9, %v5895_v4  ;;  %v8335_v54 = vadd.f32 %v4559_v48, %v4547_v45 }
 0x2c1   :  { %4788 = vmatpush.bf16.msrb.mxu0 %v6186_v34  ;;  %v6375_v13 = vld [vmem:[#allocation8 + $0x878] sm:$0xf0]  ;;  %4766 = vmatmul.bf16.vlgmr.msra.gmra.mxu1 %v8200_v10 }
 0x2c2   :  { %4810 = vmatpush.bf16.msrb.mxu1 %v6826_v49  ;;  %v7798_v14 = vld [vmem:[#allocation8 + $0xb5c] sm:$0xf]  ;;  %4775 = vmatpush.bf16.msra.mxu2 %v5930_v62  ;;  %v6378_v26 = vor.u32 %v7702_v7, %v6375_v13 }
 0x2c3   :  { %v6759_v44 = vld [vmem:[#allocation8 + $0xb78] sm:$0xf0] }
 0x2c4   :  { %v7638_v19 = vld [vmem:[#allocation8 + $0x65c] sm:$0xf]  ;;  %v6762_v59 = vor.u32 %v7798_v14, %v6759_v44  ;;  %4803 = vmatpush.bf16.msra.mxu3 %v6378_v26 }
 0x2c5   :  { %v6119_v31 = vld [vmem:[#allocation8 + $0x678] sm:$0xf0]  ;;  %4789 = vmatpush.bf16.msrb.mxu0 %v6154_v12 }
 0x2c6   :  { %v7574_v22 = vld [vmem:[#allocation8 + $0x45c] sm:$0xf]  ;;  %4811 = vmatpush.bf16.msrb.mxu1 %v6794_v6  ;;  %v6122_v47 = vor.u32 %v7638_v19, %v6119_v31  ;;  %4776 = vmatpush.bf16.msra.mxu2 %v5898_v16  ;;  %v4561_v16 = vpop.f32.mrf.mxu1 }
 0x2c7   :  { %v5863_v23 = vld [vmem:[#allocation8 + $0x478] sm:$0xf0] }
 0x2c8   :  { %v7694_v15 = vld [vmem:[#allocation8 + $0x81c] sm:$0xf]  ;;  %v5866_v60 = vor.u32 %v7574_v22, %v5863_v23 }
 0x2c9   :  { %v6343_v28 = vld [vmem:[#allocation8 + $0x838] sm:$0xf0]  ;;  %4790 = vmatpush.bf16.msrb.mxu0 %v6122_v47 }
 0x2ca   :  { %v7790_v10 = vld [vmem:[#allocation8 + $0xb1c] sm:$0xf]  ;;  %4812 = vmatpush.bf16.msrb.mxu1 %v6762_v59  ;;  %v6346_v36 = vor.u32 %v7694_v15, %v6343_v28  ;;  %4777 = vmatpush.bf16.msra.mxu2 %v5866_v60  ;;  %v4585_v28 = vpop.f32.mrf.mxu0 }
 0x2cb   :  { %v6727_v57 = vld [vmem:[#allocation8 + $0xb38] sm:$0xf0] }
 0x2cc   :  { %v7566_v29 = vld [vmem:[#allocation8 + $0x41c] sm:$0xf]  ;;  %v6730_v63 = vor.u32 %v7790_v10, %v6727_v57  ;;  %4804 = vmatpush.bf16.msra.mxu3 %v6346_v36 }
 0x2cd   :  { %v7630_v32 = vld [vmem:[#allocation8 + $0x61c] sm:$0xf] }
 0x2ce   :  { %v6087_v33 = vld [vmem:[#allocation8 + $0x638] sm:$0xf0]  ;;  %4813 = vmatpush.bf16.msrb.mxu1 %v6730_v63 }
 0x2cf   :  { %v5831_v21 = vld [vmem:[#allocation8 + $0x438] sm:$0xf0]  ;;  %v6090_v42 = vor.u32 %v7630_v32, %v6087_v33  ;;  %4805 = vmatmul.bf16.vlgmr.msra.gmra.mxu3 %v8214_v39 }
 0x2d0   :  { %v7942_v3 = vld [vmem:[#allocation8 + $0xfdc] sm:$0xf]  ;;  %v5834_v51 = vor.u32 %v7566_v29, %v5831_v21  ;;  %v4598_v21 = vpop.f32.mrf.mxu3 }
 0x2d1   :  { %v7335_v35 = vld [vmem:[#allocation8 + $0xff8] sm:$0xf0]  ;;  %4791 = vmatpush.bf16.msrb.mxu0 %v6090_v42 }
 0x2d2   :  { %v7878_v37 = vld [vmem:[#allocation8 + $0xddc] sm:$0xf]  ;;  %v7338_v53 = vor.u32 %v7942_v3, %v7335_v35  ;;  %4778 = vmatpush.bf16.msra.mxu2 %v5834_v51 }
 0x2d3   :  { %v7079_v38 = vld [vmem:[#allocation8 + $0xdf8] sm:$0xf0] }
 0x2d4   :  { %v7782_v41 = vld [vmem:[#allocation8 + $0xadc] sm:$0xf]  ;;  %v7082_v49 = vor.u32 %v7878_v37, %v7079_v38  ;;  %4792 = vmatmul.bf16.vlgmr.msrb.gmra.mxu0 %v8211_v52  ;;  %v4572_v37 = vpop.f32.mrf.mxu2 }
 0x2d5   :  { %v6695_v43 = vld [vmem:[#allocation8 + $0xaf8] sm:$0xf0]  ;;  %4836 = vmatpush.bf16.msra.mxu0 %v7338_v53  ;;  %4779 = vmatmul.bf16.vlgmr.msra.gmra.mxu2 %v8203_v30  ;;  %v4573_v42 = vadd.f32 %v4572_v37, %v8335_v54 }
 0x2d6   :  { %v7934_v50 = vld [vmem:[#allocation8 + $0xf9c] sm:$0xf]  ;;  %v6698_v55 = vor.u32 %v7782_v41, %v6695_v43  ;;  %4823 = vmatpush.bf16.msrb.mxu2 %v7082_v49  ;;  %v4587_v41 = vpop.f32.mrf.mxu0 }
 0x2d7   :  { %v7303_v34 = vld [vmem:[#allocation8 + $0xfb8] sm:$0xf0]  ;;  %v4586_v45 = vadd.f32 %v4585_v28, %v4573_v42  ;;  %v4008_v42 = vperm.slane %v8307_v61, 6 }
 0x2d8   :  { %v7870_v58 = vld [vmem:[#allocation8 + $0xd9c] sm:$0xf]  ;;  %v7306_v9 = vor.u32 %v7934_v50, %v7303_v34  ;;  %4814 = vmatpush.bf16.msrb.mxu1 %v6698_v55 }
 0x2d9   :  { %v7047_v62 = vld [vmem:[#allocation8 + $0xdb8] sm:$0xf0]  ;;  %v4599_v50 = vadd.f32 %v4598_v21, %v4586_v45 }
 0x2da   :  { %v7774_v0 = vld [vmem:[#allocation8 + $0xa9c] sm:$0xf]  ;;  %v7050_v4 = vor.u32 %v7870_v58, %v7047_v62  ;;  %4837 = vmatpush.bf16.msra.mxu0 %v7306_v9  ;;  %v4611_v62 = vpop.f32.mrf.mxu1 }
 0x2db   :  { %v6663_v1 = vld [vmem:[#allocation8 + $0xab8] sm:$0xf0] }
 0x2dc   :  { %v7926_v5 = vld [vmem:[#allocation8 + $0xf5c] sm:$0xf]  ;;  %v6666_v7 = vor.u32 %v7774_v0, %v6663_v1  ;;  %4824 = vmatpush.bf16.msrb.mxu2 %v7050_v4  ;;  %v4574_v58 = vpop.f32.mrf.mxu2  ;;  %v4612_v0 = vadd.f32 %v4611_v62, %v4599_v50 }
 0x2dd   :  { %v7271_v6 = vld [vmem:[#allocation8 + $0xf78] sm:$0xf0] }
 0x2de   :  { %v7862_v11 = vld [vmem:[#allocation8 + $0xd5c] sm:$0xf]  ;;  %v7274_v44 = vor.u32 %v7926_v5, %v7271_v6  ;;  %4815 = vmatpush.bf16.msrb.mxu1 %v6666_v7  ;;  %v4007_v7 = vperm.slane %v8307_v61, 4 }
 0x2df   :  { %v7015_v12 = vld [vmem:[#allocation8 + $0xd78] sm:$0xf0] }
 0x2e0   :  { %v7766_v13 = vld [vmem:[#allocation8 + $0xa5c] sm:$0xf]  ;;  %v7018_v19 = vor.u32 %v7862_v11, %v7015_v12  ;;  %4838 = vmatpush.bf16.msra.mxu0 %v7274_v44  ;;  %v4860_v12 = vrot.slane %v8333_v56, 4 }
 0x2e1   :  { %v6631_v14 = vld [vmem:[#allocation8 + $0xa78] sm:$0xf0]  ;;  %v4637_v1 = vpop.f32.mrf.mxu0 }
 0x2e2   :  { %v7918_v31 = vld [vmem:[#allocation8 + $0xf1c] sm:$0xf]  ;;  %v6634_v20 = vor.u32 %v7766_v13, %v6631_v14  ;;  %4825 = vmatpush.bf16.msrb.mxu2 %v7018_v19  ;;  %v4613_v54 = vpop.f32.mrf.mxu1 }
 0x2e3   :  { %v7239_v39 = vld [vmem:[#allocation8 + $0xf38] sm:$0xf0] }
 0x2e4   :  { %v7854_v22 = vld [vmem:[#allocation8 + $0xd1c] sm:$0xf]  ;;  %v7242_v27 = vor.u32 %v7918_v31, %v7239_v39  ;;  %4816 = vmatpush.bf16.msrb.mxu1 %v6634_v20 }
 0x2e5   :  { %v6983_v23 = vld [vmem:[#allocation8 + $0xd38] sm:$0xf0] }
 0x2e6   :  { %v7758_v52 = vld [vmem:[#allocation8 + $0xa1c] sm:$0xf]  ;;  %v6986_v25 = vor.u32 %v7854_v22, %v6983_v23  ;;  %4839 = vmatpush.bf16.msra.mxu0 %v7242_v27 }
 0x2e7   :  { %v6599_v24 = vld [vmem:[#allocation8 + $0xa38] sm:$0xf0] }
 0x2e8   :  { %v7910_v30 = vld [vmem:[#allocation8 + $0xedc] sm:$0xf]  ;;  %v6602_v59 = vor.u32 %v7758_v52, %v6599_v24  ;;  %4826 = vmatpush.bf16.msrb.mxu2 %v6986_v25  ;;  %v4624_v4 = vpop.f32.mrf.mxu2 }
 0x2e9   :  { %v7207_v26 = vld [vmem:[#allocation8 + $0xef8] sm:$0xf0]  ;;  %v4625_v5 = vadd.f32 %v4624_v4, %v4612_v0  ;;  %v4639_v6 = vpop.f32.mrf.mxu0 }
 0x2ea   :  { %v7846_v15 = vld [vmem:[#allocation8 + $0xcdc] sm:$0xf]  ;;  %v7210_v10 = vor.u32 %v7910_v30, %v7207_v26  ;;  %4817 = vmatpush.bf16.msrb.mxu1 %v6602_v59 }
 0x2eb   :  { %v6951_v47 = vld [vmem:[#allocation8 + $0xcf8] sm:$0xf0]  ;;  %v4638_v11 = vadd.f32 %v4637_v1, %v4625_v5 }
 0x2ec   :  { %v6954_v57 = vor.u32 %v7846_v15, %v6951_v47  ;;  %v7902_v60 = vld [vmem:[#allocation8 + $0xe9c] sm:$0xf]  ;;  %4840 = vmatpush.bf16.msra.mxu0 %v7210_v10 }
 0x2ed   :  { %v7175_v29 = vld [vmem:[#allocation8 + $0xeb8] sm:$0xf0]  ;;  %4818 = vmatmul.bf16.vlgmr.msrb.gmra.mxu1 %v8218_v18  ;;  %v4600_v18 = vpop.f32.mrf.mxu3  ;;  %v4861_v13 = vrot.slane %v4638_v11, 3 }
 0x2ee   :  { %v7838_v32 = vld [vmem:[#allocation8 + $0xc9c] sm:$0xf]  ;;  %v7178_v3 = vor.u32 %v7902_v60, %v7175_v29  ;;  %4827 = vmatpush.bf16.msrb.mxu2 %v6954_v57 }
 0x2ef   :  { %v6919_v33 = vld [vmem:[#allocation8 + $0xcb8] sm:$0xf0]  ;;  %v4871_v16 = vsel %vm4870_vm4, %v4860_v12, %v4861_v13 }
 0x2f0   :  { %v6922_v35 = vor.u32 %v7838_v32, %v6919_v33  ;;  %v7894_v36 = vld [vmem:[#allocation8 + $0xe5c] sm:$0xf]  ;;  %4841 = vmatpush.bf16.msra.mxu0 %v7178_v3  ;;  %v4626_v19 = vpop.f32.mrf.mxu2 }
 0x2f1   :  { %v7143_v63 = vld [vmem:[#allocation8 + $0xe78] sm:$0xf0] }
 0x2f2   :  { %v7830_v38 = vld [vmem:[#allocation8 + $0xc5c] sm:$0xf]  ;;  %v7146_v43 = vor.u32 %v7894_v36, %v7143_v63  ;;  %4828 = vmatpush.bf16.msrb.mxu2 %v6922_v35 }
 0x2f3   :  { %v6887_v40 = vld [vmem:[#allocation8 + $0xc78] sm:$0xf0] }
 0x2f4   :  { %v6890_v51 = vor.u32 %v7830_v38, %v6887_v40  ;;  %v7886_v53 = vld [vmem:[#allocation8 + $0xe1c] sm:$0xf]  ;;  %4842 = vmatpush.bf16.msra.mxu0 %v7146_v43 }
 0x2f5   :  { %v7111_v46 = vld [vmem:[#allocation8 + $0xe38] sm:$0xf0]  ;;  %v4650_v9 = vpop.f32.mrf.mxu3 }
 0x2f6   :  { %v7822_v48 = vld [vmem:[#allocation8 + $0xc1c] sm:$0xf]  ;;  %v7114_v34 = vor.u32 %v7886_v53, %v7111_v46  ;;  %4829 = vmatpush.bf16.msrb.mxu2 %v6890_v51  ;;  %v4651_v44 = vadd.f32 %v4650_v9, %v4007_v7 }
 0x2f7   :  { %v6855_v49 = vld [vmem:[#allocation8 + $0xc38] sm:$0xf0] }
 0x2f8   :  { %v6858_v55 = vor.u32 %v7822_v48, %v6855_v49  ;;  %4843 = vmatpush.bf16.msra.mxu0 %v7114_v34 }
 0x2fa   :  { %4830 = vmatpush.bf16.msrb.mxu2 %v6858_v55 }
 0x2fb   :  { %4844 = vmatmul.bf16.vlgmr.msra.gmra.mxu0 %v8224_v8  ;;  %v4663_v8 = vpop.f32.mrf.mxu1 }
 0x2fc   :  { %v4664_v31 = vadd.f32 %v4663_v8, %v4651_v44 }
 0x2fd   :  { %4831 = vmatmul.bf16.vlgmr.msrb.gmra.mxu2 %v8226_v17  ;;  %v4652_v14 = vpop.f32.mrf.mxu3 }
 0x303   :  { %v4665_v17 = vpop.f32.mrf.mxu1 }
 0x305   :  { %v4689_v39 = vpop.f32.mrf.mxu0 }
 0x306   :  { %v4702_v20 = vpop.f32.mrf.mxu3 }
 0x30c   :  { %v4676_v22 = vpop.f32.mrf.mxu2 }
 0x30d   :  { %v4677_v23 = vadd.f32 %v4676_v22, %v4664_v31  ;;  %v4691_v52 = vpop.f32.mrf.mxu0 }
 0x30e   :  { %v4704_v25 = vpop.f32.mrf.mxu3 }
 0x30f   :  { %v4690_v24 = vadd.f32 %v4689_v39, %v4677_v23 }
 0x311   :  { %v4703_v27 = vadd.f32 %v4702_v20, %v4690_v24 }
 0x314   :  { %v4678_v30 = vpop.f32.mrf.mxu2 }
 0x31e   :  { %v4715_v26 = vpop.f32.mrf.mxu1 }
 0x31f   :  { %v4716_v59 = vadd.f32 %v4715_v26, %v4703_v27 }
 0x326   :  { %v4717_v56 = vpop.f32.mrf.mxu1  ;;  %v4754_v47 = vpop.f32.mrf.mxu3 }
 0x327   :  { %v4755_v41 = vadd.f32 %v4754_v47, %v4008_v42 }
 0x32d   :  { %v4741_v15 = vpop.f32.mrf.mxu0 }
 0x32e   :  { %v4756_v29 = vpop.f32.mrf.mxu3 }
 0x334   :  { %v4728_v28 = vpop.f32.mrf.mxu2 }
 0x335   :  { %v4729_v10 = vadd.f32 %v4728_v28, %v4716_v59  ;;  %v4743_v57 = vpop.f32.mrf.mxu0 }
 0x337   :  { %v4742_v60 = vadd.f32 %v4741_v15, %v4729_v10 }
 0x339   :  { %v4862_v58 = vrot.slane %v4742_v60, 2 }
 0x33c   :  { %v4730_v32 = vpop.f32.mrf.mxu2 }
 0x33e   :  { %v4767_v33 = vpop.f32.mrf.mxu1 }
 0x33f   :  { %v4768_v43 = vadd.f32 %v4767_v33, %v4755_v41 }
 0x346   :  { %v4769_v21 = vpop.f32.mrf.mxu1 }
 0x351   :  { %v4793_v3 = vpop.f32.mrf.mxu0 }
 0x352   :  { %v4806_v35 = vpop.f32.mrf.mxu3 }
 0x358   :  { %v4780_v36 = vpop.f32.mrf.mxu2 }
 0x359   :  { %v4795_v63 = vpop.f32.mrf.mxu0  ;;  %v4781_v51 = vadd.f32 %v4780_v36, %v4768_v43 }
 0x35a   :  { %v4808_v37 = vpop.f32.mrf.mxu3 }
 0x35b   :  { %v4794_v53 = vadd.f32 %v4793_v3, %v4781_v51 }
 0x35d   :  { %v4807_v48 = vadd.f32 %v4806_v35, %v4794_v53 }
 0x360   :  { %v4782_v38 = vpop.f32.mrf.mxu2 }
 0x36a   :  { %v4819_v40 = vpop.f32.mrf.mxu1 }
 0x36b   :  { %v4820_v49 = vadd.f32 %v4819_v40, %v4807_v48 }
 0x372   :  { %v4821_v45 = vpop.f32.mrf.mxu1 }
 0x378   :  { %v4845_v46 = vpop.f32.mrf.mxu0 }
 0x380   :  { %v4832_v50 = vpop.f32.mrf.mxu2  ;;  %v4847_v34 = vpop.f32.mrf.mxu0 }
 0x381   :  { %v4833_v18 = vadd.f32 %v4832_v50, %v4820_v49 }
 0x383   :  { %v4846_v55 = vadd.f32 %v4845_v46, %v4833_v18 }
 0x385   :  { %v4863_v62 = vrot.slane %v4846_v55, 1 }
 0x387   :  { %v4873_v61 = vsel %vm4872_vm5, %v4862_v58, %v4863_v62 }
 0x388   :  { %v4834_v0 = vpop.f32.mrf.mxu2  ;;  %v4875_v54 = vsel %vm4874_vm6, %v4871_v16, %v4873_v61 }
 0x389   :  { %v4877_v1 = vsel %vm4876_vm7, %v8316_v2, %v4875_v54 }
 0x38a   :  { %4879 = vst [vmem:[#allocation11] sm:$0xff] %v4877_v1 }
 0x38b   :  { %4890 = dma.vmem_to_hbm [thread:$0]  %s4886_s4, 128, %s4888_s19, [#allocation4]  }
 0x38c   :  { %8106 = dma.done.wait [#allocation4], 128  }
 0x38d   :  { %8107 = vsyncadd [#allocation4], 4294967168 }
 0x38e   :  { %4895 = vsyncpa [#allocation3], 1 }
 0x38f   :  { %4896 = vsyncpa [#allocation6], 1 }
 0x390   :  { %4897 = vsyncpa [#allocation9], 1 }
 0x391   :  { %4898 = vsyncpa [#allocation4], 1 }

</bundles_post_ra>
